<compile_context>
chip_gen: v7x
topology: tpu7x:2x2x1
jax: 0.10.0
libtpu: 0.0.40
codegen_flags: <defaults>
</compile_context>

<pallas_src>
import functools

import numpy as np
import jax
import jax.numpy as jnp
from jax.experimental import pallas as pl
from jax.experimental.pallas import tpu as pltpu


# ----------------------------------------------------------------------------
# Pallas kernel: BATCH_TILE samples per grid step, full network fused.
# ----------------------------------------------------------------------------
def _wavenet_kernel(x_ref, cw_ref, dw_ref, rw_ref, rb_ref, sw_ref, sb_ref,
                    f1w_ref, f1b_ref, f2w_ref, f2b_ref,
                    out_ref, *, dilations, out_size):
    f32 = jnp.float32
    bt, T, cin = x_ref.shape
    cres = rw_ref.shape[-1]
    cdt = cw_ref.dtype                           # MXU input dtype (bf16 or f32)

    x = x_ref[...]                               # (bt, T, cin)

    # Causal conv: Conv1d(k=2, padding=1, no bias) then [:, :, :-1]
    #   h[t] = x[t-1] @ W0 + x[t] @ W1   (x[-1] == 0)
    # Taps fused: [x_prev | x] @ [W0 ; W1]  -> single matmul, K = 2*cin.
    xprev = jnp.concatenate(
        [jnp.zeros((bt, 1, cin), cdt), x[:, :T - 1, :]], axis=1)
    xcat = jnp.concatenate(
        [xprev.reshape(bt * T, cin), x.reshape(bt * T, cin)], axis=-1)
    h = jnp.dot(xcat, cw_ref[...], preferred_element_type=f32)   # (bt*T, cres)

    # Residual stack, fixed-length (right-aligned) causal formulation:
    #   z[t] = h[t-d] @ Wd0 + h[t] @ Wd1     (zero pad for t < d)
    # Rows t < sum(dilations so far) are "don't care" (finite) and never reach
    # the final [-out_size:] slice.
    skip_sum = jnp.zeros((bt * T, cin), f32)
    for b, d in enumerate(dilations):            # static unroll over blocks
        h3 = h.astype(cdt).reshape(bt, T, cres)
        hsh = jnp.concatenate(
            [jnp.zeros((bt, d, cres), cdt), h3[:, :T - d, :]], axis=1)
        hcat = jnp.concatenate(
            [hsh.reshape(bt * T, cres), h3.reshape(bt * T, cres)], axis=-1)
        z = jnp.dot(hcat, dw_ref[b], preferred_element_type=f32)  # K = 2*cres
        gated = jnp.tanh(z) * jax.nn.sigmoid(z)                   # f32 gating
        g = gated.astype(cdt)
        res = jnp.dot(g, rw_ref[b], preferred_element_type=f32) + rb_ref[b]
        # Reproduces the reference `x += x[:, :, -x.size(2):]` (self-addition).
        h = res + res
        skip_sum = skip_sum + (
            jnp.dot(g, sw_ref[b], preferred_element_type=f32) + sb_ref[b])

    # FinalConv: relu -> 1x1 conv -> relu -> 1x1 conv -> softmax over channels.
    # Done over the full T slab (aligned); the valid tail is sliced at store.
    v = jnp.maximum(skip_sum, 0.0)
    v = jnp.dot(v.astype(cdt), f1w_ref[...],
                preferred_element_type=f32) + f1b_ref[...]
    v = jnp.maximum(v, 0.0)
    v = jnp.dot(v.astype(cdt), f2w_ref[...],
                preferred_element_type=f32) + f2b_ref[...]
    m = jnp.max(v, axis=-1, keepdims=True)
    e = jnp.exp(v - m)
    inv = pl.reciprocal(jnp.sum(e, axis=-1, keepdims=True), approx=True)
    p3 = (e * inv).reshape(bt, T, cin)
    out_ref[...] = p3[:, T - out_size:, :].astype(out_ref.dtype)


# ----------------------------------------------------------------------------
# Wrapper
# ----------------------------------------------------------------------------
def wavenet_forward(x, params, *, layer_size, stack_size,
                    batch_tile=None, compute_dtype=jnp.bfloat16):
    """x: (B, T, Cin) float32 -> (B, out_size, Cin) float32 (softmax probs)."""
    (cw0, cw1, dw0, dw1, rw, rb, sw, sb, f1w, f1b, f2w, f2b) = params
    B, T, cin = x.shape
    dilations = tuple(2 ** l for l in range(layer_size)) * stack_size
    rf_size = sum(dilations)
    out_size = T - rf_size
    assert out_size >= 1, "Sample size has to be more than receptive field size"

    if batch_tile is None:
        # Keep >= 2 grid steps where possible (feeds both v7x TensorCores).
        batch_tile = B // 2 if (B >= 2 and B % 2 == 0) else B
    assert B % batch_tile == 0

    # Pack the two conv taps along the input-channel (K) axis and cast the
    # matmul weights + activations to the MXU compute dtype (biases stay f32,
    # they are added to the f32 accumulators).
    cw = jnp.concatenate([cw0, cw1], axis=0).astype(compute_dtype)   # (2cin, cres)
    dw = jnp.concatenate([dw0, dw1], axis=1).astype(compute_dtype)   # (nb, 2cres, cres)
    rw_c = rw.astype(compute_dtype)
    sw_c = sw.astype(compute_dtype)
    f1w_c = f1w.astype(compute_dtype)
    f2w_c = f2w.astype(compute_dtype)
    x_c = x.astype(compute_dtype)

    kernel = functools.partial(_wavenet_kernel,
                               dilations=dilations, out_size=out_size)

    def full_spec(arr):
        nd = arr.ndim
        return pl.BlockSpec(arr.shape, lambda b, _nd=nd: (0,) * _nd)

    weights = (cw, dw, rw_c, rb, sw_c, sb, f1w_c, f1b, f2w_c, f2b)
    in_specs = [pl.BlockSpec((batch_tile, T, cin), lambda b: (b, 0, 0))]
    in_specs += [full_spec(a) for a in weights]
    out_specs = pl.BlockSpec((batch_tile, out_size, cin), lambda b: (b, 0, 0))

    grid_spec = pltpu.PrefetchScalarGridSpec(
        num_scalar_prefetch=0,
        grid=(B // batch_tile,),
        in_specs=in_specs,
        out_specs=out_specs,
    )
    return pl.pallas_call(
        kernel,
        out_shape=jax.ShapeDtypeStruct((B, out_size, cin), jnp.float32),
        grid_spec=grid_spec,
        compiler_params=pltpu.CompilerParams(
            dimension_semantics=("parallel",)),
    )(x_c, *weights)


# ----------------------------------------------------------------------------
# Pure-JAX reference (direct translation of the PyTorch forward, f32 math,
# shrinking-window formulation) for a correctness check.
# ----------------------------------------------------------------------------
def wavenet_reference(x, params, *, layer_size, stack_size):
    (cw0, cw1, dw0, dw1, rw, rb, sw, sb, f1w, f1b, f2w, f2b) = params
    dilations = tuple(2 ** l for l in range(layer_size)) * stack_size
    out_size = x.shape[1] - sum(dilations)

    def single(xb):
        T = xb.shape[0]
        xprev = jnp.concatenate(
            [jnp.zeros((1, xb.shape[1]), xb.dtype), xb[:-1]], axis=0)
        h = xprev @ cw0 + xb @ cw1
        skip_sum = jnp.zeros((out_size, sw.shape[-1]), jnp.float32)
        cur = T
        for b, d in enumerate(dilations):
            new = cur - d
            z = h[:new] @ dw0[b] + h[d:cur] @ dw1[b]
            gated = jnp.tanh(z) * jax.nn.sigmoid(z)
            res = gated @ rw[b] + rb[b]
            h = res + res
            skip = gated @ sw[b] + sb[b]
            skip_sum = skip_sum + skip[new - out_size:]
            cur = new
        v = jnp.maximum(skip_sum, 0.0)
        v = v @ f1w + f1b
        v = jnp.maximum(v, 0.0)
        v = v @ f2w + f2b
        return jax.nn.softmax(v, axis=-1)

    return jax.vmap(single)(x)


# ----------------------------------------------------------------------------
# Deterministic parameter construction (synthetic, shapes match the module)
# ----------------------------------------------------------------------------
def make_params(key, *, layer_size, stack_size, in_channels, res_channels):
    nb = layer_size * stack_size
    ks = jax.random.split(key, 16)

    def w(k, shape, fan_in):
        return jax.random.normal(k, shape, jnp.float32) / np.sqrt(fan_in)

    # Conv1d weight [Cout, Cin, K] is stored here as per-tap [Cin, Cout] mats.
    cw0 = w(ks[0], (in_channels, res_channels), 2 * in_channels)
    cw1 = w(ks[1], (in_channels, res_channels), 2 * in_channels)
    dw0 = w(ks[2], (nb, res_channels, res_channels), 2 * res_channels)
    dw1 = w(ks[3], (nb, res_channels, res_channels), 2 * res_channels)
    rw = w(ks[4], (nb, res_channels, res_channels), res_channels)
    rb = 0.05 * jax.random.normal(ks[5], (nb, 1, res_channels), jnp.float32)
    sw = w(ks[6], (nb, res_channels, in_channels), res_channels)
    sb = 0.05 * jax.random.normal(ks[7], (nb, 1, in_channels), jnp.float32)
    f1w = w(ks[8], (in_channels, in_channels), in_channels)
    f1b = 0.05 * jax.random.normal(ks[9], (1, in_channels), jnp.float32)
    f2w = w(ks[10], (in_channels, in_channels), in_channels)
    f2b = 0.05 * jax.random.normal(ks[11], (1, in_channels), jnp.float32)
    return (cw0, cw1, dw0, dw1, rw, rb, sw, sb, f1w, f1b, f2w, f2b)


def _quantize_like_kernel(x, params, dtype):
    """Round matmul inputs/weights through `dtype` (biases stay f32) so the
    pure-JAX reference shares the kernel's weight/input quantization."""
    def rt(a):
        return a.astype(dtype).astype(jnp.float32)
    (cw0, cw1, dw0, dw1, rw, rb, sw, sb, f1w, f1b, f2w, f2b) = params
    params_q = (rt(cw0), rt(cw1), rt(dw0), rt(dw1), rt(rw), rb, rt(sw), sb,
                rt(f1w), f1b, rt(f2w), f2b)
    return rt(x), params_q


if __name__ == "__main__":
    # Small config consistent with the module's hyper-parameters.
    layer_size = 3        # dilations 1, 2, 4
    stack_size = 2        # repeated twice -> 6 residual blocks, rf_size = 14
    in_channels = 32
    res_channels = 64
    B, T = 8, 32          # out_size = 18; batch_tile=4 -> grid (2,), M=128 rows

    key = jax.random.PRNGKey(0)
    k_x, k_p = jax.random.split(key)
    x = jax.random.normal(k_x, (B, T, in_channels), jnp.float32)
    params = make_params(k_p, layer_size=layer_size, stack_size=stack_size,
                         in_channels=in_channels, res_channels=res_channels)

    out = wavenet_forward(x, params, layer_size=layer_size,
                          stack_size=stack_size, batch_tile=4,
                          compute_dtype=jnp.bfloat16)
    out = jax.block_until_ready(out)

    # Reference with the same bf16-rounded weights/inputs, f32 activation math.
    x_q, params_q = _quantize_like_kernel(x, params, jnp.bfloat16)
    ref = jax.block_until_ready(
        wavenet_reference(x_q, params_q,
                          layer_size=layer_size, stack_size=stack_size))

    rf = (2 ** layer_size - 1) * stack_size
    assert out.shape == (B, T - rf, in_channels)
    np.testing.assert_allclose(np.asarray(out), np.asarray(ref),
                               rtol=5e-2, atol=5e-3)
    # Softmax rows sum to ~1 (approx reciprocal in the kernel).
    np.testing.assert_allclose(np.asarray(out).sum(-1), 1.0, atol=5e-3)

    print("KERNEL_OK")
</pallas_src>

<mosaic_0001>
module attributes {stable_mosaic.version = 11 : i64} {
  func.func @_wavenet_kernel(%arg0: i32, %arg1: memref<4x32x32xbf16, #tpu.memory_space<vmem>>, %arg2: memref<64x64xbf16, #tpu.memory_space<vmem>>, %arg3: memref<6x128x64xbf16, #tpu.memory_space<vmem>>, %arg4: memref<6x64x64xbf16, #tpu.memory_space<vmem>>, %arg5: memref<6x1x64xf32, #tpu.memory_space<vmem>>, %arg6: memref<6x64x32xbf16, #tpu.memory_space<vmem>>, %arg7: memref<6x1x32xf32, #tpu.memory_space<vmem>>, %arg8: memref<32x32xbf16, #tpu.memory_space<vmem>>, %arg9: memref<1x32xf32, #tpu.memory_space<vmem>>, %arg10: memref<32x32xbf16, #tpu.memory_space<vmem>>, %arg11: memref<1x32xf32, #tpu.memory_space<vmem>>, %arg12: memref<4x18x32xf32, #tpu.memory_space<vmem>>) attributes {dimension_semantics = [#tpu.dimension_semantics<parallel>], iteration_bounds = array<i64: 2>, scalar_prefetch = 0 : i64, scratch_operands = 0 : i64, tpu.core_type = #tpu.core_type<tc>, window_params = [{transform_indices = @transform_0, window_bounds = array<i64: 4, 32, 32>}, {pipeline_mode = #tpu.pipeline_mode<synchronous>, transform_indices = @transform_1, window_bounds = array<i64: 64, 64>}, {pipeline_mode = #tpu.pipeline_mode<synchronous>, transform_indices = @transform_2, window_bounds = array<i64: 6, 128, 64>}, {pipeline_mode = #tpu.pipeline_mode<synchronous>, transform_indices = @transform_3, window_bounds = array<i64: 6, 64, 64>}, {pipeline_mode = #tpu.pipeline_mode<synchronous>, transform_indices = @transform_4, window_bounds = array<i64: 6, 1, 64>}, {pipeline_mode = #tpu.pipeline_mode<synchronous>, transform_indices = @transform_5, window_bounds = array<i64: 6, 64, 32>}, {pipeline_mode = #tpu.pipeline_mode<synchronous>, transform_indices = @transform_6, window_bounds = array<i64: 6, 1, 32>}, {pipeline_mode = #tpu.pipeline_mode<synchronous>, transform_indices = @transform_7, window_bounds = array<i64: 32, 32>}, {pipeline_mode = #tpu.pipeline_mode<synchronous>, transform_indices = @transform_8, window_bounds = array<i64: 1, 32>}, {pipeline_mode = #tpu.pipeline_mode<synchronous>, transform_indices = @transform_9, window_bounds = array<i64: 32, 32>}, {pipeline_mode = #tpu.pipeline_mode<synchronous>, transform_indices = @transform_10, window_bounds = array<i64: 1, 32>}, {transform_indices = @transform_11, window_bounds = array<i64: 4, 18, 32>}]} {
    %c0 = arith.constant 0 : index
    %c0_0 = arith.constant 0 : index
    %c0_1 = arith.constant 0 : index
    %0 = vector.load %arg1[%c0, %c0_0, %c0_1] : memref<4x32x32xbf16, #tpu.memory_space<vmem>>, vector<4x32x32xbf16>
    %cst = arith.constant 0.000000e+00 : bf16
    %1 = vector.broadcast %cst : bf16 to vector<4x1x32xbf16>
    %2 = vector.extract_strided_slice %0 {offsets = [0, 0, 0], sizes = [4, 31, 32], strides = [1, 1, 1]} : vector<4x32x32xbf16> to vector<4x31x32xbf16>
    %3 = tpu.concatenate %1, %2 in 1 : vector<4x1x32xbf16>, vector<4x31x32xbf16> -> vector<4x32x32xbf16>
    %4 = vector.shape_cast %3 : vector<4x32x32xbf16> to vector<128x32xbf16>
    %5 = vector.shape_cast %0 : vector<4x32x32xbf16> to vector<128x32xbf16>
    %6 = tpu.concatenate %4, %5 in 1 : vector<128x32xbf16>, vector<128x32xbf16> -> vector<128x64xbf16>
    %c0_2 = arith.constant 0 : index
    %c0_3 = arith.constant 0 : index
    %7 = vector.load %arg2[%c0_2, %c0_3] : memref<64x64xbf16, #tpu.memory_space<vmem>>, vector<64x64xbf16>
    %cst_4 = arith.constant dense<0.000000e+00> : vector<128x64xf32>
    %8 = tpu.matmul %6, %7, %cst_4 {dimension_numbers = #tpu.dot_dimension_numbers<[1], [0], [0], [1], [0, 0, 1, 1], [], []>} : vector<128x64xbf16>, vector<64x64xbf16>, vector<128x64xf32> -> vector<128x64xf32>
    %cst_5 = arith.constant 0.000000e+00 : f32
    %9 = vector.broadcast %cst_5 : f32 to vector<128x32xf32>
    %10 = arith.truncf %8 : vector<128x64xf32> to vector<128x64xbf16>
    %11 = vector.shape_cast %10 : vector<128x64xbf16> to vector<4x32x64xbf16>
    %cst_6 = arith.constant 0.000000e+00 : bf16
    %12 = vector.broadcast %cst_6 : bf16 to vector<4x1x64xbf16>
    %13 = vector.extract_strided_slice %11 {offsets = [0, 0, 0], sizes = [4, 31, 64], strides = [1, 1, 1]} : vector<4x32x64xbf16> to vector<4x31x64xbf16>
    %14 = tpu.concatenate %12, %13 in 1 : vector<4x1x64xbf16>, vector<4x31x64xbf16> -> vector<4x32x64xbf16>
    %15 = vector.shape_cast %14 : vector<4x32x64xbf16> to vector<128x64xbf16>
    %16 = vector.shape_cast %11 : vector<4x32x64xbf16> to vector<128x64xbf16>
    %17 = tpu.concatenate %15, %16 in 1 : vector<128x64xbf16>, vector<128x64xbf16> -> vector<128x128xbf16>
    %c0_7 = arith.constant 0 : index
    %c0_8 = arith.constant 0 : index
    %c0_9 = arith.constant 0 : index
    %18 = vector.load %arg3[%c0_7, %c0_8, %c0_9] : memref<6x128x64xbf16, #tpu.memory_space<vmem>>, vector<1x128x64xbf16>
    %19 = vector.shape_cast %18 : vector<1x128x64xbf16> to vector<128x64xbf16>
    %cst_10 = arith.constant dense<0.000000e+00> : vector<128x64xf32>
    %20 = tpu.matmul %17, %19, %cst_10 {dimension_numbers = #tpu.dot_dimension_numbers<[1], [0], [0], [1], [0, 0, 1, 1], [], []>} : vector<128x128xbf16>, vector<128x64xbf16>, vector<128x64xf32> -> vector<128x64xf32>
    %21 = math.tanh %20 : vector<128x64xf32>
    %22 = arith.negf %20 : vector<128x64xf32>
    %23 = math.exp %22 : vector<128x64xf32>
    %cst_11 = arith.constant 1.000000e+00 : f32
    %24 = vector.broadcast %cst_11 : f32 to vector<128x64xf32>
    %25 = arith.addf %24, %23 : vector<128x64xf32>
    %26 = arith.divf %24, %25 : vector<128x64xf32>
    %27 = arith.mulf %21, %26 : vector<128x64xf32>
    %28 = arith.truncf %27 : vector<128x64xf32> to vector<128x64xbf16>
    %c0_12 = arith.constant 0 : index
    %c0_13 = arith.constant 0 : index
    %c0_14 = arith.constant 0 : index
    %29 = vector.load %arg4[%c0_12, %c0_13, %c0_14] : memref<6x64x64xbf16, #tpu.memory_space<vmem>>, vector<1x64x64xbf16>
    %30 = vector.shape_cast %29 : vector<1x64x64xbf16> to vector<64x64xbf16>
    %cst_15 = arith.constant dense<0.000000e+00> : vector<128x64xf32>
    %31 = tpu.matmul %28, %30, %cst_15 {dimension_numbers = #tpu.dot_dimension_numbers<[1], [0], [0], [1], [0, 0, 1, 1], [], []>} : vector<128x64xbf16>, vector<64x64xbf16>, vector<128x64xf32> -> vector<128x64xf32>
    %c0_16 = arith.constant 0 : index
    %c0_17 = arith.constant 0 : index
    %c0_18 = arith.constant 0 : index
    %32 = vector.load %arg5[%c0_16, %c0_17, %c0_18] : memref<6x1x64xf32, #tpu.memory_space<vmem>>, vector<1x1x64xf32>
    %33 = vector.shape_cast %32 : vector<1x1x64xf32> to vector<1x64xf32>
    %34 = vector.broadcast %33 : vector<1x64xf32> to vector<128x64xf32>
    %35 = arith.addf %31, %34 : vector<128x64xf32>
    %36 = arith.addf %35, %35 : vector<128x64xf32>
    %c0_19 = arith.constant 0 : index
    %c0_20 = arith.constant 0 : index
    %c0_21 = arith.constant 0 : index
    %37 = vector.load %arg6[%c0_19, %c0_20, %c0_21] : memref<6x64x32xbf16, #tpu.memory_space<vmem>>, vector<1x64x32xbf16>
    %38 = vector.shape_cast %37 : vector<1x64x32xbf16> to vector<64x32xbf16>
    %cst_22 = arith.constant dense<0.000000e+00> : vector<128x32xf32>
    %39 = tpu.matmul %28, %38, %cst_22 {dimension_numbers = #tpu.dot_dimension_numbers<[1], [0], [0], [1], [0, 0, 1, 1], [], []>} : vector<128x64xbf16>, vector<64x32xbf16>, vector<128x32xf32> -> vector<128x32xf32>
    %c0_23 = arith.constant 0 : index
    %c0_24 = arith.constant 0 : index
    %c0_25 = arith.constant 0 : index
    %40 = vector.load %arg7[%c0_23, %c0_24, %c0_25] : memref<6x1x32xf32, #tpu.memory_space<vmem>>, vector<1x1x32xf32>
    %41 = vector.shape_cast %40 : vector<1x1x32xf32> to vector<1x32xf32>
    %42 = vector.broadcast %41 : vector<1x32xf32> to vector<128x32xf32>
    %43 = arith.addf %39, %42 : vector<128x32xf32>
    %44 = arith.addf %9, %43 : vector<128x32xf32>
    %45 = arith.truncf %36 : vector<128x64xf32> to vector<128x64xbf16>
    %46 = vector.shape_cast %45 : vector<128x64xbf16> to vector<4x32x64xbf16>
    %cst_26 = arith.constant 0.000000e+00 : bf16
    %47 = vector.broadcast %cst_26 : bf16 to vector<4x2x64xbf16>
    %48 = vector.extract_strided_slice %46 {offsets = [0, 0, 0], sizes = [4, 30, 64], strides = [1, 1, 1]} : vector<4x32x64xbf16> to vector<4x30x64xbf16>
    %49 = tpu.concatenate %47, %48 in 1 : vector<4x2x64xbf16>, vector<4x30x64xbf16> -> vector<4x32x64xbf16>
    %50 = vector.shape_cast %49 : vector<4x32x64xbf16> to vector<128x64xbf16>
    %51 = vector.shape_cast %46 : vector<4x32x64xbf16> to vector<128x64xbf16>
    %52 = tpu.concatenate %50, %51 in 1 : vector<128x64xbf16>, vector<128x64xbf16> -> vector<128x128xbf16>
    %c1 = arith.constant 1 : index
    %c0_27 = arith.constant 0 : index
    %c0_28 = arith.constant 0 : index
    %53 = vector.load %arg3[%c1, %c0_27, %c0_28] : memref<6x128x64xbf16, #tpu.memory_space<vmem>>, vector<1x128x64xbf16>
    %54 = vector.shape_cast %53 : vector<1x128x64xbf16> to vector<128x64xbf16>
    %cst_29 = arith.constant dense<0.000000e+00> : vector<128x64xf32>
    %55 = tpu.matmul %52, %54, %cst_29 {dimension_numbers = #tpu.dot_dimension_numbers<[1], [0], [0], [1], [0, 0, 1, 1], [], []>} : vector<128x128xbf16>, vector<128x64xbf16>, vector<128x64xf32> -> vector<128x64xf32>
    %56 = math.tanh %55 : vector<128x64xf32>
    %57 = arith.negf %55 : vector<128x64xf32>
    %58 = math.exp %57 : vector<128x64xf32>
    %cst_30 = arith.constant 1.000000e+00 : f32
    %59 = vector.broadcast %cst_30 : f32 to vector<128x64xf32>
    %60 = arith.addf %59, %58 : vector<128x64xf32>
    %61 = arith.divf %59, %60 : vector<128x64xf32>
    %62 = arith.mulf %56, %61 : vector<128x64xf32>
    %63 = arith.truncf %62 : vector<128x64xf32> to vector<128x64xbf16>
    %c1_31 = arith.constant 1 : index
    %c0_32 = arith.constant 0 : index
    %c0_33 = arith.constant 0 : index
    %64 = vector.load %arg4[%c1_31, %c0_32, %c0_33] : memref<6x64x64xbf16, #tpu.memory_space<vmem>>, vector<1x64x64xbf16>
    %65 = vector.shape_cast %64 : vector<1x64x64xbf16> to vector<64x64xbf16>
    %cst_34 = arith.constant dense<0.000000e+00> : vector<128x64xf32>
    %66 = tpu.matmul %63, %65, %cst_34 {dimension_numbers = #tpu.dot_dimension_numbers<[1], [0], [0], [1], [0, 0, 1, 1], [], []>} : vector<128x64xbf16>, vector<64x64xbf16>, vector<128x64xf32> -> vector<128x64xf32>
    %c1_35 = arith.constant 1 : index
    %c0_36 = arith.constant 0 : index
    %c0_37 = arith.constant 0 : index
    %67 = vector.load %arg5[%c1_35, %c0_36, %c0_37] : memref<6x1x64xf32, #tpu.memory_space<vmem>>, vector<1x1x64xf32>
    %68 = vector.shape_cast %67 : vector<1x1x64xf32> to vector<1x64xf32>
    %69 = vector.broadcast %68 : vector<1x64xf32> to vector<128x64xf32>
    %70 = arith.addf %66, %69 : vector<128x64xf32>
    %71 = arith.addf %70, %70 : vector<128x64xf32>
    %c1_38 = arith.constant 1 : index
    %c0_39 = arith.constant 0 : index
    %c0_40 = arith.constant 0 : index
    %72 = vector.load %arg6[%c1_38, %c0_39, %c0_40] : memref<6x64x32xbf16, #tpu.memory_space<vmem>>, vector<1x64x32xbf16>
    %73 = vector.shape_cast %72 : vector<1x64x32xbf16> to vector<64x32xbf16>
    %cst_41 = arith.constant dense<0.000000e+00> : vector<128x32xf32>
    %74 = tpu.matmul %63, %73, %cst_41 {dimension_numbers = #tpu.dot_dimension_numbers<[1], [0], [0], [1], [0, 0, 1, 1], [], []>} : vector<128x64xbf16>, vector<64x32xbf16>, vector<128x32xf32> -> vector<128x32xf32>
    %c1_42 = arith.constant 1 : index
    %c0_43 = arith.constant 0 : index
    %c0_44 = arith.constant 0 : index
    %75 = vector.load %arg7[%c1_42, %c0_43, %c0_44] : memref<6x1x32xf32, #tpu.memory_space<vmem>>, vector<1x1x32xf32>
    %76 = vector.shape_cast %75 : vector<1x1x32xf32> to vector<1x32xf32>
    %77 = vector.broadcast %76 : vector<1x32xf32> to vector<128x32xf32>
    %78 = arith.addf %74, %77 : vector<128x32xf32>
    %79 = arith.addf %44, %78 : vector<128x32xf32>
    %80 = arith.truncf %71 : vector<128x64xf32> to vector<128x64xbf16>
    %81 = vector.shape_cast %80 : vector<128x64xbf16> to vector<4x32x64xbf16>
    %cst_45 = arith.constant 0.000000e+00 : bf16
    %82 = vector.broadcast %cst_45 : bf16 to vector<4x4x64xbf16>
    %83 = vector.extract_strided_slice %81 {offsets = [0, 0, 0], sizes = [4, 28, 64], strides = [1, 1, 1]} : vector<4x32x64xbf16> to vector<4x28x64xbf16>
    %84 = tpu.concatenate %82, %83 in 1 : vector<4x4x64xbf16>, vector<4x28x64xbf16> -> vector<4x32x64xbf16>
    %85 = vector.shape_cast %84 : vector<4x32x64xbf16> to vector<128x64xbf16>
    %86 = vector.shape_cast %81 : vector<4x32x64xbf16> to vector<128x64xbf16>
    %87 = tpu.concatenate %85, %86 in 1 : vector<128x64xbf16>, vector<128x64xbf16> -> vector<128x128xbf16>
    %c2 = arith.constant 2 : index
    %c0_46 = arith.constant 0 : index
    %c0_47 = arith.constant 0 : index
    %88 = vector.load %arg3[%c2, %c0_46, %c0_47] : memref<6x128x64xbf16, #tpu.memory_space<vmem>>, vector<1x128x64xbf16>
    %89 = vector.shape_cast %88 : vector<1x128x64xbf16> to vector<128x64xbf16>
    %cst_48 = arith.constant dense<0.000000e+00> : vector<128x64xf32>
    %90 = tpu.matmul %87, %89, %cst_48 {dimension_numbers = #tpu.dot_dimension_numbers<[1], [0], [0], [1], [0, 0, 1, 1], [], []>} : vector<128x128xbf16>, vector<128x64xbf16>, vector<128x64xf32> -> vector<128x64xf32>
    %91 = math.tanh %90 : vector<128x64xf32>
    %92 = arith.negf %90 : vector<128x64xf32>
    %93 = math.exp %92 : vector<128x64xf32>
    %cst_49 = arith.constant 1.000000e+00 : f32
    %94 = vector.broadcast %cst_49 : f32 to vector<128x64xf32>
    %95 = arith.addf %94, %93 : vector<128x64xf32>
    %96 = arith.divf %94, %95 : vector<128x64xf32>
    %97 = arith.mulf %91, %96 : vector<128x64xf32>
    %98 = arith.truncf %97 : vector<128x64xf32> to vector<128x64xbf16>
    %c2_50 = arith.constant 2 : index
    %c0_51 = arith.constant 0 : index
    %c0_52 = arith.constant 0 : index
    %99 = vector.load %arg4[%c2_50, %c0_51, %c0_52] : memref<6x64x64xbf16, #tpu.memory_space<vmem>>, vector<1x64x64xbf16>
    %100 = vector.shape_cast %99 : vector<1x64x64xbf16> to vector<64x64xbf16>
    %cst_53 = arith.constant dense<0.000000e+00> : vector<128x64xf32>
    %101 = tpu.matmul %98, %100, %cst_53 {dimension_numbers = #tpu.dot_dimension_numbers<[1], [0], [0], [1], [0, 0, 1, 1], [], []>} : vector<128x64xbf16>, vector<64x64xbf16>, vector<128x64xf32> -> vector<128x64xf32>
    %c2_54 = arith.constant 2 : index
    %c0_55 = arith.constant 0 : index
    %c0_56 = arith.constant 0 : index
    %102 = vector.load %arg5[%c2_54, %c0_55, %c0_56] : memref<6x1x64xf32, #tpu.memory_space<vmem>>, vector<1x1x64xf32>
    %103 = vector.shape_cast %102 : vector<1x1x64xf32> to vector<1x64xf32>
    %104 = vector.broadcast %103 : vector<1x64xf32> to vector<128x64xf32>
    %105 = arith.addf %101, %104 : vector<128x64xf32>
    %106 = arith.addf %105, %105 : vector<128x64xf32>
    %c2_57 = arith.constant 2 : index
    %c0_58 = arith.constant 0 : index
    %c0_59 = arith.constant 0 : index
    %107 = vector.load %arg6[%c2_57, %c0_58, %c0_59] : memref<6x64x32xbf16, #tpu.memory_space<vmem>>, vector<1x64x32xbf16>
    %108 = vector.shape_cast %107 : vector<1x64x32xbf16> to vector<64x32xbf16>
    %cst_60 = arith.constant dense<0.000000e+00> : vector<128x32xf32>
    %109 = tpu.matmul %98, %108, %cst_60 {dimension_numbers = #tpu.dot_dimension_numbers<[1], [0], [0], [1], [0, 0, 1, 1], [], []>} : vector<128x64xbf16>, vector<64x32xbf16>, vector<128x32xf32> -> vector<128x32xf32>
    %c2_61 = arith.constant 2 : index
    %c0_62 = arith.constant 0 : index
    %c0_63 = arith.constant 0 : index
    %110 = vector.load %arg7[%c2_61, %c0_62, %c0_63] : memref<6x1x32xf32, #tpu.memory_space<vmem>>, vector<1x1x32xf32>
    %111 = vector.shape_cast %110 : vector<1x1x32xf32> to vector<1x32xf32>
    %112 = vector.broadcast %111 : vector<1x32xf32> to vector<128x32xf32>
    %113 = arith.addf %109, %112 : vector<128x32xf32>
    %114 = arith.addf %79, %113 : vector<128x32xf32>
    %115 = arith.truncf %106 : vector<128x64xf32> to vector<128x64xbf16>
    %116 = vector.shape_cast %115 : vector<128x64xbf16> to vector<4x32x64xbf16>
    %cst_64 = arith.constant 0.000000e+00 : bf16
    %117 = vector.broadcast %cst_64 : bf16 to vector<4x1x64xbf16>
    %118 = vector.extract_strided_slice %116 {offsets = [0, 0, 0], sizes = [4, 31, 64], strides = [1, 1, 1]} : vector<4x32x64xbf16> to vector<4x31x64xbf16>
    %119 = tpu.concatenate %117, %118 in 1 : vector<4x1x64xbf16>, vector<4x31x64xbf16> -> vector<4x32x64xbf16>
    %120 = vector.shape_cast %119 : vector<4x32x64xbf16> to vector<128x64xbf16>
    %121 = vector.shape_cast %116 : vector<4x32x64xbf16> to vector<128x64xbf16>
    %122 = tpu.concatenate %120, %121 in 1 : vector<128x64xbf16>, vector<128x64xbf16> -> vector<128x128xbf16>
    %c3 = arith.constant 3 : index
    %c0_65 = arith.constant 0 : index
    %c0_66 = arith.constant 0 : index
    %123 = vector.load %arg3[%c3, %c0_65, %c0_66] : memref<6x128x64xbf16, #tpu.memory_space<vmem>>, vector<1x128x64xbf16>
    %124 = vector.shape_cast %123 : vector<1x128x64xbf16> to vector<128x64xbf16>
    %cst_67 = arith.constant dense<0.000000e+00> : vector<128x64xf32>
    %125 = tpu.matmul %122, %124, %cst_67 {dimension_numbers = #tpu.dot_dimension_numbers<[1], [0], [0], [1], [0, 0, 1, 1], [], []>} : vector<128x128xbf16>, vector<128x64xbf16>, vector<128x64xf32> -> vector<128x64xf32>
    %126 = math.tanh %125 : vector<128x64xf32>
    %127 = arith.negf %125 : vector<128x64xf32>
    %128 = math.exp %127 : vector<128x64xf32>
    %cst_68 = arith.constant 1.000000e+00 : f32
    %129 = vector.broadcast %cst_68 : f32 to vector<128x64xf32>
    %130 = arith.addf %129, %128 : vector<128x64xf32>
    %131 = arith.divf %129, %130 : vector<128x64xf32>
    %132 = arith.mulf %126, %131 : vector<128x64xf32>
    %133 = arith.truncf %132 : vector<128x64xf32> to vector<128x64xbf16>
    %c3_69 = arith.constant 3 : index
    %c0_70 = arith.constant 0 : index
    %c0_71 = arith.constant 0 : index
    %134 = vector.load %arg4[%c3_69, %c0_70, %c0_71] : memref<6x64x64xbf16, #tpu.memory_space<vmem>>, vector<1x64x64xbf16>
    %135 = vector.shape_cast %134 : vector<1x64x64xbf16> to vector<64x64xbf16>
    %cst_72 = arith.constant dense<0.000000e+00> : vector<128x64xf32>
    %136 = tpu.matmul %133, %135, %cst_72 {dimension_numbers = #tpu.dot_dimension_numbers<[1], [0], [0], [1], [0, 0, 1, 1], [], []>} : vector<128x64xbf16>, vector<64x64xbf16>, vector<128x64xf32> -> vector<128x64xf32>
    %c3_73 = arith.constant 3 : index
    %c0_74 = arith.constant 0 : index
    %c0_75 = arith.constant 0 : index
    %137 = vector.load %arg5[%c3_73, %c0_74, %c0_75] : memref<6x1x64xf32, #tpu.memory_space<vmem>>, vector<1x1x64xf32>
    %138 = vector.shape_cast %137 : vector<1x1x64xf32> to vector<1x64xf32>
    %139 = vector.broadcast %138 : vector<1x64xf32> to vector<128x64xf32>
    %140 = arith.addf %136, %139 : vector<128x64xf32>
    %141 = arith.addf %140, %140 : vector<128x64xf32>
    %c3_76 = arith.constant 3 : index
    %c0_77 = arith.constant 0 : index
    %c0_78 = arith.constant 0 : index
    %142 = vector.load %arg6[%c3_76, %c0_77, %c0_78] : memref<6x64x32xbf16, #tpu.memory_space<vmem>>, vector<1x64x32xbf16>
    %143 = vector.shape_cast %142 : vector<1x64x32xbf16> to vector<64x32xbf16>
    %cst_79 = arith.constant dense<0.000000e+00> : vector<128x32xf32>
    %144 = tpu.matmul %133, %143, %cst_79 {dimension_numbers = #tpu.dot_dimension_numbers<[1], [0], [0], [1], [0, 0, 1, 1], [], []>} : vector<128x64xbf16>, vector<64x32xbf16>, vector<128x32xf32> -> vector<128x32xf32>
    %c3_80 = arith.constant 3 : index
    %c0_81 = arith.constant 0 : index
    %c0_82 = arith.constant 0 : index
    %145 = vector.load %arg7[%c3_80, %c0_81, %c0_82] : memref<6x1x32xf32, #tpu.memory_space<vmem>>, vector<1x1x32xf32>
    %146 = vector.shape_cast %145 : vector<1x1x32xf32> to vector<1x32xf32>
    %147 = vector.broadcast %146 : vector<1x32xf32> to vector<128x32xf32>
    %148 = arith.addf %144, %147 : vector<128x32xf32>
    %149 = arith.addf %114, %148 : vector<128x32xf32>
    %150 = arith.truncf %141 : vector<128x64xf32> to vector<128x64xbf16>
    %151 = vector.shape_cast %150 : vector<128x64xbf16> to vector<4x32x64xbf16>
    %cst_83 = arith.constant 0.000000e+00 : bf16
    %152 = vector.broadcast %cst_83 : bf16 to vector<4x2x64xbf16>
    %153 = vector.extract_strided_slice %151 {offsets = [0, 0, 0], sizes = [4, 30, 64], strides = [1, 1, 1]} : vector<4x32x64xbf16> to vector<4x30x64xbf16>
    %154 = tpu.concatenate %152, %153 in 1 : vector<4x2x64xbf16>, vector<4x30x64xbf16> -> vector<4x32x64xbf16>
    %155 = vector.shape_cast %154 : vector<4x32x64xbf16> to vector<128x64xbf16>
    %156 = vector.shape_cast %151 : vector<4x32x64xbf16> to vector<128x64xbf16>
    %157 = tpu.concatenate %155, %156 in 1 : vector<128x64xbf16>, vector<128x64xbf16> -> vector<128x128xbf16>
    %c4 = arith.constant 4 : index
    %c0_84 = arith.constant 0 : index
    %c0_85 = arith.constant 0 : index
    %158 = vector.load %arg3[%c4, %c0_84, %c0_85] : memref<6x128x64xbf16, #tpu.memory_space<vmem>>, vector<1x128x64xbf16>
    %159 = vector.shape_cast %158 : vector<1x128x64xbf16> to vector<128x64xbf16>
    %cst_86 = arith.constant dense<0.000000e+00> : vector<128x64xf32>
    %160 = tpu.matmul %157, %159, %cst_86 {dimension_numbers = #tpu.dot_dimension_numbers<[1], [0], [0], [1], [0, 0, 1, 1], [], []>} : vector<128x128xbf16>, vector<128x64xbf16>, vector<128x64xf32> -> vector<128x64xf32>
    %161 = math.tanh %160 : vector<128x64xf32>
    %162 = arith.negf %160 : vector<128x64xf32>
    %163 = math.exp %162 : vector<128x64xf32>
    %cst_87 = arith.constant 1.000000e+00 : f32
    %164 = vector.broadcast %cst_87 : f32 to vector<128x64xf32>
    %165 = arith.addf %164, %163 : vector<128x64xf32>
    %166 = arith.divf %164, %165 : vector<128x64xf32>
    %167 = arith.mulf %161, %166 : vector<128x64xf32>
    %168 = arith.truncf %167 : vector<128x64xf32> to vector<128x64xbf16>
    %c4_88 = arith.constant 4 : index
    %c0_89 = arith.constant 0 : index
    %c0_90 = arith.constant 0 : index
    %169 = vector.load %arg4[%c4_88, %c0_89, %c0_90] : memref<6x64x64xbf16, #tpu.memory_space<vmem>>, vector<1x64x64xbf16>
    %170 = vector.shape_cast %169 : vector<1x64x64xbf16> to vector<64x64xbf16>
    %cst_91 = arith.constant dense<0.000000e+00> : vector<128x64xf32>
    %171 = tpu.matmul %168, %170, %cst_91 {dimension_numbers = #tpu.dot_dimension_numbers<[1], [0], [0], [1], [0, 0, 1, 1], [], []>} : vector<128x64xbf16>, vector<64x64xbf16>, vector<128x64xf32> -> vector<128x64xf32>
    %c4_92 = arith.constant 4 : index
    %c0_93 = arith.constant 0 : index
    %c0_94 = arith.constant 0 : index
    %172 = vector.load %arg5[%c4_92, %c0_93, %c0_94] : memref<6x1x64xf32, #tpu.memory_space<vmem>>, vector<1x1x64xf32>
    %173 = vector.shape_cast %172 : vector<1x1x64xf32> to vector<1x64xf32>
    %174 = vector.broadcast %173 : vector<1x64xf32> to vector<128x64xf32>
    %175 = arith.addf %171, %174 : vector<128x64xf32>
    %176 = arith.addf %175, %175 : vector<128x64xf32>
    %c4_95 = arith.constant 4 : index
    %c0_96 = arith.constant 0 : index
    %c0_97 = arith.constant 0 : index
    %177 = vector.load %arg6[%c4_95, %c0_96, %c0_97] : memref<6x64x32xbf16, #tpu.memory_space<vmem>>, vector<1x64x32xbf16>
    %178 = vector.shape_cast %177 : vector<1x64x32xbf16> to vector<64x32xbf16>
    %cst_98 = arith.constant dense<0.000000e+00> : vector<128x32xf32>
    %179 = tpu.matmul %168, %178, %cst_98 {dimension_numbers = #tpu.dot_dimension_numbers<[1], [0], [0], [1], [0, 0, 1, 1], [], []>} : vector<128x64xbf16>, vector<64x32xbf16>, vector<128x32xf32> -> vector<128x32xf32>
    %c4_99 = arith.constant 4 : index
    %c0_100 = arith.constant 0 : index
    %c0_101 = arith.constant 0 : index
    %180 = vector.load %arg7[%c4_99, %c0_100, %c0_101] : memref<6x1x32xf32, #tpu.memory_space<vmem>>, vector<1x1x32xf32>
    %181 = vector.shape_cast %180 : vector<1x1x32xf32> to vector<1x32xf32>
    %182 = vector.broadcast %181 : vector<1x32xf32> to vector<128x32xf32>
    %183 = arith.addf %179, %182 : vector<128x32xf32>
    %184 = arith.addf %149, %183 : vector<128x32xf32>
    %185 = arith.truncf %176 : vector<128x64xf32> to vector<128x64xbf16>
    %186 = vector.shape_cast %185 : vector<128x64xbf16> to vector<4x32x64xbf16>
    %cst_102 = arith.constant 0.000000e+00 : bf16
    %187 = vector.broadcast %cst_102 : bf16 to vector<4x4x64xbf16>
    %188 = vector.extract_strided_slice %186 {offsets = [0, 0, 0], sizes = [4, 28, 64], strides = [1, 1, 1]} : vector<4x32x64xbf16> to vector<4x28x64xbf16>
    %189 = tpu.concatenate %187, %188 in 1 : vector<4x4x64xbf16>, vector<4x28x64xbf16> -> vector<4x32x64xbf16>
    %190 = vector.shape_cast %189 : vector<4x32x64xbf16> to vector<128x64xbf16>
    %191 = vector.shape_cast %186 : vector<4x32x64xbf16> to vector<128x64xbf16>
    %192 = tpu.concatenate %190, %191 in 1 : vector<128x64xbf16>, vector<128x64xbf16> -> vector<128x128xbf16>
    %c5 = arith.constant 5 : index
    %c0_103 = arith.constant 0 : index
    %c0_104 = arith.constant 0 : index
    %193 = vector.load %arg3[%c5, %c0_103, %c0_104] : memref<6x128x64xbf16, #tpu.memory_space<vmem>>, vector<1x128x64xbf16>
    %194 = vector.shape_cast %193 : vector<1x128x64xbf16> to vector<128x64xbf16>
    %cst_105 = arith.constant dense<0.000000e+00> : vector<128x64xf32>
    %195 = tpu.matmul %192, %194, %cst_105 {dimension_numbers = #tpu.dot_dimension_numbers<[1], [0], [0], [1], [0, 0, 1, 1], [], []>} : vector<128x128xbf16>, vector<128x64xbf16>, vector<128x64xf32> -> vector<128x64xf32>
    %196 = math.tanh %195 : vector<128x64xf32>
    %197 = arith.negf %195 : vector<128x64xf32>
    %198 = math.exp %197 : vector<128x64xf32>
    %cst_106 = arith.constant 1.000000e+00 : f32
    %199 = vector.broadcast %cst_106 : f32 to vector<128x64xf32>
    %200 = arith.addf %199, %198 : vector<128x64xf32>
    %201 = arith.divf %199, %200 : vector<128x64xf32>
    %202 = arith.mulf %196, %201 : vector<128x64xf32>
    %203 = arith.truncf %202 : vector<128x64xf32> to vector<128x64xbf16>
    %c5_107 = arith.constant 5 : index
    %c0_108 = arith.constant 0 : index
    %c0_109 = arith.constant 0 : index
    %204 = vector.load %arg6[%c5_107, %c0_108, %c0_109] : memref<6x64x32xbf16, #tpu.memory_space<vmem>>, vector<1x64x32xbf16>
    %205 = vector.shape_cast %204 : vector<1x64x32xbf16> to vector<64x32xbf16>
    %cst_110 = arith.constant dense<0.000000e+00> : vector<128x32xf32>
    %206 = tpu.matmul %203, %205, %cst_110 {dimension_numbers = #tpu.dot_dimension_numbers<[1], [0], [0], [1], [0, 0, 1, 1], [], []>} : vector<128x64xbf16>, vector<64x32xbf16>, vector<128x32xf32> -> vector<128x32xf32>
    %c5_111 = arith.constant 5 : index
    %c0_112 = arith.constant 0 : index
    %c0_113 = arith.constant 0 : index
    %207 = vector.load %arg7[%c5_111, %c0_112, %c0_113] : memref<6x1x32xf32, #tpu.memory_space<vmem>>, vector<1x1x32xf32>
    %208 = vector.shape_cast %207 : vector<1x1x32xf32> to vector<1x32xf32>
    %209 = vector.broadcast %208 : vector<1x32xf32> to vector<128x32xf32>
    %210 = arith.addf %206, %209 : vector<128x32xf32>
    %211 = arith.addf %184, %210 : vector<128x32xf32>
    %cst_114 = arith.constant 0.000000e+00 : f32
    %212 = vector.broadcast %cst_114 : f32 to vector<128x32xf32>
    %213 = arith.maximumf %211, %212 : vector<128x32xf32>
    %214 = arith.truncf %213 : vector<128x32xf32> to vector<128x32xbf16>
    %c0_115 = arith.constant 0 : index
    %c0_116 = arith.constant 0 : index
    %215 = vector.load %arg8[%c0_115, %c0_116] : memref<32x32xbf16, #tpu.memory_space<vmem>>, vector<32x32xbf16>
    %cst_117 = arith.constant dense<0.000000e+00> : vector<128x32xf32>
    %216 = tpu.matmul %214, %215, %cst_117 {dimension_numbers = #tpu.dot_dimension_numbers<[1], [0], [0], [1], [0, 0, 1, 1], [], []>} : vector<128x32xbf16>, vector<32x32xbf16>, vector<128x32xf32> -> vector<128x32xf32>
    %c0_118 = arith.constant 0 : index
    %c0_119 = arith.constant 0 : index
    %217 = vector.load %arg9[%c0_118, %c0_119] : memref<1x32xf32, #tpu.memory_space<vmem>>, vector<1x32xf32>
    %218 = vector.broadcast %217 : vector<1x32xf32> to vector<128x32xf32>
    %219 = arith.addf %216, %218 : vector<128x32xf32>
    %cst_120 = arith.constant 0.000000e+00 : f32
    %220 = vector.broadcast %cst_120 : f32 to vector<128x32xf32>
    %221 = arith.maximumf %219, %220 : vector<128x32xf32>
    %222 = arith.truncf %221 : vector<128x32xf32> to vector<128x32xbf16>
    %c0_121 = arith.constant 0 : index
    %c0_122 = arith.constant 0 : index
    %223 = vector.load %arg10[%c0_121, %c0_122] : memref<32x32xbf16, #tpu.memory_space<vmem>>, vector<32x32xbf16>
    %cst_123 = arith.constant dense<0.000000e+00> : vector<128x32xf32>
    %224 = tpu.matmul %222, %223, %cst_123 {dimension_numbers = #tpu.dot_dimension_numbers<[1], [0], [0], [1], [0, 0, 1, 1], [], []>} : vector<128x32xbf16>, vector<32x32xbf16>, vector<128x32xf32> -> vector<128x32xf32>
    %c0_124 = arith.constant 0 : index
    %c0_125 = arith.constant 0 : index
    %225 = vector.load %arg11[%c0_124, %c0_125] : memref<1x32xf32, #tpu.memory_space<vmem>>, vector<1x32xf32>
    %226 = vector.broadcast %225 : vector<1x32xf32> to vector<128x32xf32>
    %227 = arith.addf %224, %226 : vector<128x32xf32>
    %cst_126 = arith.constant dense<0xFF800000> : vector<128xf32>
    %228 = vector.multi_reduction <maximumf>, %227, %cst_126 [1] : vector<128x32xf32> to vector<128xf32>
    %229 = vector.shape_cast %228 : vector<128xf32> to vector<128x1xf32>
    %230 = vector.broadcast %229 : vector<128x1xf32> to vector<128x32xf32>
    %231 = arith.subf %227, %230 : vector<128x32xf32>
    %232 = math.exp %231 : vector<128x32xf32>
    %cst_127 = arith.constant dense<0.000000e+00> : vector<128xf32>
    %233 = vector.multi_reduction <add>, %232, %cst_127 [1] : vector<128x32xf32> to vector<128xf32>
    %234 = vector.shape_cast %233 : vector<128xf32> to vector<128x1xf32>
    %235 = tpu.reciprocal %234 {approx = true} : vector<128x1xf32> -> vector<128x1xf32>
    %236 = vector.broadcast %235 : vector<128x1xf32> to vector<128x32xf32>
    %237 = arith.mulf %232, %236 : vector<128x32xf32>
    %238 = vector.shape_cast %237 : vector<128x32xf32> to vector<4x32x32xf32>
    %239 = vector.extract_strided_slice %238 {offsets = [0, 14, 0], sizes = [4, 18, 32], strides = [1, 1, 1]} : vector<4x32x32xf32> to vector<4x18x32xf32>
    %c0_128 = arith.constant 0 : index
    %c0_129 = arith.constant 0 : index
    %c0_130 = arith.constant 0 : index
    %240 = vector.load %arg12[%c0_128, %c0_129, %c0_130] : memref<4x18x32xf32, #tpu.memory_space<vmem>>, vector<4x18x32xf32>
    tpu.vector_store %arg12[%c0_128, %c0_129, %c0_130], %239 {strides = array<i32>} : memref<4x18x32xf32, #tpu.memory_space<vmem>>, vector<4x18x32xf32>,
    return
  }
  func.func @transform_0(%arg0: i32) -> (i32, i32, i32) {
    %c0_i32 = arith.constant 0 : i32
    %c0_i32_0 = arith.constant 0 : i32
    %c0_i32_1 = arith.constant 0 : i32
    return %arg0, %c0_i32, %c0_i32_0 : i32, i32, i32
  }
  func.func @transform_1(%arg0: i32) -> (i32, i32) {
    %c0_i32 = arith.constant 0 : i32
    %c0_i32_0 = arith.constant 0 : i32
    %c0_i32_1 = arith.constant 0 : i32
    return %c0_i32, %c0_i32_0 : i32, i32
  }
  func.func @transform_2(%arg0: i32) -> (i32, i32, i32) {
    %c0_i32 = arith.constant 0 : i32
    %c0_i32_0 = arith.constant 0 : i32
    %c0_i32_1 = arith.constant 0 : i32
    %c0_i32_2 = arith.constant 0 : i32
    return %c0_i32, %c0_i32_0, %c0_i32_1 : i32, i32, i32
  }
  func.func @transform_3(%arg0: i32) -> (i32, i32, i32) {
    %c0_i32 = arith.constant 0 : i32
    %c0_i32_0 = arith.constant 0 : i32
    %c0_i32_1 = arith.constant 0 : i32
    %c0_i32_2 = arith.constant 0 : i32
    return %c0_i32, %c0_i32_0, %c0_i32_1 : i32, i32, i32
  }
  func.func @transform_4(%arg0: i32) -> (i32, i32, i32) {
    %c0_i32 = arith.constant 0 : i32
    %c0_i32_0 = arith.constant 0 : i32
    %c0_i32_1 = arith.constant 0 : i32
    %c0_i32_2 = arith.constant 0 : i32
    return %c0_i32, %c0_i32_0, %c0_i32_1 : i32, i32, i32
  }
  func.func @transform_5(%arg0: i32) -> (i32, i32, i32) {
    %c0_i32 = arith.constant 0 : i32
    %c0_i32_0 = arith.constant 0 : i32
    %c0_i32_1 = arith.constant 0 : i32
    %c0_i32_2 = arith.constant 0 : i32
    return %c0_i32, %c0_i32_0, %c0_i32_1 : i32, i32, i32
  }
  func.func @transform_6(%arg0: i32) -> (i32, i32, i32) {
    %c0_i32 = arith.constant 0 : i32
    %c0_i32_0 = arith.constant 0 : i32
    %c0_i32_1 = arith.constant 0 : i32
    %c0_i32_2 = arith.constant 0 : i32
    return %c0_i32, %c0_i32_0, %c0_i32_1 : i32, i32, i32
  }
  func.func @transform_7(%arg0: i32) -> (i32, i32) {
    %c0_i32 = arith.constant 0 : i32
    %c0_i32_0 = arith.constant 0 : i32
    %c0_i32_1 = arith.constant 0 : i32
    return %c0_i32, %c0_i32_0 : i32, i32
  }
  func.func @transform_8(%arg0: i32) -> (i32, i32) {
    %c0_i32 = arith.constant 0 : i32
    %c0_i32_0 = arith.constant 0 : i32
    %c0_i32_1 = arith.constant 0 : i32
    return %c0_i32, %c0_i32_0 : i32, i32
  }
  func.func @transform_9(%arg0: i32) -> (i32, i32) {
    %c0_i32 = arith.constant 0 : i32
    %c0_i32_0 = arith.constant 0 : i32
    %c0_i32_1 = arith.constant 0 : i32
    return %c0_i32, %c0_i32_0 : i32, i32
  }
  func.func @transform_10(%arg0: i32) -> (i32, i32) {
    %c0_i32 = arith.constant 0 : i32
    %c0_i32_0 = arith.constant 0 : i32
    %c0_i32_1 = arith.constant 0 : i32
    return %c0_i32, %c0_i32_0 : i32, i32
  }
  func.func @transform_11(%arg0: i32) -> (i32, i32, i32) {
    %c0_i32 = arith.constant 0 : i32
    %c0_i32_0 = arith.constant 0 : i32
    %c0_i32_1 = arith.constant 0 : i32
    return %arg0, %c0_i32, %c0_i32_0 : i32, i32, i32
  }
}

</mosaic_0001>

<bundles_post_ra>
// kernel: tpu_custom_call.1
= control target key start
LH: loop header
LB: loop body
LE: loop exit
PB: predicated region body
PF: predicated region fallthrough
CT: control target
= control target key end

     0   :  { %s7734_s17 = smov 0   ;;  %s8740_s0 = inlined_call_operand.vmem [shape: bf16[8,32,32], index: 0, kind: input, shape index: {}]   ;;  %s8741_s1 = inlined_call_operand.vmem [shape: bf16[64,64], index: 1, kind: input, shape index: {}]   ;;  %s8742_s2 = inlined_call_operand.vmem [shape: bf16[6,128,64], index: 2, kind: input, shape index: {}]   ;;  %s8743_s3 = inlined_call_operand.vmem [shape: bf16[6,64,64], index: 3, kind: input, shape index: {}]   ;;  %s8744_s4 = inlined_call_operand.vmem [shape: f32[6,1,64], index: 4, kind: input, shape index: {}]   ;;  %s8745_s5 = inlined_call_operand.vmem [shape: bf16[6,64,32], index: 5, kind: input, shape index: {}]   ;;  %s8746_s6 = inlined_call_operand.vmem [shape: f32[6,1,32], index: 6, kind: input, shape index: {}]   ;;  %s8747_s7 = inlined_call_operand.vmem [shape: bf16[32,32], index: 7, kind: input, shape index: {}]   ;;  %s8748_s8 = inlined_call_operand.vmem [shape: f32[1,32], index: 8, kind: input, shape index: {}]   ;;  %s8749_s9 = inlined_call_operand.vmem [shape: bf16[32,32], index: 9, kind: input, shape index: {}]   ;;  %s8750_s10 = inlined_call_operand.vmem [shape: f32[1,32], index: 10, kind: input, shape index: {}]   ;;  %s8751_s11 = inlined_call_operand.vmem [shape: f32[8,18,32], index: 11, kind: output, shape index: {}]  }
   0x1 LB: > { %s5454_s18 = sadd.s32 4294967295, %s7670_s17   ;;  %p5458_p0 = scmp.ge.s32.totalorder %s7670_s17, 1  ;;  %s7670_s17 = sphi %s7734_s17, %s21_s17  }
   0x2   : > { %p339_p1 = scmp.lt.s32.totalorder %s7670_s17, 3 }
   0x4   : > { %p340_p2 = pnand %p5458_p0, %p339_p1 }
   0x5   : > { %s5459_s19 = sshll.u32 (!%p340_p2), %s5454_s18, 2  ;;  %v6940_v0 = vld [vmem:[%s8741_s1] sm:$0xff] (!%p340_p2)   ;;  %v6941_v1 = vld [vmem:[%s8741_s1 + $0x8] sm:$0xff] (!%p340_p2)   ;;  %v6942_v2 = vld [vmem:[%s8741_s1 + $0x10] sm:$0xff] (!%p340_p2)   ;;  %s7672_s13 = smov (!%p340_p2), 32   ;;  %vm517_vm1 = vcmask (!%p340_p2), 1040384  }
   0x6   : > { %343 = sbr.rel (%p340_p2) target bundleno = 4680 (0x1248), region = 64  ;;  %p382_p3 = scmp.lt.s32.totalorder (!%p340_p2), %s5459_s19, 7  ;;  %6217 = vmatprep.subr.bf16.mxu0 (!%p340_p2), %v6940_v0  ;;  %v6943_v4 = vld [vmem:[%s8741_s1 + $0x18] sm:$0xff] (!%p340_p2)   ;;  %vm452_vm0 = vsmask.f32 (!%p340_p2), 256  ;;  %vm539_vm3 = vcmask (!%p340_p2), 261120  }
   0x7   : > { %6218 = vmatpush3.bf16.msra.mxu0 (!%p340_p2), %v6940_v0  ;;  %vm7784_vm2 = vmand (!%p340_p2), %vm517_vm1, %vm452_vm0  ;;  %vm596_vm4 = vcmask (!%p340_p2), 523264   ;;  %vm2195_vm5 = vcmask (!%p340_p2), 1041408   ;;  %v7002_v43 = vld [vmem:[%s8743_s3 + $0x70] sm:$0xff] (!%p340_p2)   ;;  %vm5383_vm6 = vcmask (!%p340_p2), 261126  }
   0x8   : > { %6219 = vmatprep.subr.bf16.mxu0 (!%p340_p2), %v6941_v1 }
   0xb   : > { %6220 = vmatpush3.bf16.msra.mxu0 (!%p340_p2), %v6941_v1 }
   0xc   : > { %6221 = vmatprep.subr.bf16.mxu0 (!%p340_p2), %v6942_v2 }
   0xd   : > { %s8755_s19 = smov (!%p382_p3, %s5459_s19), 7 }
   0xe   : > { %s5956_s24 = sshll.u32 %s8755_s19, 4 }
   0xf   : > { %s7757_s29 = scalar_lea.vmem %s8740_s0, %s5956_s24  ;;  %6222 = vmatpush3.bf16.msra.mxu0 %v6942_v2  ;;  %s6921_s24 = smul.u32 24, %s8755_s19 }
  0x10   : > { %v6932_v3 = vld [vmem:[%s7757_s29] sm:$0xff]   ;;  %v6933_v5 = vld [vmem:[%s7757_s29 + $0x8] sm:$0xff]   ;;  %v6934_v6 = vld [vmem:[%s7757_s29 + $0x10] sm:$0xff]   ;;  %6223 = vmatprep.subr.bf16.mxu0 %v6943_v4 }
  0x11   : > { %523 = vrot.lane.b32.xlu0 %v6932_v3, %s7672_s13  ;;  %v454_v7 = vshrl.u32 %v6932_v3, 16  ;;  %v461_v8 = vshrl.u32 %v6933_v5, 16  ;;  %v464_v9 = vshll.u32 %v6933_v5, 16  ;;  %527 = vrot.lane.b32.xlu1 %v6934_v6, %s7672_s13  ;;  %v6935_v10 = vld [vmem:[%s7757_s29 + $0x18] sm:$0xff]   ;;  %v6936_v15 = vld [vmem:[%s7757_s29 + $0x20] sm:$0xff]   ;;  %v469_v23 = vshrl.u32 %v6934_v6, 16  ;;  %s8699_s26 = scalar_lea.vmem %s8751_s11, %s6921_s24 }
  0x12   : > { %v476_v13 = vshrl.u32 %v6935_v10, 16  ;;  %v479_v14 = vshll.u32 %v6935_v10, 16  ;;  %v6937_v16 = vld [vmem:[%s7757_s29 + $0x28] sm:$0xff]   ;;  %v6939_v21 = vld [vmem:[%s7757_s29 + $0x38] sm:$0xff]   ;;  %v484_v24 = vshrl.u32 %v6936_v15, 16  ;;  %v6938_v26 = vld [vmem:[%s7757_s29 + $0x30] sm:$0xff]  }
  0x13   : > { %v463_v11 = vrot.slane %v461_v8, 7  ;;  %v456_v12 = vrot.slane %v454_v7, 7  ;;  %v491_v19 = vshrl.u32 %v6937_v16, 16  ;;  %v494_v20 = vshll.u32 %v6937_v16, 16  ;;  %6224 = vmatpush3.bf16.msra.mxu0 %v6943_v4  ;;  %v6946_v7 = vld [vmem:[%s8742_s2 + $0x10] sm:$0xff]   ;;  %v6947_v8 = vld [vmem:[%s8742_s2 + $0x18] sm:$0xff]  }
  0x14   : > { %v478_v18 = vrot.slane %v476_v13, 7  ;;  %v506_v27 = vshrl.u32 %v6939_v21, 16  ;;  %v509_v28 = vshll.u32 %v6939_v21, 16  ;;  %v471_v29 = vrot.slane %v469_v23, 7 }
  0x15   : > { %525 = vrot.lane.b32.xlu0 %v6933_v5, %s7672_s13  ;;  %v466_v17 = vor.u32 %v464_v9, %v463_v11  ;;  %529 = vrot.lane.b32.xlu1 %v6935_v10, %s7672_s13  ;;  %v493_v25 = vrot.slane %v491_v19, 7  ;;  %v486_v32 = vrot.slane %v484_v24, 7  ;;  %v499_v34 = vshrl.u32 %v6938_v26, 16  ;;  %v6944_v5 = vld [vmem:[%s8742_s2] sm:$0xff]   ;;  %v6949_v10 = vld [vmem:[%s8742_s2 + $0x28] sm:$0xff]  }
  0x16   : > { %v481_v30 = vor.u32 %v479_v14, %v478_v18  ;;  %v508_v31 = vrot.slane %v506_v27, 7  ;;  %v457_v40 = vshll.u32 %v6932_v3, 16  ;;  %v472_v41 = vshll.u32 %v6934_v6, 16  ;;  %v6945_v6 = vld [vmem:[%s8742_s2 + $0x8] sm:$0xff]   ;;  %6241 = vmatprep.subr.bf16.mxu1 %v6944_v5  ;;  %v6948_v9 = vld [vmem:[%s8742_s2 + $0x20] sm:$0xff]   ;;  %v6950_v11 = vld [vmem:[%s8742_s2 + $0x30] sm:$0xff]  }
  0x17   : > { %v467_v22 = vsel %vm452_vm0, %v456_v12, %v466_v17  ;;  %v496_v33 = vor.u32 %v494_v20, %v493_v25  ;;  %v501_v37 = vrot.slane %v499_v34, 7  ;;  %v487_v49 = vshll.u32 %v6936_v15, 16  ;;  %6242 = vmatpush3.bf16.msra.mxu1 %v6944_v5 }
  0x18   : > { %v482_v35 = vsel %vm452_vm0, %v471_v29, %v481_v30  ;;  %v511_v38 = vor.u32 %v509_v28, %v508_v31  ;;  %v459_v42 = vor.u32 %v457_v40, %v456_v12  ;;  %v474_v44 = vor.u32 %v472_v41, %v471_v29  ;;  %6243 = vmatprep.subr.bf16.mxu1 %v6945_v6  ;;  %v6951_v12 = vld [vmem:[%s8742_s2 + $0x38] sm:$0xff]  }
  0x19   : > { %531 = vrot.lane.b32.xlu0 %v6936_v15, %s7672_s13  ;;  %533 = vrot.lane.b32.xlu1 %v6937_v16, %s7672_s13  ;;  %v497_v36 = vsel %vm452_vm0, %v486_v32, %v496_v33  ;;  %v489_v54 = vor.u32 %v487_v49, %v486_v32  ;;  %v502_v58 = vshll.u32 %v6938_v26, 16 }
  0x1a   : > { %v512_v39 = vsel %vm452_vm0, %v501_v37, %v511_v38  ;;  %v519_v45 = vsel %vm7784_vm2, 0, %v459_v42  ;;  %v520_v48 = vsel %vm7784_vm2, 0, %v474_v44 }
  0x1b   : > { %v521_v56 = vsel %vm7784_vm2, 0, %v489_v54  ;;  %v504_v61 = vor.u32 %v502_v58, %v501_v37  ;;  %6244 = vmatpush3.bf16.msra.mxu1 %v6945_v6 }
  0x1c   : > { %6245 = vmatprep.subr.bf16.mxu1 %v6946_v7 }
  0x1d   : > { %535 = vrot.lane.b32.xlu0 %v6938_v26, %s7672_s13  ;;  %537 = vrot.lane.b32.xlu1 %v6939_v21, %s7672_s13  ;;  %v522_v63 = vsel %vm7784_vm2, 0, %v504_v61  ;;  %s7673_s13 = smov 64  }
  0x1f   : > { %6246 = vmatpush3.bf16.msra.mxu1 %v6946_v7 }
  0x20   : > { %6247 = vmatprep.subr.bf16.mxu1 %v6947_v8 }
  0x23   : > { %6248 = vmatpush3.bf16.msra.mxu1 %v6947_v8 }
  0x24   : > { %6249 = vmatprep.subr.bf16.mxu1 %v6948_v9 }
  0x27   : > { %6250 = vmatpush3.bf16.msra.mxu1 %v6948_v9 }
  0x28   : > { %6251 = vmatprep.subr.bf16.mxu1 %v6949_v10 }
  0x2b   : > { %6252 = vmatpush3.bf16.msra.mxu1 %v6949_v10 }
  0x2c   : > { %6253 = vmatprep.subr.bf16.mxu1 %v6950_v11 }
  0x2f   : > { %6254 = vmatpush3.bf16.msra.mxu1 %v6950_v11 }
  0x30   : > { %6255 = vmatprep.subr.bf16.mxu1 %v6951_v12 }
  0x33   : > { %6256 = vmatpush3.bf16.msra.mxu1 %v6951_v12 }
  0x83   : > { %v524_v46 = vpop.permute.xlu0 %523  ;;  %v528_v50 = vpop.permute.xlu1 %527 }
  0x84   : > { %v542_v47 = vsel %vm539_vm3, %v519_v45, %v524_v46  ;;  %v548_v52 = vsel %vm539_vm3, %v520_v48, %v528_v50 }
  0x85   : > { %6225 = vmatprep.mubr.msk.bf16.mxu0 %vm596_vm4, %v542_v47 }
  0x87   : > { %v526_v51 = vpop.permute.xlu0 %525  ;;  %v530_v55 = vpop.permute.xlu1 %529 }
  0x88   : > { %v545_v53 = vsel %vm539_vm3, %v467_v22, %v526_v51  ;;  %v551_v59 = vsel %vm539_vm3, %v482_v35, %v530_v55 }
  0x89   : > { %6226 = vmatmul.mubr.msk.bf16.vlgmr.msra.gmra.mrb[0].mxu0 %vm596_vm4, %v545_v53 }
  0x8a   : > { %6229 = vmatprep.mubr.msk.bf16.mxu0 %vm596_vm4, %v548_v52 }
  0x8b   : > { %v532_v57 = vpop.permute.xlu0 %531  ;;  %v534_v62 = vpop.permute.xlu1 %533 }
  0x8c   : > { %v554_v60 = vsel %vm539_vm3, %v521_v56, %v532_v57  ;;  %v557_v1 = vsel %vm539_vm3, %v497_v36, %v534_v62 }
  0x8f   : > { %v536_v0 = vpop.permute.xlu0 %535  ;;  %v538_v3 = vpop.permute.xlu1 %537 }
  0x90   : > { %v560_v2 = vsel %vm539_vm3, %v522_v63, %v536_v0  ;;  %v563_v4 = vsel %vm539_vm3, %v512_v39, %v538_v3 }
  0x91   : > { %6230 = vmatmul.mubr.msk.bf16.gmra.mrb[4].mxu0 %vm596_vm4, %v551_v59 }
  0x92   : > { %6233 = vmatprep.mubr.msk.bf16.mxu0 %vm596_vm4, %v554_v60 }
  0x99   : > { %6234 = vmatmul.mubr.msk.bf16.gmra.mrb[8].mxu0 %vm596_vm4, %v557_v1 }
  0x9a   : > { %6237 = vmatprep.mubr.msk.bf16.mxu0 %vm596_vm4, %v560_v2 }
  0xa1   : > { %6238 = vmatmul.mubr.msk.bf16.gmra.mrb[12].mxu0 %vm596_vm4, %v563_v4 }
 0x15c   : > { %v6227_v13 = vpop.f32.mrb[0].mxu0 }
 0x15d   : > { %v647_v14 = vpop.f32.mrb[1].mxu0 }
 0x15e   : > { %v6228_v15 = vpop.f32.mrb[2].mxu0 }
 0x15f   : > { %v711_v16 = vpack.c.bf16 %v6228_v15, %v6227_v13  ;;  %v650_v17 = vpop.f32.mrb[3].mxu0 }
 0x160   : > { %v710_v18 = vpack.c.bf16 %v650_v17, %v647_v14 }
 0x161   : > { %v726_v19 = vshrl.u32 %v711_v16, 16  ;;  %796 = vrot.lane.b32.xlu1 %v711_v16, %s7673_s13  ;;  %v729_v22 = vshll.u32 %v711_v16, 16 }
 0x162   : > { %v719_v20 = vshrl.u32 %v710_v18, 16  ;;  %794 = vrot.lane.b32.xlu0 %v710_v18, %s7673_s13  ;;  %v722_v2 = vshll.u32 %v710_v18, 16 }
 0x163   : > { %v728_v21 = vrot.slane %v726_v19, 7 }
 0x164   : > { %v721_v23 = vrot.slane %v719_v20, 7  ;;  %v6231_v24 = vpop.f32.mrb[4].mxu0 }
 0x165   : > { %v731_v25 = vor.u32 %v729_v22, %v728_v21  ;;  %v663_v26 = vpop.f32.mrb[5].mxu0 }
 0x166   : > { %v6232_v27 = vpop.f32.mrb[6].mxu0  ;;  %v724_v3 = vor.u32 %v722_v2, %v721_v23 }
 0x167   : > { %v713_v28 = vpack.c.bf16 %v6232_v27, %v6231_v24  ;;  %v666_v29 = vpop.f32.mrb[7].mxu0  ;;  %v732_v30 = vsel %vm452_vm0, %v721_v23, %v731_v25 }
 0x168   : > { %v712_v31 = vpack.c.bf16 %v666_v29, %v663_v26  ;;  %v782_v6 = vsel %vm7784_vm2, 0, %v724_v3 }
 0x169   : > { %v741_v32 = vshrl.u32 %v713_v28, 16  ;;  %800 = vrot.lane.b32.xlu1 %v713_v28, %s7673_s13  ;;  %v744_v35 = vshll.u32 %v713_v28, 16 }
 0x16a   : > { %v734_v33 = vshrl.u32 %v712_v31, 16  ;;  %798 = vrot.lane.b32.xlu0 %v712_v31, %s7673_s13  ;;  %v737_v8 = vshll.u32 %v712_v31, 16  ;;  %v6953_v31 = vld [vmem:[%s8743_s3 + $0x8] sm:$0xff]  }
 0x16b   : > { %v743_v34 = vrot.slane %v741_v32, 7  ;;  %v6955_v32 = vld [vmem:[%s8745_s5] sm:$0xff]  }
 0x16c   : > { %v736_v36 = vrot.slane %v734_v33, 7  ;;  %v6235_v37 = vpop.f32.mrb[8].mxu0  ;;  %6297 = vmatprep.subr.bf16.mxu1 %v6955_v32  ;;  %v6956_v33 = vld [vmem:[%s8745_s5 + $0x8] sm:$0xff]  }
 0x16d   : > { %v746_v38 = vor.u32 %v744_v35, %v743_v34  ;;  %v679_v39 = vpop.f32.mrb[9].mxu0  ;;  %v6954_v34 = vld [vmem:[%s8743_s3 + $0x10] sm:$0xff]  }
 0x16e   : > { %v6236_v40 = vpop.f32.mrb[10].mxu0  ;;  %v739_v10 = vor.u32 %v737_v8, %v736_v36  ;;  %v6958_v35 = vld [vmem:[%s8745_s5 + $0x10] sm:$0xff]  }
 0x16f   : > { %v715_v41 = vpack.c.bf16 %v6236_v40, %v6235_v37  ;;  %v682_v42 = vpop.f32.mrb[11].mxu0  ;;  %v747_v44 = vsel %vm452_vm0, %v736_v36, %v746_v38  ;;  %v6957_v36 = vld [vmem:[%s8743_s3 + $0x18] sm:$0xff]  }
 0x170   : > { %v714_v45 = vpack.c.bf16 %v682_v42, %v679_v39  ;;  %v783_v13 = vsel %vm7784_vm2, 0, %v739_v10  ;;  %v6959_v37 = vld [vmem:[%s8745_s5 + $0x18] sm:$0xff]  }
 0x171   : > { %v756_v46 = vshrl.u32 %v715_v41, 16  ;;  %804 = vrot.lane.b32.xlu1 %v715_v41, %s7673_s13  ;;  %v759_v49 = vshll.u32 %v715_v41, 16 }
 0x172   : > { %v749_v47 = vshrl.u32 %v714_v45, 16  ;;  %802 = vrot.lane.b32.xlu0 %v714_v45, %s7673_s13  ;;  %v752_v15 = vshll.u32 %v714_v45, 16 }
 0x173   : > { %v758_v48 = vrot.slane %v756_v46, 7 }
 0x174   : > { %v751_v50 = vrot.slane %v749_v47, 7  ;;  %v6239_v51 = vpop.f32.mrb[12].mxu0 }
 0x175   : > { %v761_v52 = vor.u32 %v759_v49, %v758_v48  ;;  %v695_v53 = vpop.f32.mrb[13].mxu0 }
 0x176   : > { %v6240_v54 = vpop.f32.mrb[14].mxu0  ;;  %v754_v17 = vor.u32 %v752_v15, %v751_v50 }
 0x177   : > { %v717_v55 = vpack.c.bf16 %v6240_v54, %v6239_v51  ;;  %v698_v56 = vpop.f32.mrb[15].mxu0  ;;  %v762_v57 = vsel %vm452_vm0, %v751_v50, %v761_v52 }
 0x178   : > { %v716_v58 = vpack.c.bf16 %v698_v56, %v695_v53  ;;  %v784_v20 = vsel %vm7784_vm2, 0, %v754_v17 }
 0x179   : > { %v771_v59 = vshrl.u32 %v717_v55, 16  ;;  %808 = vrot.lane.b32.xlu1 %v717_v55, %s7673_s13  ;;  %v774_v62 = vshll.u32 %v717_v55, 16 }
 0x17a   : > { %v764_v60 = vshrl.u32 %v716_v58, 16  ;;  %806 = vrot.lane.b32.xlu0 %v716_v58, %s7673_s13  ;;  %v767_v22 = vshll.u32 %v716_v58, 16 }
 0x17b   : > { %v773_v61 = vrot.slane %v771_v59, 7 }
 0x17c   : > { %v766_v63 = vrot.slane %v764_v60, 7 }
 0x17d   : > { %v776_v0 = vor.u32 %v774_v62, %v773_v61 }
 0x17e   : > { %v769_v24 = vor.u32 %v767_v22, %v766_v63 }
 0x17f   : > { %v777_v1 = vsel %vm452_vm0, %v766_v63, %v776_v0 }
 0x180   : > { %v785_v27 = vsel %vm7784_vm2, 0, %v769_v24 }
 0x1d3   : > { %v797_v4 = vpop.permute.xlu1 %796 }
 0x1d4   : > { %v795_v5 = vpop.permute.xlu0 %794  ;;  %v816_v9 = vsel %vm596_vm4, %v732_v30, %v797_v4  ;;  %v6952_v30 = vld [vmem:[%s8743_s3] sm:$0xff]  }
 0x1d5   : > { %v812_v7 = vsel %vm596_vm4, %v782_v6, %v795_v5  ;;  %6273 = vmatprep.subr.bf16.mxu0 %v6952_v30 }
 0x1d6   : > { %6257 = vmatprep.mubr.bf16.mxu1 %v812_v7  ;;  %6274 = vmatpush3.bf16.msra.mxu0 %v6952_v30 }
 0x1d7   : > { %6258 = vmatmul.mubr.bf16.vlgmr.msra.gmra.mrb[0].mxu1 %v816_v9  ;;  %6275 = vmatprep.subr.bf16.mxu0 %v6953_v31 }
 0x1d8   : > { %6298 = vmatpush3.bf16.msra.mxu1 %v6955_v32 }
 0x1d9   : > { %6299 = vmatprep.subr.bf16.mxu1 %v6956_v33 }
 0x1da   : > { %6276 = vmatpush3.bf16.msra.mxu0 %v6953_v31 }
 0x1db   : > { %v801_v11 = vpop.permute.xlu1 %800  ;;  %6277 = vmatprep.subr.bf16.mxu0 %v6954_v34 }
 0x1dc   : > { %v799_v12 = vpop.permute.xlu0 %798  ;;  %v824_v16 = vsel %vm596_vm4, %v747_v44, %v801_v11  ;;  %6300 = vmatpush3.bf16.msra.mxu1 %v6956_v33 }
 0x1dd   : > { %v820_v14 = vsel %vm596_vm4, %v783_v13, %v799_v12  ;;  %6301 = vmatprep.subr.bf16.mxu1 %v6958_v35 }
 0x1de   : > { %6261 = vmatprep.mubr.bf16.mxu1 %v820_v14  ;;  %6278 = vmatpush3.bf16.msra.mxu0 %v6954_v34 }
 0x1df   : > { %6262 = vmatmul.mubr.bf16.gmra.mrb[4].mxu1 %v824_v16  ;;  %6279 = vmatprep.subr.bf16.mxu0 %v6957_v36 }
 0x1e0   : > { %6302 = vmatpush3.bf16.msra.mxu1 %v6958_v35 }
 0x1e1   : > { %6303 = vmatprep.subr.bf16.mxu1 %v6959_v37 }
 0x1e2   : > { %6280 = vmatpush3.bf16.msra.mxu0 %v6957_v36 }
 0x1e3   : > { %v805_v18 = vpop.permute.xlu1 %804 }
 0x1e4   : > { %v803_v19 = vpop.permute.xlu0 %802  ;;  %v832_v23 = vsel %vm596_vm4, %v762_v57, %v805_v18  ;;  %6304 = vmatpush3.bf16.msra.mxu1 %v6959_v37 }
 0x1e5   : > { %v828_v21 = vsel %vm596_vm4, %v784_v20, %v803_v19 }
 0x1e6   : > { %6265 = vmatprep.mubr.bf16.mxu1 %v828_v21 }
 0x1e7   : > { %6266 = vmatmul.mubr.bf16.gmra.mrb[8].mxu1 %v832_v23 }
 0x1eb   : > { %v809_v25 = vpop.permute.xlu1 %808 }
 0x1ec   : > { %v807_v26 = vpop.permute.xlu0 %806  ;;  %v840_v29 = vsel %vm596_vm4, %v777_v1, %v809_v25 }
 0x1ed   : > { %v836_v28 = vsel %vm596_vm4, %v785_v27, %v807_v26 }
 0x1ee   : > { %6269 = vmatprep.mubr.bf16.mxu1 %v836_v28 }
 0x1ef   : > { %6270 = vmatmul.mubr.bf16.gmra.mrb[12].mxu1 %v840_v29 }
 0x2aa   : > { %v6259_v38 = vpop.f32.mrb[0].mxu1 }
 0x2ab   : > { %v5494_v39 = vmul.f32 -1.442695, %v6259_v38  ;;  %v940_v40 = vpop.f32.mrb[1].mxu1 }
 0x2ac   : > { %v5492_v41 = vmul.f32 -1.442695, %v940_v40  ;;  %v6260_v42 = vpop.f32.mrb[2].mxu1 }
 0x2ad   : > { %7040 = vpow2.f32 %v5494_v39  ;;  %v5495_v44 = vmul.f32 -1.442695, %v6260_v42  ;;  %v943_v45 = vpop.f32.mrb[3].mxu1 }
 0x2ae   : > { %7042 = vpow2.f32 %v5492_v41  ;;  %v5493_v46 = vmul.f32 -1.442695, %v943_v45 }
 0x2af   : > { %7044 = vpow2.f32 %v5495_v44 }
 0x2b0   : > { %7046 = vpow2.f32 %v5493_v46 }
 0x2b1   : > { %7048 = vtanh.f32 %v6259_v38 }
 0x2b2   : > { %v6263_v47 = vpop.f32.mrb[4].mxu1  ;;  %7050 = vtanh.f32 %v940_v40 }
 0x2b3   : > { %v5498_v48 = vmul.f32 -1.442695, %v6263_v47  ;;  %v956_v49 = vpop.f32.mrb[5].mxu1 }
 0x2b4   : > { %v5496_v50 = vmul.f32 -1.442695, %v956_v49  ;;  %v6264_v51 = vpop.f32.mrb[6].mxu1 }
 0x2b5   : > { %7052 = vpow2.f32 %v5498_v48  ;;  %v5499_v52 = vmul.f32 -1.442695, %v6264_v51  ;;  %v959_v53 = vpop.f32.mrb[7].mxu1 }
 0x2b6   : > { %7054 = vpow2.f32 %v5496_v50  ;;  %v5497_v57 = vmul.f32 -1.442695, %v959_v53 }
 0x2b7   : > { %v7041_v54 = vpop.eup %7040  ;;  %7056 = vtanh.f32 %v6260_v42 }
 0x2b8   : > { %v7043_v55 = vpop.eup %7042  ;;  %v1069_v56 = vadd.f32 1.0, %v7041_v54  ;;  %7058 = vpow2.f32 %v5499_v52 }
 0x2b9   : > { %v1067_v58 = vadd.f32 1.0, %v7043_v55  ;;  %7060 = vtanh.f32 %v943_v45  ;;  %v7045_v59 = vpop.eup %7044 }
 0x2ba   : > { %7062 = vrcp.f32 %v1069_v56  ;;  %v6267_v60 = vpop.f32.mrb[8].mxu1  ;;  %v1070_v61 = vadd.f32 1.0, %v7045_v59  ;;  %v7047_v63 = vpop.eup %7046 }
 0x2bb   : > { %7064 = vrcp.f32 %v1067_v58  ;;  %v972_v62 = vpop.f32.mrb[9].mxu1  ;;  %v5502_v0 = vmul.f32 -1.442695, %v6267_v60  ;;  %v7049_v2 = vpop.eup %7048  ;;  %v1068_v3 = vadd.f32 1.0, %v7047_v63 }
 0x2bc   : > { %7066 = vpow2.f32 %v5497_v57  ;;  %v7888_v1 = vpop.f32.mrb[10].mxu1  ;;  %v7051_v5 = vpop.eup %7050  ;;  %v5500_v9 = vmul.f32 -1.442695, %v972_v62 }
 0x2bd   : > { %7068 = vrcp.f32 %v1070_v61  ;;  %v7890_v4 = vpop.f32.mrb[11].mxu1  ;;  %v5503_v16 = vmul.f32 -1.442695, %v7888_v1 }
 0x2be   : > { %7070 = vtanh.f32 %v6263_v47  ;;  %v5501_v23 = vmul.f32 -1.442695, %v7890_v4 }
 0x2bf   : > { %v7053_v6 = vpop.eup %7052  ;;  %7072 = vrcp.f32 %v1068_v3 }
 0x2c0   : > { %v7055_v7 = vpop.eup %7054  ;;  %v1073_v8 = vadd.f32 1.0, %v7053_v6  ;;  %7074 = vpow2.f32 %v5502_v0 }
 0x2c1   : > { %v7057_v10 = vpop.eup %7056  ;;  %7076 = vtanh.f32 %v956_v49  ;;  %v1071_v12 = vadd.f32 1.0, %v7055_v7 }
 0x2c2   : > { %v7059_v11 = vpop.eup %7058  ;;  %7078 = vtanh.f32 %v6264_v51  ;;  %v7892_v13 = vpop.f32.mrb[12].mxu1 }
 0x2c3   : > { %v7061_v14 = vpop.eup %7060  ;;  %7080 = vrcp.f32 %v1073_v8  ;;  %v1074_v15 = vadd.f32 1.0, %v7059_v11  ;;  %v7895_v17 = vpop.f32.mrb[13].mxu1  ;;  %v5506_v29 = vmul.f32 -1.442695, %v7892_v13 }
 0x2c4   : > { %v7063_v18 = vpop.eup %7062  ;;  %7082 = vpow2.f32 %v5500_v9  ;;  %v7897_v19 = vpop.f32.mrb[14].mxu1  ;;  %v5504_v36 = vmul.f32 -1.442695, %v7895_v17 }
 0x2c5   : > { %v7065_v20 = vpop.eup %7064  ;;  %7084 = vrcp.f32 %v1074_v15  ;;  %v7899_v21 = vpop.f32.mrb[15].mxu1  ;;  %v1117_v27 = vmul.f32 %v7063_v18, %v7049_v2  ;;  %v5507_v42 = vmul.f32 -1.442695, %v7897_v19 }
 0x2c6   : > { %v7067_v22 = vpop.eup %7066  ;;  %7086 = vrcp.f32 %v1071_v12  ;;  %v1115_v33 = vmul.f32 %v7065_v20, %v7051_v5  ;;  %v5505_v50 = vmul.f32 -1.442695, %v7899_v21 }
 0x2c7   : > { %v7069_v24 = vpop.eup %7068  ;;  %v1072_v25 = vadd.f32 1.0, %v7067_v22  ;;  %7088 = vpow2.f32 %v5503_v16 }
 0x2c8   : > { %v7071_v26 = vpop.eup %7070  ;;  %v1118_v28 = vmul.f32 %v7069_v24, %v7057_v10  ;;  %7090 = vtanh.f32 %v959_v53 }
 0x2c9   : > { %v7073_v30 = vpop.eup %7072  ;;  %7092 = vrcp.f32 %v1072_v25 }
 0x2ca   : > { %v7075_v31 = vpop.eup %7074  ;;  %v1132_v32 = vpack.c.bf16 %v1118_v28, %v1117_v27  ;;  %7094 = vpow2.f32 %v5501_v23  ;;  %v1116_v34 = vmul.f32 %v7073_v30, %v7061_v14 }
 0x2cb   : > { %v7077_v35 = vpop.eup %7076  ;;  %7096 = vpow2.f32 %v5506_v29  ;;  %v1077_v40 = vadd.f32 1.0, %v7075_v31 }
 0x2cc   : > { %v7079_v37 = vpop.eup %7078  ;;  %v1131_v38 = vpack.c.bf16 %v1116_v34, %v1115_v33  ;;  %7098 = vtanh.f32 %v6267_v60  ;;  %v6961_v33 = vld [vmem:[%s8742_s2 + $0x48] sm:$0xff]   ;;  %v6962_v34 = vld [vmem:[%s8742_s2 + $0x50] sm:$0xff]  }
 0x2cd   : > { %v7081_v39 = vpop.eup %7080  ;;  %7100 = vtanh.f32 %v972_v62 }
 0x2ce   : > { %v7083_v41 = vpop.eup %7082  ;;  %6281 = vmatprep.mubr.msk.bf16.mxu0 %vm596_vm4, %v1131_v38  ;;  %6305 = vmatprep.mubr.msk.bf16.mxu1 %vm596_vm4, %v1131_v38  ;;  %7102 = vpow2.f32 %v5504_v36  ;;  %v1121_v47 = vmul.f32 %v7081_v39, %v7071_v26  ;;  %v6964_v36 = vld [vmem:[%s8742_s2 + $0x60] sm:$0xff]   ;;  %v6966_v38 = vld [vmem:[%s8742_s2 + $0x70] sm:$0xff]   ;;  %v6967_v39 = vld [vmem:[%s8742_s2 + $0x78] sm:$0xff]  }
 0x2cf   : > { %v7085_v44 = vpop.eup %7084  ;;  %v1075_v45 = vadd.f32 1.0, %v7083_v41  ;;  %6282 = vmatmul.mubr.msk.bf16.vlgmr.msra.gmra.mrb[16].mxu0 %vm596_vm4, %v1132_v32  ;;  %6306 = vmatmul.mubr.msk.bf16.vlgmr.msra.gmra.mrb[16].mxu1 %vm596_vm4, %v1132_v32  ;;  %7104 = vtanh.f32 %v7888_v1  ;;  %v6960_v32 = vld [vmem:[%s8742_s2 + $0x40] sm:$0xff]  }
 0x2d0   : > { %v7087_v46 = vpop.eup %7086  ;;  %v1122_v48 = vmul.f32 %v7085_v44, %v7079_v37  ;;  %7106 = vrcp.f32 %v1077_v40  ;;  %6321 = vmatprep.subr.bf16.mxu0 %v6960_v32  ;;  %v6965_v37 = vld [vmem:[%s8742_s2 + $0x68] sm:$0xff]   ;;  %v7955_v40 = vld [vmem:[%s8744_s4] ss:$0 sm:$0xff] }
 0x2d1   : > { %v7089_v49 = vpop.eup %7088  ;;  %7108 = vpow2.f32 %v5507_v42  ;;  %v1119_v56 = vmul.f32 %v7087_v46, %v7077_v35  ;;  %6322 = vmatpush3.bf16.msra.mxu0 %v6960_v32  ;;  %v6963_v35 = vld [vmem:[%s8742_s2 + $0x58] sm:$0xff]  }
 0x2d2   : > { %v7091_v51 = vpop.eup %7090  ;;  %v1078_v52 = vadd.f32 1.0, %v7089_v49  ;;  %v1134_v53 = vpack.c.bf16 %v1122_v48, %v1121_v47  ;;  %7110 = vrcp.f32 %v1075_v45  ;;  %6323 = vmatprep.subr.bf16.mxu0 %v6961_v33 }
 0x2d3   : > { %v7093_v54 = vpop.eup %7092 }
 0x2d4   : > { %v7095_v55 = vpop.eup %7094  ;;  %7112 = vrcp.f32 %v1078_v52  ;;  %v1120_v57 = vmul.f32 %v7093_v54, %v7091_v51 }
 0x2d5   : > { %v1076_v58 = vadd.f32 1.0, %v7095_v55  ;;  %7114 = vpow2.f32 %v5505_v50  ;;  %v7097_v59 = vpop.eup %7096  ;;  %6324 = vmatpush3.bf16.msra.mxu0 %v6961_v33 }
 0x2d6   : > { %7116 = vtanh.f32 %v7890_v4  ;;  %v1133_v60 = vpack.c.bf16 %v1120_v57, %v1119_v56  ;;  %v7099_v61 = vpop.eup %7098  ;;  %v1081_v0 = vadd.f32 1.0, %v7097_v59  ;;  %6325 = vmatprep.subr.bf16.mxu0 %v6962_v34 }
 0x2d7   : > { %7118 = vrcp.f32 %v1076_v58  ;;  %v7101_v62 = vpop.eup %7100 }
 0x2d8   : > { %6285 = vmatprep.mubr.msk.bf16.mxu0 %vm596_vm4, %v1133_v60  ;;  %6309 = vmatprep.mubr.msk.bf16.mxu1 %vm596_vm4, %v1133_v60  ;;  %v7103_v63 = vpop.eup %7102  ;;  %7120 = vtanh.f32 %v7892_v13 }
 0x2d9   : > { %6286 = vmatmul.mubr.msk.bf16.gmra.mrb[20].mxu0 %vm596_vm4, %v1134_v53  ;;  %6310 = vmatmul.mubr.msk.bf16.gmra.mrb[20].mxu1 %vm596_vm4, %v1134_v53  ;;  %v7105_v1 = vpop.eup %7104  ;;  %7122 = vtanh.f32 %v7895_v17  ;;  %v1079_v4 = vadd.f32 1.0, %v7103_v63 }
 0x2da   : > { %v7107_v2 = vpop.eup %7106  ;;  %7124 = vrcp.f32 %v1081_v0  ;;  %6326 = vmatpush3.bf16.msra.mxu0 %v6962_v34 }
 0x2db   : > { %v7109_v3 = vpop.eup %7108  ;;  %7126 = vtanh.f32 %v7897_v19  ;;  %v1125_v9 = vmul.f32 %v7107_v2, %v7099_v61  ;;  %6327 = vmatprep.subr.bf16.mxu0 %v6963_v35 }
 0x2dc   : > { %v7111_v5 = vpop.eup %7110  ;;  %v1082_v6 = vadd.f32 1.0, %v7109_v3 }
 0x2dd   : > { %v1123_v15 = vmul.f32 %v7111_v5, %v7101_v62 }
 0x2de   : > { %v7113_v7 = vpop.eup %7112  ;;  %7128 = vrcp.f32 %v1082_v6  ;;  %6328 = vmatpush3.bf16.msra.mxu0 %v6963_v35 }
 0x2df   : > { %v7115_v8 = vpop.eup %7114  ;;  %v1126_v10 = vmul.f32 %v7113_v7, %v7105_v1  ;;  %7130 = vrcp.f32 %v1079_v4  ;;  %6329 = vmatprep.subr.bf16.mxu0 %v6964_v36 }
 0x2e0   : > { %v7117_v11 = vpop.eup %7116  ;;  %v1080_v12 = vadd.f32 1.0, %v7115_v8  ;;  %7132 = vtanh.f32 %v7899_v21 }
 0x2e1   : > { %v7119_v14 = vpop.eup %7118  ;;  %v1136_v13 = vpack.c.bf16 %v1126_v10, %v1125_v9 }
 0x2e2   : > { %7134 = vrcp.f32 %v1080_v12  ;;  %v1124_v16 = vmul.f32 %v7119_v14, %v7117_v11  ;;  %v7121_v18 = vpop.eup %7120  ;;  %6330 = vmatpush3.bf16.msra.mxu0 %v6964_v36 }
 0x2e3   : > { %v7123_v20 = vpop.eup %7122  ;;  %6331 = vmatprep.subr.bf16.mxu0 %v6965_v37 }
 0x2e4   : > { %v1135_v17 = vpack.c.bf16 %v1124_v16, %v1123_v15  ;;  %v7125_v19 = vpop.eup %7124 }
 0x2e5   : > { %v7127_v22 = vpop.eup %7126  ;;  %v1129_v21 = vmul.f32 %v7125_v19, %v7121_v18 }
 0x2e6   : > { %6289 = vmatprep.mubr.msk.bf16.mxu0 %vm596_vm4, %v1135_v17  ;;  %6313 = vmatprep.mubr.msk.bf16.mxu1 %vm596_vm4, %v1135_v17 }
 0x2e7   : > { %6290 = vmatmul.mubr.msk.bf16.gmra.mrb[24].mxu0 %vm596_vm4, %v1136_v13  ;;  %6314 = vmatmul.mubr.msk.bf16.gmra.mrb[24].mxu1 %vm596_vm4, %v1136_v13 }
 0x2e8   : > { %v7129_v23 = vpop.eup %7128  ;;  %6332 = vmatpush3.bf16.msra.mxu0 %v6965_v37 }
 0x2e9   : > { %v7131_v24 = vpop.eup %7130  ;;  %v1130_v25 = vmul.f32 %v7129_v23, %v7127_v22  ;;  %6333 = vmatprep.subr.bf16.mxu0 %v6966_v38 }
 0x2ea   : > { %v7133_v26 = vpop.eup %7132  ;;  %v1127_v29 = vmul.f32 %v7131_v24, %v7123_v20 }
 0x2eb   : > { %v1138_v28 = vpack.c.bf16 %v1130_v25, %v1129_v21 }
 0x2ec   : > { %v7135_v27 = vpop.eup %7134  ;;  %6334 = vmatpush3.bf16.msra.mxu0 %v6966_v38 }
 0x2ed   : > { %v1128_v30 = vmul.f32 %v7135_v27, %v7133_v26  ;;  %6335 = vmatprep.subr.bf16.mxu0 %v6967_v39 }
 0x2ef   : > { %v1137_v31 = vpack.c.bf16 %v1128_v30, %v1127_v29 }
 0x2f0   : > { %6336 = vmatpush3.bf16.msra.mxu0 %v6967_v39 }
 0x2f1   : > { %6293 = vmatprep.mubr.msk.bf16.mxu0 %vm596_vm4, %v1137_v31  ;;  %6317 = vmatprep.mubr.msk.bf16.mxu1 %vm596_vm4, %v1137_v31 }
 0x2f2   : > { %6294 = vmatmul.mubr.msk.bf16.gmra.mrb[28].mxu0 %vm596_vm4, %v1138_v28  ;;  %6318 = vmatmul.mubr.msk.bf16.gmra.mrb[28].mxu1 %vm596_vm4, %v1138_v28 }
 0x3a2   : > { %v6283_v41 = vpop.f32.mrb[16].mxu0 }
 0x3a3   : > { %v1245_v42 = vadd.f32 %v6283_v41, %v7955_v40  ;;  %v1236_v44 = vpop.f32.mrb[17].mxu0 }
 0x3a4   : > { %v1237_v45 = vadd.f32 %v7955_v40, %v1236_v44  ;;  %v6284_v46 = vpop.f32.mrb[18].mxu0 }
 0x3a5   : > { %v1248_v47 = vadd.f32 %v6284_v46, %v7955_v40  ;;  %v1239_v48 = vpop.f32.mrb[19].mxu0  ;;  %v1301_v50 = vadd.f32 %v1245_v42, %v1245_v42 }
 0x3a6   : > { %v1240_v49 = vadd.f32 %v7955_v40, %v1239_v48  ;;  %v1299_v52 = vadd.f32 %v1237_v45, %v1237_v45 }
 0x3a7   : > { %v1302_v51 = vadd.f32 %v1248_v47, %v1248_v47 }
 0x3a8   : > { %v1300_v53 = vadd.f32 %v1240_v49, %v1240_v49 }
 0x3a9   : > { %v1468_v54 = vpack.c.bf16 %v1302_v51, %v1301_v50 }
 0x3aa   : > { %v7961_v55 = vpack.c.bf16 %v1300_v53, %v1299_v52 }
 0x3ab   : > { %v1484_v56 = vrot.slane %v1468_v54, 7  ;;  %1507 = vrot.lane.b32.xlu1 %v1468_v54, %s7673_s13 }
 0x3ac   : > { %v1483_v57 = vrot.slane %v7961_v55, 7  ;;  %v6287_v58 = vpop.f32.mrb[20].mxu0  ;;  %1505 = vrot.lane.b32.xlu0 %v7961_v55, %s7673_s13 }
 0x3ad   : > { %v1261_v59 = vadd.f32 %v6287_v58, %v7955_v40  ;;  %v1252_v60 = vpop.f32.mrb[21].mxu0 }
 0x3ae   : > { %v1253_v61 = vadd.f32 %v7955_v40, %v1252_v60  ;;  %v6288_v62 = vpop.f32.mrb[22].mxu0  ;;  %v1485_v63 = vsel %vm517_vm1, %v1483_v57, %v1484_v56  ;;  %v1498_v50 = vsel %vm517_vm1, 0, %v1483_v57 }
 0x3af   : > { %v1264_v0 = vadd.f32 %v6288_v62, %v7955_v40  ;;  %v1255_v1 = vpop.f32.mrb[23].mxu0  ;;  %v1305_v3 = vadd.f32 %v1261_v59, %v1261_v59 }
 0x3b0   : > { %v1256_v2 = vadd.f32 %v7955_v40, %v1255_v1  ;;  %v1303_v5 = vadd.f32 %v1253_v61, %v1253_v61 }
 0x3b1   : > { %v1306_v4 = vadd.f32 %v1264_v0, %v1264_v0 }
 0x3b2   : > { %v1304_v6 = vadd.f32 %v1256_v2, %v1256_v2 }
 0x3b3   : > { %v1470_v7 = vpack.c.bf16 %v1306_v4, %v1305_v3  ;;  %v6968_v3 = vld [vmem:[%s8743_s3 + $0x20] sm:$0xff]   ;;  %v6969_v4 = vld [vmem:[%s8743_s3 + $0x28] sm:$0xff]  }
 0x3b4   : > { %v1469_v8 = vpack.c.bf16 %v1304_v6, %v1303_v5  ;;  %6353 = vmatprep.subr.bf16.mxu1 %v6968_v3  ;;  %v6970_v5 = vld [vmem:[%s8743_s3 + $0x30] sm:$0xff]   ;;  %v6971_v6 = vld [vmem:[%s8743_s3 + $0x38] sm:$0xff]  }
 0x3b5   : > { %v1487_v9 = vrot.slane %v1470_v7, 7  ;;  %1511 = vrot.lane.b32.xlu1 %v1470_v7, %s7673_s13  ;;  %6354 = vmatpush3.bf16.msra.mxu1 %v6968_v3  ;;  %v8016_v7 = vld [vmem:[%s8745_s5 + $0x20] sm:$0xff]  }
 0x3b6   : > { %v1486_v10 = vrot.slane %v1469_v8, 7  ;;  %1509 = vrot.lane.b32.xlu0 %v1469_v8, %s7673_s13  ;;  %6355 = vmatprep.subr.bf16.mxu1 %v6969_v4 }
 0x3b8   : > { %v1488_v11 = vsel %vm517_vm1, %v1486_v10, %v1487_v9  ;;  %v1500_v54 = vsel %vm517_vm1, 0, %v1486_v10 }
 0x3b9   : > { %6356 = vmatpush3.bf16.msra.mxu1 %v6969_v4 }
 0x3ba   : > { %v6291_v12 = vpop.f32.mrb[24].mxu0  ;;  %6357 = vmatprep.subr.bf16.mxu1 %v6970_v5 }
 0x3bb   : > { %v1277_v14 = vadd.f32 %v6291_v12, %v7955_v40  ;;  %v1268_v13 = vpop.f32.mrb[25].mxu0 }
 0x3bc   : > { %v1269_v15 = vadd.f32 %v7955_v40, %v1268_v13  ;;  %v6292_v16 = vpop.f32.mrb[26].mxu0 }
 0x3bd   : > { %v1280_v17 = vadd.f32 %v6292_v16, %v7955_v40  ;;  %v1271_v18 = vpop.f32.mrb[27].mxu0  ;;  %v1309_v19 = vadd.f32 %v1277_v14, %v1277_v14  ;;  %6358 = vmatpush3.bf16.msra.mxu1 %v6970_v5 }
 0x3be   : > { %v1272_v20 = vadd.f32 %v7955_v40, %v1271_v18  ;;  %v1307_v23 = vadd.f32 %v1269_v15, %v1269_v15  ;;  %6359 = vmatprep.subr.bf16.mxu1 %v6971_v6 }
 0x3bf   : > { %v1310_v22 = vadd.f32 %v1280_v17, %v1280_v17 }
 0x3c0   : > { %v1308_v24 = vadd.f32 %v1272_v20, %v1272_v20 }
 0x3c1   : > { %v1472_v21 = vpack.c.bf16 %v1310_v22, %v1309_v19  ;;  %6360 = vmatpush3.bf16.msra.mxu1 %v6971_v6 }
 0x3c2   : > { %v1471_v25 = vpack.c.bf16 %v1308_v24, %v1307_v23  ;;  %6377 = vmatprep.subr.bf16.mxu1 %v8016_v7 }
 0x3c3   : > { %v1490_v26 = vrot.slane %v1472_v21, 7  ;;  %1515 = vrot.lane.b32.xlu1 %v1472_v21, %s7673_s13 }
 0x3c4   : > { %v1489_v27 = vrot.slane %v1471_v25, 7  ;;  %1513 = vrot.lane.b32.xlu0 %v1471_v25, %s7673_s13 }
 0x3c5   : > { %v6295_v28 = vpop.f32.mrb[28].mxu0 }
 0x3c6   : > { %v1293_v29 = vadd.f32 %v6295_v28, %v7955_v40  ;;  %v1284_v30 = vpop.f32.mrb[29].mxu0  ;;  %v1491_v31 = vsel %vm517_vm1, %v1489_v27, %v1490_v26  ;;  %v1502_v57 = vsel %vm517_vm1, 0, %v1489_v27 }
 0x3c7   : > { %v1285_v32 = vadd.f32 %v7955_v40, %v1284_v30  ;;  %v6296_v33 = vpop.f32.mrb[30].mxu0 }
 0x3c8   : > { %v1296_v34 = vadd.f32 %v6296_v33, %v7955_v40  ;;  %v1287_v35 = vpop.f32.mrb[31].mxu0  ;;  %v1313_v37 = vadd.f32 %v1293_v29, %v1293_v29 }
 0x3c9   : > { %v1288_v36 = vadd.f32 %v7955_v40, %v1287_v35  ;;  %v1311_v39 = vadd.f32 %v1285_v32, %v1285_v32 }
 0x3ca   : > { %v1314_v38 = vadd.f32 %v1296_v34, %v1296_v34 }
 0x3cb   : > { %v1312_v41 = vadd.f32 %v1288_v36, %v1288_v36 }
 0x3cc   : > { %v1474_v42 = vpack.c.bf16 %v1314_v38, %v1313_v37 }
 0x3cd   : > { %v1473_v44 = vpack.c.bf16 %v1312_v41, %v1311_v39 }
 0x3ce   : > { %v1493_v45 = vrot.slane %v1474_v42, 7  ;;  %1519 = vrot.lane.b32.xlu1 %v1474_v42, %s7673_s13 }
 0x3cf   : > { %v1492_v46 = vrot.slane %v1473_v44, 7  ;;  %1517 = vrot.lane.b32.xlu0 %v1473_v44, %s7673_s13 }
 0x3d1   : > { %v1494_v47 = vsel %vm517_vm1, %v1492_v46, %v1493_v45  ;;  %v1504_v0 = vsel %vm517_vm1, 0, %v1492_v46 }
 0x41d   : > { %v1508_v48 = vpop.permute.xlu1 %1507 }
 0x41e   : > { %v1506_v49 = vpop.permute.xlu0 %1505  ;;  %v1526_v51 = vsel %vm596_vm4, %v1485_v63, %v1508_v48 }
 0x41f   : > { %v1522_v40 = vsel %vm596_vm4, %v1498_v50, %v1506_v49 }
 0x420   : > { %6337 = vmatprep.mubr.bf16.mxu0 %v1522_v40 }
 0x421   : > { %6338 = vmatmul.mubr.bf16.vlgmr.msra.gmra.mrb[32].mxu0 %v1526_v51 }
 0x427   : > { %v1512_v52 = vpop.permute.xlu1 %1511 }
 0x428   : > { %v1510_v53 = vpop.permute.xlu0 %1509  ;;  %v1533_v56 = vsel %vm596_vm4, %v1488_v11, %v1512_v52 }
 0x429   : > { %v1529_v55 = vsel %vm596_vm4, %v1500_v54, %v1510_v53 }
 0x42a   : > { %6341 = vmatprep.mubr.bf16.mxu0 %v1529_v55 }
 0x42b   : > { %6342 = vmatmul.mubr.bf16.gmra.mrb[36].mxu0 %v1533_v56 }
 0x435   : > { %v1516_v58 = vpop.permute.xlu1 %1515 }
 0x436   : > { %v1514_v59 = vpop.permute.xlu0 %1513  ;;  %v1540_v61 = vsel %vm596_vm4, %v1491_v31, %v1516_v58 }
 0x437   : > { %v1536_v60 = vsel %vm596_vm4, %v1502_v57, %v1514_v59 }
 0x438   : > { %6345 = vmatprep.mubr.bf16.mxu0 %v1536_v60 }
 0x439   : > { %6346 = vmatmul.mubr.bf16.gmra.mrb[40].mxu0 %v1540_v61 }
 0x440   : > { %v1520_v62 = vpop.permute.xlu1 %1519 }
 0x441   : > { %v1518_v63 = vpop.permute.xlu0 %1517  ;;  %v1547_v2 = vsel %vm596_vm4, %v1494_v47, %v1520_v62 }
 0x442   : > { %v1543_v1 = vsel %vm596_vm4, %v1504_v0, %v1518_v63 }
 0x443   : > { %6349 = vmatprep.mubr.bf16.mxu0 %v1543_v1 }
 0x444   : > { %6350 = vmatmul.mubr.bf16.gmra.mrb[44].mxu0 %v1547_v2  ;;  %v6973_v2 = vld [vmem:[%s8745_s5 + $0x28] sm:$0xff]  }
 0x4f4   : > { %v6339_v8 = vpop.f32.mrb[32].mxu0 }
 0x4f5   : > { %v5560_v9 = vmul.f32 -1.442695, %v6339_v8  ;;  %v1648_v10 = vpop.f32.mrb[33].mxu0 }
 0x4f6   : > { %v5558_v11 = vmul.f32 -1.442695, %v1648_v10  ;;  %v6340_v12 = vpop.f32.mrb[34].mxu0 }
 0x4f7   : > { %7136 = vpow2.f32 %v5560_v9  ;;  %v5561_v14 = vmul.f32 -1.442695, %v6340_v12  ;;  %v1651_v13 = vpop.f32.mrb[35].mxu0 }
 0x4f8   : > { %7138 = vpow2.f32 %v5558_v11  ;;  %v5559_v15 = vmul.f32 -1.442695, %v1651_v13 }
 0x4f9   : > { %7140 = vpow2.f32 %v5561_v14 }
 0x4fa   : > { %7142 = vpow2.f32 %v5559_v15 }
 0x4fb   : > { %7144 = vtanh.f32 %v6339_v8 }
 0x4fc   : > { %7146 = vtanh.f32 %v1648_v10 }
 0x4fe   : > { %v6343_v16 = vpop.f32.mrb[36].mxu0 }
 0x4ff   : > { %v5564_v17 = vmul.f32 -1.442695, %v6343_v16  ;;  %v1664_v18 = vpop.f32.mrb[37].mxu0 }
 0x500   : > { %v5562_v20 = vmul.f32 -1.442695, %v1664_v18  ;;  %v6344_v19 = vpop.f32.mrb[38].mxu0 }
 0x501   : > { %v7137_v22 = vpop.eup %7136  ;;  %7148 = vpow2.f32 %v5564_v17  ;;  %v1667_v23 = vpop.f32.mrb[39].mxu0  ;;  %v5565_v25 = vmul.f32 -1.442695, %v6344_v19 }
 0x502   : > { %v7139_v24 = vpop.eup %7138  ;;  %v1777_v21 = vadd.f32 1.0, %v7137_v22  ;;  %7150 = vpow2.f32 %v5562_v20  ;;  %v5563_v30 = vmul.f32 -1.442695, %v1667_v23 }
 0x503   : > { %v1775_v26 = vadd.f32 1.0, %v7139_v24  ;;  %7152 = vtanh.f32 %v6340_v12  ;;  %v7141_v27 = vpop.eup %7140 }
 0x504   : > { %7154 = vrcp.f32 %v1777_v21  ;;  %v1778_v28 = vadd.f32 1.0, %v7141_v27  ;;  %v7143_v29 = vpop.eup %7142 }
 0x505   : > { %7156 = vrcp.f32 %v1775_v26  ;;  %v1776_v31 = vadd.f32 1.0, %v7143_v29  ;;  %v7145_v32 = vpop.eup %7144 }
 0x506   : > { %7158 = vpow2.f32 %v5565_v25  ;;  %v7147_v33 = vpop.eup %7146 }
 0x507   : > { %7160 = vrcp.f32 %v1778_v28 }
 0x508   : > { %7162 = vtanh.f32 %v1651_v13  ;;  %v6974_v13 = vld [vmem:[%s8745_s5 + $0x30] sm:$0xff]  }
 0x509   : > { %7164 = vrcp.f32 %v1776_v31 }
 0x50a   : > { %7166 = vpow2.f32 %v5563_v30 }
 0x50b   : > { %v7149_v34 = vpop.eup %7148  ;;  %7168 = vtanh.f32 %v6343_v16 }
 0x50c   : > { %v7151_v35 = vpop.eup %7150  ;;  %v1781_v36 = vadd.f32 1.0, %v7149_v34  ;;  %v6347_v37 = vpop.f32.mrb[40].mxu0  ;;  %7170 = vtanh.f32 %v1664_v18 }
 0x50d   : > { %v7153_v38 = vpop.eup %7152  ;;  %v1779_v39 = vadd.f32 1.0, %v7151_v35  ;;  %v5568_v41 = vmul.f32 -1.442695, %v6347_v37  ;;  %v1680_v42 = vpop.f32.mrb[41].mxu0  ;;  %7172 = vtanh.f32 %v6344_v19 }
 0x50e   : > { %v7155_v44 = vpop.eup %7154  ;;  %v5566_v45 = vmul.f32 -1.442695, %v1680_v42  ;;  %v6348_v46 = vpop.f32.mrb[42].mxu0  ;;  %7174 = vrcp.f32 %v1781_v36 }
 0x50f   : > { %v7157_v47 = vpop.eup %7156  ;;  %v8019_v48 = vpop.f32.mrb[43].mxu0  ;;  %7176 = vpow2.f32 %v5568_v41  ;;  %v5569_v51 = vmul.f32 -1.442695, %v6348_v46  ;;  %v1825_v53 = vmul.f32 %v7155_v44, %v7145_v32 }
 0x510   : > { %v7159_v49 = vpop.eup %7158  ;;  %7178 = vrcp.f32 %v1779_v39  ;;  %v5567_v59 = vmul.f32 -1.442695, %v8019_v48  ;;  %v1823_v57 = vmul.f32 %v7157_v47, %v7147_v33 }
 0x511   : > { %v7161_v50 = vpop.eup %7160  ;;  %v1782_v40 = vadd.f32 1.0, %v7159_v49  ;;  %7180 = vpow2.f32 %v5566_v45 }
 0x512   : > { %v7163_v52 = vpop.eup %7162  ;;  %v1826_v54 = vmul.f32 %v7161_v50, %v7153_v38 }
 0x513   : > { %v7165_v55 = vpop.eup %7164  ;;  %7182 = vrcp.f32 %v1782_v40 }
 0x514   : > { %v7167_v56 = vpop.eup %7166  ;;  %v8021_v58 = vpack.c.bf16 %v1826_v54, %v1825_v53  ;;  %v1824_v60 = vmul.f32 %v7165_v55, %v7163_v52  ;;  %7184 = vpow2.f32 %v5569_v51 }
 0x515   : > { %v1780_v61 = vadd.f32 1.0, %v7167_v56  ;;  %v7169_v62 = vpop.eup %7168  ;;  %7186 = vtanh.f32 %v1667_v23  ;;  %v6975_v23 = vld [vmem:[%s8745_s5 + $0x38] sm:$0xff]  }
 0x516   : > { %v8024_v63 = vpack.c.bf16 %v1824_v60, %v1823_v57  ;;  %v7171_v0 = vpop.eup %7170 }
 0x517   : > { %7188 = vrcp.f32 %v1780_v61  ;;  %v6351_v1 = vpop.f32.mrb[44].mxu0  ;;  %v7173_v3 = vpop.eup %7172 }
 0x518   : > { %7190 = vpow2.f32 %v5567_v59  ;;  %v5572_v4 = vmul.f32 -1.442695, %v6351_v1  ;;  %v1696_v5 = vpop.f32.mrb[45].mxu0  ;;  %6361 = vmatprep.mubr.msk.bf16.mxu1 %vm596_vm4, %v8024_v63  ;;  %v7175_v6 = vpop.eup %7174 }
 0x519   : > { %v5570_v8 = vmul.f32 -1.442695, %v1696_v5  ;;  %v6352_v9 = vpop.f32.mrb[46].mxu0  ;;  %6362 = vmatmul.mubr.msk.bf16.vlgmr.msra.gmra.mrb[32].mxu1 %vm596_vm4, %v8021_v58  ;;  %v7177_v10 = vpop.eup %7176  ;;  %v1829_v20 = vmul.f32 %v7175_v6, %v7169_v62 }
 0x51a   : > { %7192 = vpow2.f32 %v5572_v4  ;;  %v8033_v11 = vpop.f32.mrb[47].mxu0  ;;  %6378 = vmatpush3.bf16.msra.mxu1 %v8016_v7  ;;  %v7179_v12 = vpop.eup %7178  ;;  %v1785_v14 = vadd.f32 1.0, %v7177_v10  ;;  %v5573_v16 = vmul.f32 -1.442695, %v6352_v9  ;;  %v6980_v10 = vld [vmem:[%s8742_s2 + $0xa0] sm:$0xff]  }
 0x51b   : > { %7194 = vtanh.f32 %v6347_v37  ;;  %6379 = vmatprep.subr.bf16.mxu1 %v6973_v2  ;;  %v7181_v15 = vpop.eup %7180  ;;  %v5571_v7 = vmul.f32 -1.442695, %v8033_v11  ;;  %v1827_v28 = vmul.f32 %v7179_v12, %v7171_v0  ;;  %v6982_v12 = vld [vmem:[%s8742_s2 + $0xb0] sm:$0xff]  }
 0x51c   : > { %7196 = vtanh.f32 %v1680_v42  ;;  %v1783_v18 = vadd.f32 1.0, %v7181_v15 }
 0x51d   : > { %v7183_v17 = vpop.eup %7182  ;;  %7198 = vpow2.f32 %v5570_v8  ;;  %v6978_v8 = vld [vmem:[%s8742_s2 + $0x90] sm:$0xff]  }
 0x51e   : > { %7200 = vtanh.f32 %v6348_v46  ;;  %v1830_v19 = vmul.f32 %v7183_v17, %v7173_v3  ;;  %6380 = vmatpush3.bf16.msra.mxu1 %v6973_v2  ;;  %v7185_v22 = vpop.eup %7184 }
 0x51f   : > { %7202 = vrcp.f32 %v1785_v14  ;;  %6381 = vmatprep.subr.bf16.mxu1 %v6974_v13  ;;  %v7187_v24 = vpop.eup %7186  ;;  %v1786_v21 = vadd.f32 1.0, %v7185_v22  ;;  %v6983_v14 = vld [vmem:[%s8742_s2 + $0xb8] sm:$0xff]  }
 0x520   : > { %7204 = vpow2.f32 %v5573_v16  ;;  %v8043_v25 = vpack.c.bf16 %v1830_v19, %v1829_v20 }
 0x521   : > { %v7189_v26 = vpop.eup %7188  ;;  %7206 = vrcp.f32 %v1783_v18 }
 0x522   : > { %v7191_v27 = vpop.eup %7190  ;;  %7208 = vrcp.f32 %v1786_v21  ;;  %v1828_v29 = vmul.f32 %v7189_v26, %v7187_v24  ;;  %6382 = vmatpush3.bf16.msra.mxu1 %v6974_v13  ;;  %v8092_v13 = vld [vmem:[%s8744_s4 + $0x1] ss:$0 sm:$0xff] }
 0x523   : > { %v1784_v30 = vadd.f32 1.0, %v7191_v27  ;;  %7210 = vpow2.f32 %v5571_v7  ;;  %6383 = vmatprep.subr.bf16.mxu1 %v6975_v23 }
 0x524   : > { %v7193_v31 = vpop.eup %7192  ;;  %7212 = vtanh.f32 %v8019_v48  ;;  %v1841_v32 = vpack.c.bf16 %v1828_v29, %v1827_v28 }
 0x525   : > { %v7195_v33 = vpop.eup %7194  ;;  %7214 = vrcp.f32 %v1784_v30  ;;  %v1789_v36 = vadd.f32 1.0, %v7193_v31 }
 0x526   : > { %v7197_v34 = vpop.eup %7196  ;;  %6365 = vmatprep.mubr.msk.bf16.mxu1 %vm596_vm4, %v1841_v32  ;;  %6384 = vmatpush3.bf16.msra.mxu1 %v6975_v23  ;;  %7216 = vtanh.f32 %v6351_v1 }
 0x527   : > { %v7199_v35 = vpop.eup %7198  ;;  %6366 = vmatmul.mubr.msk.bf16.gmra.mrb[36].mxu1 %vm596_vm4, %v8043_v25  ;;  %7218 = vtanh.f32 %v1696_v5 }
 0x528   : > { %v7201_v37 = vpop.eup %7200  ;;  %v1787_v41 = vadd.f32 1.0, %v7199_v35  ;;  %7220 = vrcp.f32 %v1789_v36 }
 0x529   : > { %v7203_v38 = vpop.eup %7202  ;;  %7222 = vtanh.f32 %v6352_v9  ;;  %v6979_v9 = vld [vmem:[%s8742_s2 + $0x98] sm:$0xff]  }
 0x52a   : > { %v7205_v39 = vpop.eup %7204  ;;  %v1833_v47 = vmul.f32 %v7203_v38, %v7195_v33 }
 0x52b   : > { %v7207_v42 = vpop.eup %7206  ;;  %v1790_v44 = vadd.f32 1.0, %v7205_v39 }
 0x52c   : > { %v7209_v45 = vpop.eup %7208  ;;  %v1831_v52 = vmul.f32 %v7207_v42, %v7197_v34 }
 0x52d   : > { %v7211_v46 = vpop.eup %7210  ;;  %7224 = vrcp.f32 %v1790_v44  ;;  %v1834_v48 = vmul.f32 %v7209_v45, %v7201_v37 }
 0x52e   : > { %v7213_v49 = vpop.eup %7212  ;;  %7226 = vrcp.f32 %v1787_v41  ;;  %v1788_v50 = vadd.f32 1.0, %v7211_v46 }
 0x52f   : > { %v7215_v40 = vpop.eup %7214  ;;  %7228 = vtanh.f32 %v8033_v11  ;;  %v1844_v51 = vpack.c.bf16 %v1834_v48, %v1833_v47  ;;  %v6981_v11 = vld [vmem:[%s8742_s2 + $0xa8] sm:$0xff]  }
 0x530   : > { %7230 = vrcp.f32 %v1788_v50  ;;  %v1832_v53 = vmul.f32 %v7215_v40, %v7213_v49  ;;  %v7217_v55 = vpop.eup %7216 }
 0x531   : > { %v7219_v56 = vpop.eup %7218 }
 0x532   : > { %v1843_v54 = vpack.c.bf16 %v1832_v53, %v1831_v52  ;;  %v7221_v59 = vpop.eup %7220 }
 0x533   : > { %v7223_v57 = vpop.eup %7222  ;;  %v1837_v62 = vmul.f32 %v7221_v59, %v7217_v55 }
 0x534   : > { %6369 = vmatprep.mubr.msk.bf16.mxu1 %vm596_vm4, %v1843_v54 }
 0x535   : > { %6370 = vmatmul.mubr.msk.bf16.gmra.mrb[40].mxu1 %vm596_vm4, %v1844_v51 }
 0x537   : > { %v7225_v60 = vpop.eup %7224 }
 0x538   : > { %v7227_v61 = vpop.eup %7226  ;;  %v1838_v0 = vmul.f32 %v7225_v60, %v7223_v57 }
 0x539   : > { %v7229_v1 = vpop.eup %7228  ;;  %v1835_v4 = vmul.f32 %v7227_v61, %v7219_v56 }
 0x53a   : > { %v7231_v2 = vpop.eup %7230  ;;  %v1846_v3 = vpack.c.bf16 %v1838_v0, %v1837_v62 }
 0x53b   : > { %v1836_v5 = vmul.f32 %v7231_v2, %v7229_v1 }
 0x53d   : > { %v1845_v6 = vpack.c.bf16 %v1836_v5, %v1835_v4 }
 0x53f   : > { %6373 = vmatprep.mubr.msk.bf16.mxu1 %vm596_vm4, %v1845_v6 }
 0x540   : > { %6374 = vmatmul.mubr.msk.bf16.gmra.mrb[44].mxu1 %vm596_vm4, %v1846_v3 }
 0x541   : > { %6385 = vmatprep.mubr.msk.bf16.mxu1 %vm596_vm4, %v8024_v63  ;;  %v6976_v63 = vld [vmem:[%s8742_s2 + $0x80] sm:$0xff]  }
 0x542   : > { %6401 = vmatprep.subr.bf16.mxu0 %v6976_v63 }
 0x543   : > { %6402 = vmatpush3.bf16.msra.mxu0 %v6976_v63 }
 0x548   : > { %6386 = vmatmul.mubr.msk.bf16.vlgmr.msra.gmra.mrb[16].mxu1 %vm596_vm4, %v8021_v58  ;;  %v6977_v58 = vld [vmem:[%s8742_s2 + $0x88] sm:$0xff]  }
 0x549   : > { %6389 = vmatprep.mubr.msk.bf16.mxu1 %vm596_vm4, %v1841_v32  ;;  %6403 = vmatprep.subr.bf16.mxu0 %v6977_v58 }
 0x54a   : > { %6404 = vmatpush3.bf16.msra.mxu0 %v6977_v58 }
 0x54b   : > { %6405 = vmatprep.subr.bf16.mxu0 %v6978_v8 }
 0x54e   : > { %6406 = vmatpush3.bf16.msra.mxu0 %v6978_v8 }
 0x54f   : > { %6407 = vmatprep.subr.bf16.mxu0 %v6979_v9 }
 0x550   : > { %6390 = vmatmul.mubr.msk.bf16.gmra.mrb[20].mxu1 %vm596_vm4, %v8043_v25 }
 0x551   : > { %6393 = vmatprep.mubr.msk.bf16.mxu1 %vm596_vm4, %v1843_v54 }
 0x552   : > { %6408 = vmatpush3.bf16.msra.mxu0 %v6979_v9 }
 0x553   : > { %6409 = vmatprep.subr.bf16.mxu0 %v6980_v10 }
 0x556   : > { %6410 = vmatpush3.bf16.msra.mxu0 %v6980_v10 }
 0x557   : > { %6411 = vmatprep.subr.bf16.mxu0 %v6981_v11 }
 0x558   : > { %6394 = vmatmul.mubr.msk.bf16.gmra.mrb[24].mxu1 %vm596_vm4, %v1844_v51 }
 0x559   : > { %6397 = vmatprep.mubr.msk.bf16.mxu1 %vm596_vm4, %v1845_v6 }
 0x55a   : > { %6412 = vmatpush3.bf16.msra.mxu0 %v6981_v11 }
 0x55b   : > { %6413 = vmatprep.subr.bf16.mxu0 %v6982_v12 }
 0x55e   : > { %6414 = vmatpush3.bf16.msra.mxu0 %v6982_v12 }
 0x55f   : > { %6415 = vmatprep.subr.bf16.mxu0 %v6983_v14 }
 0x560   : > { %6398 = vmatmul.mubr.msk.bf16.gmra.mrb[28].mxu1 %vm596_vm4, %v1846_v3 }
 0x562   : > { %6416 = vmatpush3.bf16.msra.mxu0 %v6983_v14 }
 0x5ec   : > { %v6363_v15 = vpop.f32.mrb[32].mxu1 }
 0x5ed   : > { %v1955_v16 = vadd.f32 %v6363_v15, %v8092_v13  ;;  %v1946_v17 = vpop.f32.mrb[33].mxu1 }
 0x5ee   : > { %v1947_v18 = vadd.f32 %v8092_v13, %v1946_v17  ;;  %v6364_v20 = vpop.f32.mrb[34].mxu1 }
 0x5ef   : > { %v1958_v19 = vadd.f32 %v6364_v20, %v8092_v13  ;;  %v1949_v22 = vpop.f32.mrb[35].mxu1  ;;  %v2011_v23 = vadd.f32 %v1955_v16, %v1955_v16 }
 0x5f0   : > { %v1950_v7 = vadd.f32 %v8092_v13, %v1949_v22  ;;  %v2009_v21 = vadd.f32 %v1947_v18, %v1947_v18 }
 0x5f1   : > { %v2012_v24 = vadd.f32 %v1958_v19, %v1958_v19 }
 0x5f2   : > { %v2010_v25 = vadd.f32 %v1950_v7, %v1950_v7 }
 0x5f3   : > { %v2180_v26 = vpack.c.bf16 %v2012_v24, %v2011_v23 }
 0x5f4   : > { %v8098_v27 = vpack.c.bf16 %v2010_v25, %v2009_v21 }
 0x5f5   : > { %v2197_v28 = vrot.slane %v2180_v26, 6  ;;  %2219 = vrot.lane.b32.xlu1 %v2180_v26, %s7673_s13 }
 0x5f6   : > { %v2196_v29 = vrot.slane %v8098_v27, 6  ;;  %2217 = vrot.lane.b32.xlu0 %v8098_v27, %s7673_s13 }
 0x5f8   : > { %v8105_v30 = vsel %vm2195_vm5, %v2196_v29, %v2197_v28  ;;  %v2210_v23 = vsel %vm2195_vm5, 0, %v2196_v29 }
 0x5fa   : > { %v6367_v31 = vpop.f32.mrb[36].mxu1 }
 0x5fb   : > { %v1971_v32 = vadd.f32 %v6367_v31, %v8092_v13  ;;  %v1962_v33 = vpop.f32.mrb[37].mxu1 }
 0x5fc   : > { %v1963_v34 = vadd.f32 %v8092_v13, %v1962_v33  ;;  %v6368_v35 = vpop.f32.mrb[38].mxu1 }
 0x5fd   : > { %v1974_v36 = vadd.f32 %v6368_v35, %v8092_v13  ;;  %v1965_v37 = vpop.f32.mrb[39].mxu1  ;;  %v2015_v39 = vadd.f32 %v1971_v32, %v1971_v32 }
 0x5fe   : > { %v1966_v38 = vadd.f32 %v8092_v13, %v1965_v37  ;;  %v2013_v42 = vadd.f32 %v1963_v34, %v1963_v34 }
 0x5ff   : > { %v2016_v41 = vadd.f32 %v1974_v36, %v1974_v36 }
 0x600   : > { %v2014_v44 = vadd.f32 %v1966_v38, %v1966_v38 }
 0x601   : > { %v2182_v45 = vpack.c.bf16 %v2016_v41, %v2015_v39  ;;  %v6984_v39 = vld [vmem:[%s8743_s3 + $0x40] sm:$0xff]  }
 0x602   : > { %v2181_v46 = vpack.c.bf16 %v2014_v44, %v2013_v42  ;;  %6433 = vmatprep.subr.bf16.mxu0 %v6984_v39  ;;  %v6987_v41 = vld [vmem:[%s8745_s5 + $0x40] sm:$0xff]   ;;  %v6985_v42 = vld [vmem:[%s8743_s3 + $0x48] sm:$0xff]  }
 0x603   : > { %v2200_v47 = vrot.slane %v2182_v45, 6  ;;  %2223 = vrot.lane.b32.xlu1 %v2182_v45, %s7673_s13  ;;  %6457 = vmatprep.subr.bf16.mxu1 %v6987_v41  ;;  %v6988_v44 = vld [vmem:[%s8745_s5 + $0x48] sm:$0xff]   ;;  %v6986_v45 = vld [vmem:[%s8743_s3 + $0x50] sm:$0xff]  }
 0x604   : > { %v2199_v48 = vrot.slane %v2181_v46, 6  ;;  %2221 = vrot.lane.b32.xlu0 %v2181_v46, %s7673_s13  ;;  %6458 = vmatpush3.bf16.msra.mxu1 %v6987_v41  ;;  %v6990_v46 = vld [vmem:[%s8745_s5 + $0x50] sm:$0xff]  }
 0x605   : > { %6459 = vmatprep.subr.bf16.mxu1 %v6988_v44 }
 0x606   : > { %v2201_v49 = vsel %vm2195_vm5, %v2199_v48, %v2200_v47  ;;  %v2212_v26 = vsel %vm2195_vm5, 0, %v2199_v48  ;;  %v6989_v47 = vld [vmem:[%s8743_s3 + $0x58] sm:$0xff]  }
 0x607   : > { %v6991_v48 = vld [vmem:[%s8745_s5 + $0x58] sm:$0xff]  }
 0x608   : > { %v6371_v50 = vpop.f32.mrb[40].mxu1  ;;  %6460 = vmatpush3.bf16.msra.mxu1 %v6988_v44 }
 0x609   : > { %v1987_v40 = vadd.f32 %v6371_v50, %v8092_v13  ;;  %v1978_v51 = vpop.f32.mrb[41].mxu1  ;;  %6461 = vmatprep.subr.bf16.mxu1 %v6990_v46 }
 0x60a   : > { %v1979_v52 = vadd.f32 %v8092_v13, %v1978_v51  ;;  %v6372_v53 = vpop.f32.mrb[42].mxu1 }
 0x60b   : > { %v1990_v54 = vadd.f32 %v6372_v53, %v8092_v13  ;;  %v1981_v55 = vpop.f32.mrb[43].mxu1  ;;  %v2019_v59 = vadd.f32 %v1987_v40, %v1987_v40 }
 0x60c   : > { %v1982_v56 = vadd.f32 %v8092_v13, %v1981_v55  ;;  %v2017_v60 = vadd.f32 %v1979_v52, %v1979_v52  ;;  %6462 = vmatpush3.bf16.msra.mxu1 %v6990_v46 }
 0x60d   : > { %v2020_v57 = vadd.f32 %v1990_v54, %v1990_v54  ;;  %6463 = vmatprep.subr.bf16.mxu1 %v6991_v48 }
 0x60e   : > { %v2018_v61 = vadd.f32 %v1982_v56, %v1982_v56 }
 0x60f   : > { %v2184_v62 = vpack.c.bf16 %v2020_v57, %v2019_v59 }
 0x610   : > { %v2183_v0 = vpack.c.bf16 %v2018_v61, %v2017_v60  ;;  %6464 = vmatpush3.bf16.msra.mxu1 %v6991_v48 }
 0x611   : > { %v2203_v1 = vrot.slane %v2184_v62, 6  ;;  %2227 = vrot.lane.b32.xlu1 %v2184_v62, %s7673_s13 }
 0x612   : > { %v2202_v2 = vrot.slane %v2183_v0, 6  ;;  %2225 = vrot.lane.b32.xlu0 %v2183_v0, %s7673_s13 }
 0x613   : > { %v6375_v3 = vpop.f32.mrb[44].mxu1 }
 0x614   : > { %v2003_v4 = vadd.f32 %v6375_v3, %v8092_v13  ;;  %v1994_v5 = vpop.f32.mrb[45].mxu1  ;;  %v2204_v6 = vsel %vm2195_vm5, %v2202_v2, %v2203_v1  ;;  %v2214_v29 = vsel %vm2195_vm5, 0, %v2202_v2 }
 0x615   : > { %v1995_v63 = vadd.f32 %v8092_v13, %v1994_v5  ;;  %v6376_v58 = vpop.f32.mrb[46].mxu1 }
 0x616   : > { %v2006_v8 = vadd.f32 %v6376_v58, %v8092_v13  ;;  %v1997_v9 = vpop.f32.mrb[47].mxu1  ;;  %v2023_v11 = vadd.f32 %v2003_v4, %v2003_v4 }
 0x617   : > { %v1998_v10 = vadd.f32 %v8092_v13, %v1997_v9  ;;  %v2021_v14 = vadd.f32 %v1995_v63, %v1995_v63 }
 0x618   : > { %v2024_v12 = vadd.f32 %v2006_v8, %v2006_v8 }
 0x619   : > { %v2022_v15 = vadd.f32 %v1998_v10, %v1998_v10 }
 0x61a   : > { %v2186_v16 = vpack.c.bf16 %v2024_v12, %v2023_v11 }
 0x61b   : > { %v2185_v17 = vpack.c.bf16 %v2022_v15, %v2021_v14 }
 0x61c   : > { %v2206_v18 = vrot.slane %v2186_v16, 6  ;;  %2231 = vrot.lane.b32.xlu1 %v2186_v16, %s7673_s13 }
 0x61d   : > { %v2205_v20 = vrot.slane %v2185_v17, 6  ;;  %2229 = vrot.lane.b32.xlu0 %v2185_v17, %s7673_s13 }
 0x61f   : > { %v2207_v19 = vsel %vm2195_vm5, %v2205_v20, %v2206_v18  ;;  %v2216_v36 = vsel %vm2195_vm5, 0, %v2205_v20 }
 0x667   : > { %v2220_v22 = vpop.permute.xlu1 %2219 }
 0x668   : > { %v2218_v7 = vpop.permute.xlu0 %2217  ;;  %v2238_v24 = vsel %vm596_vm4, %v8105_v30, %v2220_v22 }
 0x669   : > { %v2234_v13 = vsel %vm596_vm4, %v2210_v23, %v2218_v7 }
 0x66a   : > { %6417 = vmatprep.mubr.bf16.mxu0 %v2234_v13 }
 0x66b   : > { %6418 = vmatmul.mubr.bf16.vlgmr.msra.gmra.mrb[48].mxu0 %v2238_v24 }
 0x66c   : > { %6434 = vmatpush3.bf16.msra.mxu0 %v6984_v39 }
 0x66d   : > { %6435 = vmatprep.subr.bf16.mxu0 %v6985_v42 }
 0x670   : > { %6436 = vmatpush3.bf16.msra.mxu0 %v6985_v42 }
 0x671   : > { %6437 = vmatprep.subr.bf16.mxu0 %v6986_v45 }
 0x674   : > { %6438 = vmatpush3.bf16.msra.mxu0 %v6986_v45 }
 0x675   : > { %v2224_v21 = vpop.permute.xlu1 %2223  ;;  %6439 = vmatprep.subr.bf16.mxu0 %v6989_v47 }
 0x676   : > { %v2222_v25 = vpop.permute.xlu0 %2221  ;;  %v2245_v28 = vsel %vm596_vm4, %v2201_v49, %v2224_v21 }
 0x677   : > { %v2241_v27 = vsel %vm596_vm4, %v2212_v26, %v2222_v25 }
 0x678   : > { %6421 = vmatprep.mubr.bf16.mxu0 %v2241_v27  ;;  %6440 = vmatpush3.bf16.msra.mxu0 %v6989_v47 }
 0x679   : > { %6422 = vmatmul.mubr.bf16.gmra.mrb[52].mxu0 %v2245_v28 }
 0x683   : > { %v2228_v31 = vpop.permute.xlu1 %2227 }
 0x684   : > { %v2226_v32 = vpop.permute.xlu0 %2225  ;;  %v2252_v30 = vsel %vm596_vm4, %v2204_v6, %v2228_v31 }
 0x685   : > { %v2248_v33 = vsel %vm596_vm4, %v2214_v29, %v2226_v32 }
 0x686   : > { %6425 = vmatprep.mubr.bf16.mxu0 %v2248_v33 }
 0x687   : > { %6426 = vmatmul.mubr.bf16.gmra.mrb[56].mxu0 %v2252_v30 }
 0x68e   : > { %v2232_v34 = vpop.permute.xlu1 %2231 }
 0x68f   : > { %v2230_v35 = vpop.permute.xlu0 %2229  ;;  %v2259_v38 = vsel %vm596_vm4, %v2207_v19, %v2232_v34 }
 0x690   : > { %v2255_v37 = vsel %vm596_vm4, %v2216_v36, %v2230_v35 }
 0x691   : > { %6429 = vmatprep.mubr.bf16.mxu0 %v2255_v37 }
 0x692   : > { %6430 = vmatmul.mubr.bf16.gmra.mrb[60].mxu0 %v2259_v38 }
 0x73e   : > { %v6419_v49 = vpop.f32.mrb[48].mxu0 }
 0x73f   : > { %v5644_v50 = vmul.f32 -1.442695, %v6419_v49  ;;  %v2360_v40 = vpop.f32.mrb[49].mxu0 }
 0x740   : > { %v5642_v51 = vmul.f32 -1.442695, %v2360_v40  ;;  %v6420_v52 = vpop.f32.mrb[50].mxu0 }
 0x741   : > { %7232 = vpow2.f32 %v5644_v50  ;;  %v5645_v53 = vmul.f32 -1.442695, %v6420_v52  ;;  %v2363_v54 = vpop.f32.mrb[51].mxu0 }
 0x742   : > { %7234 = vpow2.f32 %v5642_v51  ;;  %v5643_v55 = vmul.f32 -1.442695, %v2363_v54 }
 0x743   : > { %7236 = vpow2.f32 %v5645_v53 }
 0x744   : > { %7238 = vpow2.f32 %v5643_v55 }
 0x745   : > { %7240 = vtanh.f32 %v6419_v49 }
 0x746   : > { %7242 = vtanh.f32 %v2360_v40 }
 0x747   : > { %7244 = vtanh.f32 %v6420_v52 }
 0x74b   : > { %v7233_v56 = vpop.eup %7232 }
 0x74c   : > { %v7235_v59 = vpop.eup %7234  ;;  %v2489_v57 = vadd.f32 1.0, %v7233_v56  ;;  %v6423_v60 = vpop.f32.mrb[52].mxu0 }
 0x74d   : > { %v2487_v61 = vadd.f32 1.0, %v7235_v59  ;;  %v5648_v62 = vmul.f32 -1.442695, %v6423_v60  ;;  %v2376_v0 = vpop.f32.mrb[53].mxu0  ;;  %v7237_v1 = vpop.eup %7236 }
 0x74e   : > { %7246 = vrcp.f32 %v2489_v57  ;;  %v6424_v2 = vpop.f32.mrb[54].mxu0  ;;  %v2490_v3 = vadd.f32 1.0, %v7237_v1  ;;  %v7239_v5 = vpop.eup %7238  ;;  %v5646_v6 = vmul.f32 -1.442695, %v2376_v0 }
 0x74f   : > { %7248 = vrcp.f32 %v2487_v61  ;;  %v2379_v4 = vpop.f32.mrb[55].mxu0  ;;  %v2488_v63 = vadd.f32 1.0, %v7239_v5  ;;  %v5649_v58 = vmul.f32 -1.442695, %v6424_v2  ;;  %v7241_v9 = vpop.eup %7240 }
 0x750   : > { %7250 = vpow2.f32 %v5648_v62  ;;  %v5647_v8 = vmul.f32 -1.442695, %v2379_v4  ;;  %v7243_v10 = vpop.eup %7242 }
 0x751   : > { %7252 = vrcp.f32 %v2490_v3  ;;  %v7245_v11 = vpop.eup %7244 }
 0x752   : > { %7254 = vtanh.f32 %v2363_v54 }
 0x753   : > { %7256 = vrcp.f32 %v2488_v63 }
 0x754   : > { %7258 = vpow2.f32 %v5646_v6 }
 0x755   : > { %7260 = vpow2.f32 %v5649_v58 }
 0x756   : > { %7262 = vpow2.f32 %v5647_v8 }
 0x757   : > { %7264 = vtanh.f32 %v6423_v60 }
 0x758   : > { %v7247_v12 = vpop.eup %7246  ;;  %7266 = vtanh.f32 %v2376_v0 }
 0x759   : > { %v7249_v14 = vpop.eup %7248  ;;  %v2537_v22 = vmul.f32 %v7247_v12, %v7241_v9  ;;  %7268 = vtanh.f32 %v6424_v2 }
 0x75a   : > { %v7251_v15 = vpop.eup %7250  ;;  %v6427_v16 = vpop.f32.mrb[56].mxu0  ;;  %v2535_v26 = vmul.f32 %v7249_v14, %v7243_v10 }
 0x75b   : > { %v7253_v17 = vpop.eup %7252  ;;  %v5652_v18 = vmul.f32 -1.442695, %v6427_v16  ;;  %v2392_v20 = vpop.f32.mrb[57].mxu0  ;;  %v2493_v23 = vadd.f32 1.0, %v7251_v15 }
 0x75c   : > { %v7255_v19 = vpop.eup %7254  ;;  %v2538_v7 = vmul.f32 %v7253_v17, %v7245_v11  ;;  %v5650_v13 = vmul.f32 -1.442695, %v2392_v20  ;;  %v6428_v24 = vpop.f32.mrb[58].mxu0 }
 0x75d   : > { %v7257_v21 = vpop.eup %7256  ;;  %v8165_v25 = vpop.f32.mrb[59].mxu0  ;;  %7270 = vpow2.f32 %v5652_v18  ;;  %v5653_v31 = vmul.f32 -1.442695, %v6428_v24 }
 0x75e   : > { %v7259_v27 = vpop.eup %7258  ;;  %v2552_v28 = vpack.c.bf16 %v2538_v7, %v2537_v22  ;;  %v2536_v32 = vmul.f32 %v7257_v21, %v7255_v19  ;;  %7272 = vpow2.f32 %v5650_v13  ;;  %v5651_v36 = vmul.f32 -1.442695, %v8165_v25 }
 0x75f   : > { %v2491_v29 = vadd.f32 1.0, %v7259_v27  ;;  %v7261_v33 = vpop.eup %7260  ;;  %7274 = vrcp.f32 %v2493_v23 }
 0x760   : > { %v2551_v30 = vpack.c.bf16 %v2536_v32, %v2535_v26  ;;  %v2494_v34 = vadd.f32 1.0, %v7261_v33  ;;  %v7263_v35 = vpop.eup %7262 }
 0x761   : > { %7276 = vrcp.f32 %v2491_v29  ;;  %v2492_v37 = vadd.f32 1.0, %v7263_v35  ;;  %v7265_v38 = vpop.eup %7264 }
 0x762   : > { %7278 = vpow2.f32 %v5653_v31  ;;  %6441 = vmatprep.mubr.msk.bf16.mxu0 %vm596_vm4, %v2551_v30  ;;  %6465 = vmatprep.mubr.msk.bf16.mxu1 %vm596_vm4, %v2551_v30  ;;  %v7267_v39 = vpop.eup %7266 }
 0x763   : > { %7280 = vrcp.f32 %v2494_v34  ;;  %6442 = vmatmul.mubr.msk.bf16.vlgmr.msra.gmra.mrb[64].mxu0 %vm596_vm4, %v2552_v28  ;;  %6466 = vmatmul.mubr.msk.bf16.vlgmr.msra.gmra.mrb[16].mxu1 %vm596_vm4, %v2552_v28  ;;  %v7269_v45 = vpop.eup %7268 }
 0x764   : > { %7282 = vtanh.f32 %v2379_v4 }
 0x765   : > { %7284 = vrcp.f32 %v2492_v37  ;;  %v6431_v41 = vpop.f32.mrb[60].mxu0 }
 0x766   : > { %7286 = vpow2.f32 %v5651_v36  ;;  %v5656_v42 = vmul.f32 -1.442695, %v6431_v41  ;;  %v2408_v44 = vpop.f32.mrb[61].mxu0 }
 0x767   : > { %v5654_v46 = vmul.f32 -1.442695, %v2408_v44  ;;  %v6432_v47 = vpop.f32.mrb[62].mxu0  ;;  %v7271_v48 = vpop.eup %7270 }
 0x768   : > { %7288 = vpow2.f32 %v5656_v42  ;;  %v2411_v49 = vpop.f32.mrb[63].mxu0  ;;  %v7273_v50 = vpop.eup %7272  ;;  %v2497_v40 = vadd.f32 1.0, %v7271_v48  ;;  %v5657_v52 = vmul.f32 -1.442695, %v6432_v47  ;;  %v6992_v42 = vld [vmem:[%s8742_s2 + $0xc0] sm:$0xff]   ;;  %v6997_v48 = vld [vmem:[%s8742_s2 + $0xe8] sm:$0xff]  }
 0x769   : > { %7290 = vtanh.f32 %v6427_v16  ;;  %v7275_v51 = vpop.eup %7274  ;;  %v2495_v55 = vadd.f32 1.0, %v7273_v50  ;;  %v5655_v57 = vmul.f32 -1.442695, %v2411_v49  ;;  %6481 = vmatprep.subr.bf16.mxu0 %v6992_v42  ;;  %v6999_v50 = vld [vmem:[%s8742_s2 + $0xf8] sm:$0xff]  }
 0x76a   : > { %7292 = vtanh.f32 %v2392_v20  ;;  %v2541_v61 = vmul.f32 %v7275_v51, %v7265_v38  ;;  %6482 = vmatpush3.bf16.msra.mxu0 %v6992_v42 }
 0x76b   : > { %v7277_v53 = vpop.eup %7276  ;;  %7294 = vpow2.f32 %v5654_v46  ;;  %v6995_v46 = vld [vmem:[%s8742_s2 + $0xd8] sm:$0xff]  }
 0x76c   : > { %v7279_v54 = vpop.eup %7278  ;;  %7296 = vtanh.f32 %v6428_v24  ;;  %v2539_v2 = vmul.f32 %v7277_v53, %v7267_v39 }
 0x76d   : > { %v7281_v56 = vpop.eup %7280  ;;  %7298 = vrcp.f32 %v2497_v40  ;;  %v2498_v59 = vadd.f32 1.0, %v7279_v54  ;;  %v8212_v40 = vld [vmem:[%s8744_s4 + $0x2] ss:$0 sm:$0xff] }
 0x76e   : > { %v7283_v60 = vpop.eup %7282  ;;  %7300 = vpow2.f32 %v5657_v52  ;;  %v2542_v62 = vmul.f32 %v7281_v56, %v7269_v45  ;;  %v6994_v45 = vld [vmem:[%s8742_s2 + $0xd0] sm:$0xff]  }
 0x76f   : > { %v7285_v0 = vpop.eup %7284  ;;  %7302 = vrcp.f32 %v2498_v59 }
 0x770   : > { %v7287_v1 = vpop.eup %7286  ;;  %7304 = vrcp.f32 %v2495_v55  ;;  %v2540_v3 = vmul.f32 %v7285_v0, %v7283_v60  ;;  %v2554_v4 = vpack.c.bf16 %v2542_v62, %v2541_v61 }
 0x771   : > { %v2496_v5 = vadd.f32 1.0, %v7287_v1  ;;  %7306 = vpow2.f32 %v5655_v57 }
 0x772   : > { %v7289_v6 = vpop.eup %7288  ;;  %7308 = vtanh.f32 %v8165_v25  ;;  %v2553_v63 = vpack.c.bf16 %v2540_v3, %v2539_v2 }
 0x773   : > { %v7291_v58 = vpop.eup %7290  ;;  %7310 = vrcp.f32 %v2496_v5  ;;  %v2501_v10 = vadd.f32 1.0, %v7289_v6 }
 0x774   : > { %v7293_v8 = vpop.eup %7292  ;;  %6445 = vmatprep.mubr.msk.bf16.mxu0 %vm596_vm4, %v2553_v63  ;;  %6469 = vmatprep.mubr.msk.bf16.mxu1 %vm596_vm4, %v2553_v63  ;;  %7312 = vtanh.f32 %v6431_v41 }
 0x775   : > { %v7295_v9 = vpop.eup %7294  ;;  %6446 = vmatmul.mubr.msk.bf16.gmra.mrb[68].mxu0 %vm596_vm4, %v2554_v4  ;;  %6470 = vmatmul.mubr.msk.bf16.gmra.mrb[20].mxu1 %vm596_vm4, %v2554_v4  ;;  %7314 = vtanh.f32 %v2408_v44  ;;  %v6993_v44 = vld [vmem:[%s8742_s2 + $0xc8] sm:$0xff]  }
 0x776   : > { %v7297_v11 = vpop.eup %7296  ;;  %v2499_v15 = vadd.f32 1.0, %v7295_v9  ;;  %7316 = vrcp.f32 %v2501_v10  ;;  %6483 = vmatprep.subr.bf16.mxu0 %v6993_v44 }
 0x777   : > { %v7299_v12 = vpop.eup %7298  ;;  %7318 = vtanh.f32 %v6432_v47  ;;  %6484 = vmatpush3.bf16.msra.mxu0 %v6993_v44  ;;  %v6996_v47 = vld [vmem:[%s8742_s2 + $0xe0] sm:$0xff]  }
 0x778   : > { %v7301_v14 = vpop.eup %7300  ;;  %v2545_v20 = vmul.f32 %v7299_v12, %v7291_v58  ;;  %6485 = vmatprep.subr.bf16.mxu0 %v6994_v45 }
 0x779   : > { %v7303_v16 = vpop.eup %7302  ;;  %v2502_v17 = vadd.f32 1.0, %v7301_v14 }
 0x77a   : > { %v7305_v18 = vpop.eup %7304  ;;  %v2546_v19 = vmul.f32 %v7303_v16, %v7297_v11 }
 0x77b   : > { %v7307_v22 = vpop.eup %7306  ;;  %7320 = vrcp.f32 %v2502_v17  ;;  %v2543_v21 = vmul.f32 %v7305_v18, %v7293_v8  ;;  %6486 = vmatpush3.bf16.msra.mxu0 %v6994_v45 }
 0x77c   : > { %v7309_v7 = vpop.eup %7308  ;;  %7322 = vrcp.f32 %v2499_v15  ;;  %v2500_v23 = vadd.f32 1.0, %v7307_v22  ;;  %v2556_v13 = vpack.c.bf16 %v2546_v19, %v2545_v20  ;;  %6487 = vmatprep.subr.bf16.mxu0 %v6995_v46 }
 0x77d   : > { %v7311_v24 = vpop.eup %7310  ;;  %7324 = vtanh.f32 %v2411_v49  ;;  %v6998_v49 = vld [vmem:[%s8742_s2 + $0xf0] sm:$0xff]  }
 0x77e   : > { %7326 = vrcp.f32 %v2500_v23  ;;  %v2544_v25 = vmul.f32 %v7311_v24, %v7309_v7  ;;  %v7313_v27 = vpop.eup %7312 }
 0x77f   : > { %v7315_v28 = vpop.eup %7314  ;;  %6488 = vmatpush3.bf16.msra.mxu0 %v6995_v46 }
 0x780   : > { %v2555_v26 = vpack.c.bf16 %v2544_v25, %v2543_v21  ;;  %v7317_v31 = vpop.eup %7316  ;;  %6489 = vmatprep.subr.bf16.mxu0 %v6996_v47 }
 0x781   : > { %v7319_v32 = vpop.eup %7318  ;;  %v2549_v30 = vmul.f32 %v7317_v31, %v7313_v27 }
 0x782   : > { %6449 = vmatprep.mubr.msk.bf16.mxu0 %vm596_vm4, %v2555_v26  ;;  %6473 = vmatprep.mubr.msk.bf16.mxu1 %vm596_vm4, %v2555_v26 }
 0x783   : > { %6450 = vmatmul.mubr.msk.bf16.gmra.mrb[72].mxu0 %vm596_vm4, %v2556_v13  ;;  %6474 = vmatmul.mubr.msk.bf16.gmra.mrb[24].mxu1 %vm596_vm4, %v2556_v13 }
 0x784   : > { %6490 = vmatpush3.bf16.msra.mxu0 %v6996_v47 }
 0x785   : > { %v7321_v29 = vpop.eup %7320  ;;  %6491 = vmatprep.subr.bf16.mxu0 %v6997_v48 }
 0x786   : > { %v7323_v33 = vpop.eup %7322  ;;  %v2550_v34 = vmul.f32 %v7321_v29, %v7319_v32 }
 0x787   : > { %v7325_v35 = vpop.eup %7324  ;;  %v2547_v38 = vmul.f32 %v7323_v33, %v7315_v28 }
 0x788   : > { %v7327_v36 = vpop.eup %7326  ;;  %v2558_v37 = vpack.c.bf16 %v2550_v34, %v2549_v30  ;;  %6492 = vmatpush3.bf16.msra.mxu0 %v6997_v48 }
 0x789   : > { %v2548_v39 = vmul.f32 %v7327_v36, %v7325_v35  ;;  %6493 = vmatprep.subr.bf16.mxu0 %v6998_v49 }
 0x78b   : > { %v2557_v41 = vpack.c.bf16 %v2548_v39, %v2547_v38 }
 0x78c   : > { %6494 = vmatpush3.bf16.msra.mxu0 %v6998_v49 }
 0x78d   : > { %6453 = vmatprep.mubr.msk.bf16.mxu0 %vm596_vm4, %v2557_v41  ;;  %6477 = vmatprep.mubr.msk.bf16.mxu1 %vm596_vm4, %v2557_v41 }
 0x78e   : > { %6454 = vmatmul.mubr.msk.bf16.gmra.mrb[76].mxu0 %vm596_vm4, %v2558_v37  ;;  %6478 = vmatmul.mubr.msk.bf16.gmra.mrb[28].mxu1 %vm596_vm4, %v2558_v37 }
 0x78f   : > { %6495 = vmatprep.subr.bf16.mxu0 %v6999_v50 }
 0x790   : > { %6496 = vmatpush3.bf16.msra.mxu0 %v6999_v50 }
 0x836   : > { %v6443_v51 = vpop.f32.mrb[64].mxu0 }
 0x837   : > { %v2667_v52 = vadd.f32 %v6443_v51, %v8212_v40  ;;  %v2658_v53 = vpop.f32.mrb[65].mxu0 }
 0x838   : > { %v2659_v54 = vadd.f32 %v8212_v40, %v2658_v53  ;;  %v6444_v55 = vpop.f32.mrb[66].mxu0 }
 0x839   : > { %v2670_v56 = vadd.f32 %v6444_v55, %v8212_v40  ;;  %v2661_v59 = vpop.f32.mrb[67].mxu0  ;;  %v2723_v60 = vadd.f32 %v2667_v52, %v2667_v52 }
 0x83a   : > { %v2662_v57 = vadd.f32 %v8212_v40, %v2661_v59  ;;  %v2721_v62 = vadd.f32 %v2659_v54, %v2659_v54 }
 0x83b   : > { %v2724_v61 = vadd.f32 %v2670_v56, %v2670_v56 }
 0x83c   : > { %v2722_v0 = vadd.f32 %v2662_v57, %v2662_v57 }
 0x83d   : > { %v2892_v1 = vpack.c.bf16 %v2724_v61, %v2723_v60 }
 0x83e   : > { %v8218_v2 = vpack.c.bf16 %v2722_v0, %v2721_v62 }
 0x83f   : > { %v2907_v3 = vshrl.u32 %v2892_v1, 16  ;;  %2977 = vrot.lane.b32.xlu1 %v2892_v1, %s7673_s13  ;;  %v2910_v6 = vshll.u32 %v2892_v1, 16 }
 0x840   : > { %v2900_v4 = vshrl.u32 %v8218_v2, 16  ;;  %2975 = vrot.lane.b32.xlu0 %v8218_v2, %s7673_s13 }
 0x841   : > { %v2909_v5 = vrot.slane %v2907_v3, 7 }
 0x842   : > { %v8224_v63 = vrot.slane %v2900_v4, 7 }
 0x843   : > { %v2912_v58 = vor.u32 %v2910_v6, %v2909_v5 }
 0x845   : > { %v8228_v8 = vsel %vm452_vm0, %v8224_v63, %v2912_v58 }
 0x848   : > { %v6447_v9 = vpop.f32.mrb[68].mxu0 }
 0x849   : > { %v2683_v10 = vadd.f32 %v6447_v9, %v8212_v40  ;;  %v2674_v11 = vpop.f32.mrb[69].mxu0 }
 0x84a   : > { %v2675_v12 = vadd.f32 %v8212_v40, %v2674_v11  ;;  %v6448_v14 = vpop.f32.mrb[70].mxu0 }
 0x84b   : > { %v2686_v15 = vadd.f32 %v6448_v14, %v8212_v40  ;;  %v2677_v16 = vpop.f32.mrb[71].mxu0  ;;  %v2727_v18 = vadd.f32 %v2683_v10, %v2683_v10 }
 0x84c   : > { %v2678_v17 = vadd.f32 %v8212_v40, %v2677_v16  ;;  %v2725_v19 = vadd.f32 %v2675_v12, %v2675_v12  ;;  %v2903_v12 = vshll.u32 %v8218_v2, 16 }
 0x84d   : > { %v2728_v20 = vadd.f32 %v2686_v15, %v2686_v15 }
 0x84e   : > { %v2726_v22 = vadd.f32 %v2678_v17, %v2678_v17  ;;  %v2905_v14 = vor.u32 %v2903_v12, %v8224_v63 }
 0x84f   : > { %v2894_v7 = vpack.c.bf16 %v2728_v20, %v2727_v18 }
 0x850   : > { %v8234_v23 = vpack.c.bf16 %v2726_v22, %v2725_v19  ;;  %v2963_v17 = vsel %vm7784_vm2, 0, %v2905_v14 }
 0x851   : > { %v2922_v13 = vshrl.u32 %v2894_v7, 16  ;;  %2981 = vrot.lane.b32.xlu1 %v2894_v7, %s7673_s13  ;;  %v2925_v25 = vshll.u32 %v2894_v7, 16 }
 0x852   : > { %v2915_v24 = vshrl.u32 %v8234_v23, 16  ;;  %2979 = vrot.lane.b32.xlu0 %v8234_v23, %s7673_s13  ;;  %v2918_v19 = vshll.u32 %v8234_v23, 16 }
 0x853   : > { %v2924_v21 = vrot.slane %v2922_v13, 7 }
 0x854   : > { %v2917_v26 = vrot.slane %v2915_v24, 7 }
 0x855   : > { %v2927_v27 = vor.u32 %v2925_v25, %v2924_v21 }
 0x856   : > { %v6451_v28 = vpop.f32.mrb[72].mxu0  ;;  %v2920_v22 = vor.u32 %v2918_v19, %v2917_v26 }
 0x857   : > { %v2699_v31 = vadd.f32 %v6451_v28, %v8212_v40  ;;  %v2690_v32 = vpop.f32.mrb[73].mxu0  ;;  %v2928_v29 = vsel %vm452_vm0, %v2917_v26, %v2927_v27 }
 0x858   : > { %v2691_v33 = vadd.f32 %v8212_v40, %v2690_v32  ;;  %v6452_v30 = vpop.f32.mrb[74].mxu0  ;;  %v2964_v2 = vsel %vm7784_vm2, 0, %v2920_v22 }
 0x859   : > { %v2702_v34 = vadd.f32 %v6452_v30, %v8212_v40  ;;  %v2693_v35 = vpop.f32.mrb[75].mxu0  ;;  %v2731_v37 = vadd.f32 %v2699_v31, %v2699_v31 }
 0x85a   : > { %v2694_v36 = vadd.f32 %v8212_v40, %v2693_v35  ;;  %v2729_v39 = vadd.f32 %v2691_v33, %v2691_v33 }
 0x85b   : > { %v2732_v38 = vadd.f32 %v2702_v34, %v2702_v34 }
 0x85c   : > { %v2730_v41 = vadd.f32 %v2694_v36, %v2694_v36  ;;  %v7000_v36 = vld [vmem:[%s8743_s3 + $0x60] sm:$0xff]  }
 0x85d   : > { %v2896_v42 = vpack.c.bf16 %v2732_v38, %v2731_v37  ;;  %6513 = vmatprep.subr.bf16.mxu1 %v7000_v36  ;;  %v7001_v37 = vld [vmem:[%s8743_s3 + $0x68] sm:$0xff]   ;;  %v7003_v38 = vld [vmem:[%s8743_s3 + $0x78] sm:$0xff]  }
 0x85e   : > { %v2895_v44 = vpack.c.bf16 %v2730_v41, %v2729_v39  ;;  %6514 = vmatpush3.bf16.msra.mxu1 %v7000_v36  ;;  %v8290_v39 = vld [vmem:[%s8745_s5 + $0x60] sm:$0xff]   ;;  %v7007_v36 = vld [vmem:[%s8745_s5 + $0x78] sm:$0xff]  }
 0x85f   : > { %v2937_v45 = vshrl.u32 %v2896_v42, 16  ;;  %2985 = vrot.lane.b32.xlu1 %v2896_v42, %s7673_s13  ;;  %v2940_v48 = vshll.u32 %v2896_v42, 16  ;;  %6515 = vmatprep.subr.bf16.mxu1 %v7001_v37 }
 0x860   : > { %v2930_v46 = vshrl.u32 %v2895_v44, 16  ;;  %2983 = vrot.lane.b32.xlu0 %v2895_v44, %s7673_s13  ;;  %v2933_v21 = vshll.u32 %v2895_v44, 16 }
 0x861   : > { %v2939_v47 = vrot.slane %v2937_v45, 7  ;;  %v6455_v49 = vpop.f32.mrb[76].mxu0 }
 0x862   : > { %v2715_v50 = vadd.f32 %v6455_v49, %v8212_v40  ;;  %v2706_v51 = vpop.f32.mrb[77].mxu0  ;;  %v2932_v52 = vrot.slane %v2930_v46, 7  ;;  %6516 = vmatpush3.bf16.msra.mxu1 %v7001_v37 }
 0x863   : > { %v2707_v53 = vadd.f32 %v8212_v40, %v2706_v51  ;;  %v6456_v54 = vpop.f32.mrb[78].mxu0  ;;  %v2942_v55 = vor.u32 %v2940_v48, %v2939_v47  ;;  %6517 = vmatprep.subr.bf16.mxu1 %v7002_v43 }
 0x864   : > { %v2718_v56 = vadd.f32 %v6456_v54, %v8212_v40  ;;  %v2709_v59 = vpop.f32.mrb[79].mxu0  ;;  %v2735_v61 = vadd.f32 %v2715_v50, %v2715_v50  ;;  %v2935_v25 = vor.u32 %v2933_v21, %v2932_v52 }
 0x865   : > { %v2710_v57 = vadd.f32 %v8212_v40, %v2709_v59  ;;  %v2943_v60 = vsel %vm452_vm0, %v2932_v52, %v2942_v55  ;;  %v2733_v0 = vadd.f32 %v2707_v53, %v2707_v53 }
 0x866   : > { %v2736_v62 = vadd.f32 %v2718_v56, %v2718_v56  ;;  %v2965_v28 = vsel %vm7784_vm2, 0, %v2935_v25  ;;  %6518 = vmatpush3.bf16.msra.mxu1 %v7002_v43 }
 0x867   : > { %v2734_v1 = vadd.f32 %v2710_v57, %v2710_v57  ;;  %6519 = vmatprep.subr.bf16.mxu1 %v7003_v38 }
 0x868   : > { %v2898_v3 = vpack.c.bf16 %v2736_v62, %v2735_v61 }
 0x869   : > { %v2897_v4 = vpack.c.bf16 %v2734_v1, %v2733_v0 }
 0x86a   : > { %v2952_v5 = vshrl.u32 %v2898_v3, 16  ;;  %2989 = vrot.lane.b32.xlu1 %v2898_v3, %s7673_s13  ;;  %v2955_v9 = vshll.u32 %v2898_v3, 16  ;;  %6520 = vmatpush3.bf16.msra.mxu1 %v7003_v38 }
 0x86b   : > { %v2945_v6 = vshrl.u32 %v2897_v4, 16  ;;  %2987 = vrot.lane.b32.xlu0 %v2897_v4, %s7673_s13  ;;  %v2948_v31 = vshll.u32 %v2897_v4, 16  ;;  %6537 = vmatprep.subr.bf16.mxu1 %v8290_v39 }
 0x86c   : > { %v2954_v58 = vrot.slane %v2952_v5, 7 }
 0x86d   : > { %v2947_v10 = vrot.slane %v2945_v6, 7 }
 0x86e   : > { %v2957_v11 = vor.u32 %v2955_v9, %v2954_v58 }
 0x86f   : > { %v2950_v32 = vor.u32 %v2948_v31, %v2947_v10 }
 0x870   : > { %v2958_v40 = vsel %vm452_vm0, %v2947_v10, %v2957_v11 }
 0x8b1   : > { %v2978_v15 = vpop.permute.xlu1 %2977 }
 0x8b2   : > { %v2976_v16 = vpop.permute.xlu0 %2975  ;;  %v2997_v20 = vsel %vm596_vm4, %v8228_v8, %v2978_v15 }
 0x8b3   : > { %v2993_v18 = vsel %vm596_vm4, %v2963_v17, %v2976_v16 }
 0x8b4   : > { %6497 = vmatprep.mubr.bf16.mxu0 %v2993_v18 }
 0x8b5   : > { %6498 = vmatmul.mubr.bf16.vlgmr.msra.gmra.mrb[80].mxu0 %v2997_v20 }
 0x8c3   : > { %v2982_v7 = vpop.permute.xlu1 %2981 }
 0x8c4   : > { %v2980_v13 = vpop.permute.xlu0 %2979  ;;  %v3005_v24 = vsel %vm596_vm4, %v2928_v29, %v2982_v7  ;;  %v2966_v29 = vsel %vm7784_vm2, 0, %v2950_v32 }
 0x8c5   : > { %v3001_v63 = vsel %vm596_vm4, %v2964_v2, %v2980_v13 }
 0x8c6   : > { %6501 = vmatprep.mubr.bf16.mxu0 %v3001_v63 }
 0x8c7   : > { %6502 = vmatmul.mubr.bf16.gmra.mrb[84].mxu0 %v3005_v24 }
 0x8d1   : > { %v2986_v27 = vpop.permute.xlu1 %2985 }
 0x8d2   : > { %v2984_v8 = vpop.permute.xlu0 %2983  ;;  %v3013_v26 = vsel %vm596_vm4, %v2943_v60, %v2986_v27 }
 0x8d3   : > { %v3009_v23 = vsel %vm596_vm4, %v2965_v28, %v2984_v8  ;;  %v7005_v8 = vld [vmem:[%s8745_s5 + $0x68] sm:$0xff]  }
 0x8d4   : > { %6505 = vmatprep.mubr.bf16.mxu0 %v3009_v23 }
 0x8d5   : > { %6506 = vmatmul.mubr.bf16.gmra.mrb[88].mxu0 %v3013_v26 }
 0x8dc   : > { %v2990_v33 = vpop.permute.xlu1 %2989 }
 0x8dd   : > { %v2988_v30 = vpop.permute.xlu0 %2987  ;;  %v3021_v35 = vsel %vm596_vm4, %v2958_v40, %v2990_v33  ;;  %v7006_v33 = vld [vmem:[%s8745_s5 + $0x70] sm:$0xff]  }
 0x8de   : > { %v3017_v34 = vsel %vm596_vm4, %v2966_v29, %v2988_v30 }
 0x8df   : > { %6509 = vmatprep.mubr.bf16.mxu0 %v3017_v34 }
 0x8e0   : > { %6510 = vmatmul.mubr.bf16.gmra.mrb[92].mxu0 %v3021_v35 }
 0x988   : > { %v6499_v41 = vpop.f32.mrb[80].mxu0 }
 0x989   : > { %v5728_v42 = vmul.f32 -1.442695, %v6499_v41  ;;  %v3122_v44 = vpop.f32.mrb[81].mxu0 }
 0x98a   : > { %v5726_v45 = vmul.f32 -1.442695, %v3122_v44  ;;  %v6500_v46 = vpop.f32.mrb[82].mxu0 }
 0x98b   : > { %7328 = vpow2.f32 %v5728_v42  ;;  %v5729_v47 = vmul.f32 -1.442695, %v6500_v46  ;;  %v3125_v48 = vpop.f32.mrb[83].mxu0 }
 0x98c   : > { %7330 = vpow2.f32 %v5726_v45  ;;  %v5727_v49 = vmul.f32 -1.442695, %v3125_v48 }
 0x98d   : > { %7332 = vpow2.f32 %v5729_v47 }
 0x98e   : > { %7334 = vpow2.f32 %v5727_v49 }
 0x98f   : > { %7336 = vtanh.f32 %v6499_v41 }
 0x990   : > { %7338 = vtanh.f32 %v3122_v44 }
 0x991   : > { %7340 = vtanh.f32 %v6500_v46 }
 0x995   : > { %v7329_v50 = vpop.eup %7328 }
 0x996   : > { %v7331_v51 = vpop.eup %7330  ;;  %v3251_v52 = vadd.f32 1.0, %v7329_v50 }
 0x997   : > { %v3249_v53 = vadd.f32 1.0, %v7331_v51  ;;  %v7333_v54 = vpop.eup %7332 }
 0x998   : > { %7342 = vrcp.f32 %v3251_v52  ;;  %v3252_v55 = vadd.f32 1.0, %v7333_v54  ;;  %v7335_v56 = vpop.eup %7334 }
 0x999   : > { %7344 = vrcp.f32 %v3249_v53  ;;  %v3250_v57 = vadd.f32 1.0, %v7335_v56  ;;  %v7337_v4 = vpop.eup %7336 }
 0x99a   : > { %v6503_v59 = vpop.f32.mrb[84].mxu0  ;;  %7346 = vrcp.f32 %v3252_v55  ;;  %v7339_v6 = vpop.eup %7338 }
 0x99b   : > { %v5732_v60 = vmul.f32 -1.442695, %v6503_v59  ;;  %v3138_v61 = vpop.f32.mrb[85].mxu0  ;;  %7348 = vtanh.f32 %v3125_v48  ;;  %v7341_v58 = vpop.eup %7340 }
 0x99c   : > { %v5730_v62 = vmul.f32 -1.442695, %v3138_v61  ;;  %v6504_v0 = vpop.f32.mrb[86].mxu0  ;;  %7350 = vrcp.f32 %v3250_v57 }
 0x99d   : > { %v3141_v1 = vpop.f32.mrb[87].mxu0  ;;  %7352 = vpow2.f32 %v5732_v60  ;;  %v5733_v3 = vmul.f32 -1.442695, %v6504_v0 }
 0x99e   : > { %7354 = vpow2.f32 %v5730_v62  ;;  %v5731_v5 = vmul.f32 -1.442695, %v3141_v1 }
 0x99f   : > { %7356 = vpow2.f32 %v5733_v3 }
 0x9a0   : > { %7358 = vpow2.f32 %v5731_v5 }
 0x9a1   : > { %7360 = vtanh.f32 %v6503_v59 }
 0x9a2   : > { %v7343_v9 = vpop.eup %7342  ;;  %7362 = vtanh.f32 %v3138_v61 }
 0x9a3   : > { %v7345_v10 = vpop.eup %7344  ;;  %v3299_v12 = vmul.f32 %v7343_v9, %v7337_v4  ;;  %7364 = vtanh.f32 %v6504_v0 }
 0x9a4   : > { %v7347_v11 = vpop.eup %7346  ;;  %v3297_v20 = vmul.f32 %v7345_v10, %v7339_v6 }
 0x9a5   : > { %v7349_v40 = vpop.eup %7348  ;;  %v3300_v14 = vmul.f32 %v7347_v11, %v7341_v58 }
 0x9a6   : > { %v7351_v15 = vpop.eup %7350 }
 0x9a7   : > { %v7353_v16 = vpop.eup %7352  ;;  %v8293_v17 = vpack.c.bf16 %v3300_v14, %v3299_v12  ;;  %v3298_v19 = vmul.f32 %v7351_v15, %v7349_v40 }
 0x9a8   : > { %v6507_v18 = vpop.f32.mrb[88].mxu0  ;;  %v3255_v22 = vadd.f32 1.0, %v7353_v16  ;;  %v7355_v2 = vpop.eup %7354 }
 0x9a9   : > { %v5736_v7 = vmul.f32 -1.442695, %v6507_v18  ;;  %v3154_v13 = vpop.f32.mrb[89].mxu0  ;;  %v8295_v21 = vpack.c.bf16 %v3298_v19, %v3297_v20  ;;  %v3253_v25 = vadd.f32 1.0, %v7355_v2  ;;  %v7357_v28 = vpop.eup %7356 }
 0x9aa   : > { %v5734_v63 = vmul.f32 -1.442695, %v3154_v13  ;;  %v6508_v24 = vpop.f32.mrb[90].mxu0  ;;  %7366 = vrcp.f32 %v3255_v22  ;;  %v3256_v23 = vadd.f32 1.0, %v7357_v28  ;;  %v7359_v26 = vpop.eup %7358 }
 0x9ab   : > { %v8297_v27 = vpop.f32.mrb[91].mxu0  ;;  %7368 = vpow2.f32 %v5736_v7  ;;  %6521 = vmatprep.mubr.msk.bf16.mxu1 %vm596_vm4, %v8295_v21  ;;  %v5737_v31 = vmul.f32 -1.442695, %v6508_v24  ;;  %v3254_v32 = vadd.f32 1.0, %v7359_v26  ;;  %v7361_v29 = vpop.eup %7360 }
 0x9ac   : > { %7370 = vrcp.f32 %v3253_v25  ;;  %6522 = vmatmul.mubr.msk.bf16.vlgmr.msra.gmra.mrb[48].mxu1 %vm596_vm4, %v8293_v17  ;;  %v5735_v30 = vmul.f32 -1.442695, %v8297_v27  ;;  %v7363_v34 = vpop.eup %7362 }
 0x9ad   : > { %7372 = vpow2.f32 %v5734_v63  ;;  %6538 = vmatpush3.bf16.msra.mxu1 %v8290_v39  ;;  %v7365_v37 = vpop.eup %7364 }
 0x9ae   : > { %7374 = vrcp.f32 %v3256_v23  ;;  %6539 = vmatprep.subr.bf16.mxu1 %v7005_v8 }
 0x9af   : > { %7376 = vtanh.f32 %v3141_v1 }
 0x9b0   : > { %7378 = vrcp.f32 %v3254_v32 }
 0x9b1   : > { %7380 = vpow2.f32 %v5737_v31  ;;  %6540 = vmatpush3.bf16.msra.mxu1 %v7005_v8 }
 0x9b2   : > { %6541 = vmatprep.subr.bf16.mxu1 %v7006_v33  ;;  %7382 = vpow2.f32 %v5735_v30 }
 0x9b3   : > { %v6511_v35 = vpop.f32.mrb[92].mxu0 }
 0x9b4   : > { %v5740_v43 = vmul.f32 -1.442695, %v6511_v35  ;;  %v3170_v38 = vpop.f32.mrb[93].mxu0  ;;  %v7367_v39 = vpop.eup %7366 }
 0x9b5   : > { %v5738_v41 = vmul.f32 -1.442695, %v3170_v38  ;;  %v6512_v42 = vpop.f32.mrb[94].mxu0  ;;  %v7369_v44 = vpop.eup %7368  ;;  %6542 = vmatpush3.bf16.msra.mxu1 %v7006_v33  ;;  %v3303_v54 = vmul.f32 %v7367_v39, %v7361_v29  ;;  %v7012_v39 = vld [vmem:[%s8742_s2 + $0x120] sm:$0xff]  }
 0x9b6   : > { %7384 = vpow2.f32 %v5740_v43  ;;  %v3173_v45 = vpop.f32.mrb[95].mxu0  ;;  %v7371_v46 = vpop.eup %7370  ;;  %v3259_v47 = vadd.f32 1.0, %v7369_v44  ;;  %6543 = vmatprep.subr.bf16.mxu1 %v7007_v36  ;;  %v5741_v49 = vmul.f32 -1.442695, %v6512_v42  ;;  %v7010_v43 = vld [vmem:[%s8742_s2 + $0x110] sm:$0xff]   ;;  %v7015_v44 = vld [vmem:[%s8742_s2 + $0x138] sm:$0xff]  }
 0x9b7   : > { %7386 = vtanh.f32 %v6507_v18  ;;  %v7373_v48 = vpop.eup %7372  ;;  %v5739_v53 = vmul.f32 -1.442695, %v3173_v45  ;;  %v3301_v57 = vmul.f32 %v7371_v46, %v7363_v34 }
 0x9b8   : > { %7388 = vpow2.f32 %v5738_v41  ;;  %v7375_v50 = vpop.eup %7374  ;;  %v3257_v51 = vadd.f32 1.0, %v7373_v48  ;;  %v7013_v41 = vld [vmem:[%s8742_s2 + $0x128] sm:$0xff]  }
 0x9b9   : > { %7390 = vtanh.f32 %v3154_v13  ;;  %v7377_v52 = vpop.eup %7376  ;;  %v3304_v55 = vmul.f32 %v7375_v50, %v7365_v37  ;;  %6544 = vmatpush3.bf16.msra.mxu1 %v7007_v36 }
 0x9ba   : > { %7392 = vtanh.f32 %v6508_v24  ;;  %v7379_v56 = vpop.eup %7378 }
 0x9bb   : > { %7394 = vrcp.f32 %v3259_v47  ;;  %v7381_v59 = vpop.eup %7380  ;;  %v3302_v60 = vmul.f32 %v7379_v56, %v7377_v52  ;;  %v8314_v61 = vpack.c.bf16 %v3304_v55, %v3303_v54 }
 0x9bc   : > { %7396 = vpow2.f32 %v5741_v49  ;;  %v3260_v62 = vadd.f32 1.0, %v7381_v59  ;;  %v7383_v0 = vpop.eup %7382 }
 0x9bd   : > { %7398 = vrcp.f32 %v3257_v51  ;;  %v3315_v1 = vpack.c.bf16 %v3302_v60, %v3301_v57  ;;  %v3258_v3 = vadd.f32 1.0, %v7383_v0 }
 0x9be   : > { %7400 = vpow2.f32 %v5739_v53 }
 0x9bf   : > { %7402 = vrcp.f32 %v3260_v62  ;;  %6525 = vmatprep.mubr.msk.bf16.mxu1 %vm596_vm4, %v3315_v1 }
 0x9c0   : > { %v7385_v4 = vpop.eup %7384  ;;  %7404 = vtanh.f32 %v8297_v27  ;;  %6526 = vmatmul.mubr.msk.bf16.gmra.mrb[52].mxu1 %vm596_vm4, %v8314_v61 }
 0x9c1   : > { %v7387_v5 = vpop.eup %7386  ;;  %7406 = vrcp.f32 %v3258_v3  ;;  %v3263_v9 = vadd.f32 1.0, %v7385_v4 }
 0x9c2   : > { %v7389_v6 = vpop.eup %7388  ;;  %7408 = vtanh.f32 %v6511_v35 }
 0x9c3   : > { %v7391_v58 = vpop.eup %7390  ;;  %v3261_v11 = vadd.f32 1.0, %v7389_v6  ;;  %7410 = vtanh.f32 %v3170_v38  ;;  %v7011_v38 = vld [vmem:[%s8742_s2 + $0x118] sm:$0xff]  }
 0x9c4   : > { %v7393_v10 = vpop.eup %7392  ;;  %7412 = vtanh.f32 %v6512_v42  ;;  %v7014_v42 = vld [vmem:[%s8742_s2 + $0x130] sm:$0xff]  }
 0x9c5   : > { %v7395_v40 = vpop.eup %7394  ;;  %7414 = vrcp.f32 %v3263_v9 }
 0x9c6   : > { %v7397_v12 = vpop.eup %7396  ;;  %7416 = vrcp.f32 %v3261_v11  ;;  %v3307_v22 = vmul.f32 %v7395_v40, %v7387_v5 }
 0x9c7   : > { %v7399_v14 = vpop.eup %7398  ;;  %v3264_v15 = vadd.f32 1.0, %v7397_v12 }
 0x9c8   : > { %v7401_v16 = vpop.eup %7400  ;;  %v3305_v2 = vmul.f32 %v7399_v14, %v7391_v58 }
 0x9c9   : > { %v7403_v18 = vpop.eup %7402  ;;  %7418 = vrcp.f32 %v3264_v15  ;;  %v3262_v20 = vadd.f32 1.0, %v7401_v16 }
 0x9ca   : > { %v7405_v19 = vpop.eup %7404  ;;  %7420 = vtanh.f32 %v3173_v45  ;;  %v3308_v7 = vmul.f32 %v7403_v18, %v7393_v10  ;;  %v8362_v45 = vld [vmem:[%s8744_s4 + $0x3] ss:$0 sm:$0xff] }
 0x9cb   : > { %v7407_v13 = vpop.eup %7406  ;;  %7422 = vrcp.f32 %v3262_v20 }
 0x9cc   : > { %v3306_v63 = vmul.f32 %v7407_v13, %v7405_v19  ;;  %v3318_v24 = vpack.c.bf16 %v3308_v7, %v3307_v22  ;;  %v7409_v25 = vpop.eup %7408 }
 0x9cd   : > { %v7411_v8 = vpop.eup %7410 }
 0x9ce   : > { %v3317_v27 = vpack.c.bf16 %v3306_v63, %v3305_v2  ;;  %v7413_v28 = vpop.eup %7412 }
 0x9cf   : > { %v7415_v23 = vpop.eup %7414 }
 0x9d0   : > { %6529 = vmatprep.mubr.msk.bf16.mxu1 %vm596_vm4, %v3317_v27  ;;  %v7417_v26 = vpop.eup %7416  ;;  %v3311_v33 = vmul.f32 %v7415_v23, %v7409_v25 }
 0x9d1   : > { %6530 = vmatmul.mubr.msk.bf16.gmra.mrb[56].mxu1 %vm596_vm4, %v3318_v24  ;;  %v3309_v34 = vmul.f32 %v7417_v26, %v7411_v8 }
 0x9d3   : > { %v7419_v31 = vpop.eup %7418 }
 0x9d4   : > { %v7421_v32 = vpop.eup %7420  ;;  %v3312_v30 = vmul.f32 %v7419_v31, %v7413_v28 }
 0x9d5   : > { %v7423_v29 = vpop.eup %7422 }
 0x9d6   : > { %v3310_v35 = vmul.f32 %v7423_v29, %v7421_v32  ;;  %v3320_v36 = vpack.c.bf16 %v3312_v30, %v3311_v33 }
 0x9d8   : > { %v3319_v37 = vpack.c.bf16 %v3310_v35, %v3309_v34 }
 0x9da   : > { %6533 = vmatprep.mubr.msk.bf16.mxu1 %vm596_vm4, %v3319_v37 }
 0x9db   : > { %6534 = vmatmul.mubr.msk.bf16.gmra.mrb[60].mxu1 %vm596_vm4, %v3320_v36 }
 0x9dc   : > { %6545 = vmatprep.mubr.msk.bf16.mxu1 %vm596_vm4, %v8295_v21  ;;  %v7008_v21 = vld [vmem:[%s8742_s2 + $0x100] sm:$0xff]  }
 0x9dd   : > { %6561 = vmatprep.subr.bf16.mxu0 %v7008_v21 }
 0x9de   : > { %6562 = vmatpush3.bf16.msra.mxu0 %v7008_v21 }
 0x9e3   : > { %6546 = vmatmul.mubr.msk.bf16.vlgmr.msra.gmra.mrb[16].mxu1 %vm596_vm4, %v8293_v17  ;;  %v7009_v17 = vld [vmem:[%s8742_s2 + $0x108] sm:$0xff]  }
 0x9e4   : > { %6549 = vmatprep.mubr.msk.bf16.mxu1 %vm596_vm4, %v3315_v1  ;;  %6563 = vmatprep.subr.bf16.mxu0 %v7009_v17 }
 0x9e5   : > { %6564 = vmatpush3.bf16.msra.mxu0 %v7009_v17 }
 0x9e6   : > { %6565 = vmatprep.subr.bf16.mxu0 %v7010_v43 }
 0x9e9   : > { %6566 = vmatpush3.bf16.msra.mxu0 %v7010_v43 }
 0x9ea   : > { %6567 = vmatprep.subr.bf16.mxu0 %v7011_v38 }
 0x9eb   : > { %6550 = vmatmul.mubr.msk.bf16.gmra.mrb[20].mxu1 %vm596_vm4, %v8314_v61 }
 0x9ec   : > { %6553 = vmatprep.mubr.msk.bf16.mxu1 %vm596_vm4, %v3317_v27 }
 0x9ed   : > { %6568 = vmatpush3.bf16.msra.mxu0 %v7011_v38 }
 0x9ee   : > { %6569 = vmatprep.subr.bf16.mxu0 %v7012_v39 }
 0x9f1   : > { %6570 = vmatpush3.bf16.msra.mxu0 %v7012_v39 }
 0x9f2   : > { %6571 = vmatprep.subr.bf16.mxu0 %v7013_v41 }
 0x9f3   : > { %6554 = vmatmul.mubr.msk.bf16.gmra.mrb[24].mxu1 %vm596_vm4, %v3318_v24 }
 0x9f4   : > { %6557 = vmatprep.mubr.msk.bf16.mxu1 %vm596_vm4, %v3319_v37 }
 0x9f5   : > { %6572 = vmatpush3.bf16.msra.mxu0 %v7013_v41 }
 0x9f6   : > { %6573 = vmatprep.subr.bf16.mxu0 %v7014_v42 }
 0x9f9   : > { %6574 = vmatpush3.bf16.msra.mxu0 %v7014_v42 }
 0x9fa   : > { %6575 = vmatprep.subr.bf16.mxu0 %v7015_v44 }
 0x9fb   : > { %6558 = vmatmul.mubr.msk.bf16.gmra.mrb[28].mxu1 %vm596_vm4, %v3320_v36 }
 0x9fd   : > { %6576 = vmatpush3.bf16.msra.mxu0 %v7015_v44 }
 0xa7f   : > { %v6523_v46 = vpop.f32.mrb[48].mxu1 }
 0xa80   : > { %v3429_v47 = vadd.f32 %v6523_v46, %v8362_v45  ;;  %v3420_v48 = vpop.f32.mrb[49].mxu1 }
 0xa81   : > { %v3421_v49 = vadd.f32 %v8362_v45, %v3420_v48  ;;  %v6524_v50 = vpop.f32.mrb[50].mxu1 }
 0xa82   : > { %v3432_v51 = vadd.f32 %v6524_v50, %v8362_v45  ;;  %v3423_v52 = vpop.f32.mrb[51].mxu1  ;;  %v3485_v54 = vadd.f32 %v3429_v47, %v3429_v47 }
 0xa83   : > { %v3424_v53 = vadd.f32 %v8362_v45, %v3423_v52  ;;  %v3483_v56 = vadd.f32 %v3421_v49, %v3421_v49 }
 0xa84   : > { %v3486_v55 = vadd.f32 %v3432_v51, %v3432_v51 }
 0xa85   : > { %v3484_v59 = vadd.f32 %v3424_v53, %v3424_v53 }
 0xa86   : > { %v3654_v57 = vpack.c.bf16 %v3486_v55, %v3485_v54 }
 0xa87   : > { %v8368_v60 = vpack.c.bf16 %v3484_v59, %v3483_v56 }
 0xa88   : > { %v3670_v61 = vrot.slane %v3654_v57, 7  ;;  %3691 = vrot.lane.b32.xlu1 %v3654_v57, %s7673_s13 }
 0xa89   : > { %v3669_v62 = vrot.slane %v8368_v60, 7  ;;  %3689 = vrot.lane.b32.xlu0 %v8368_v60, %s7673_s13 }
 0xa8b   : > { %v8375_v0 = vsel %vm517_vm1, %v3669_v62, %v3670_v61  ;;  %v3682_v53 = vsel %vm517_vm1, 0, %v3669_v62 }
 0xa93   : > { %v6527_v1 = vpop.f32.mrb[52].mxu1 }
 0xa94   : > { %v3445_v3 = vadd.f32 %v6527_v1, %v8362_v45  ;;  %v3436_v4 = vpop.f32.mrb[53].mxu1 }
 0xa95   : > { %v3437_v5 = vadd.f32 %v8362_v45, %v3436_v4  ;;  %v6528_v6 = vpop.f32.mrb[54].mxu1 }
 0xa96   : > { %v3448_v58 = vadd.f32 %v6528_v6, %v8362_v45  ;;  %v3439_v9 = vpop.f32.mrb[55].mxu1  ;;  %v3489_v11 = vadd.f32 %v3445_v3, %v3445_v3 }
 0xa97   : > { %v3440_v10 = vadd.f32 %v8362_v45, %v3439_v9  ;;  %v3487_v12 = vadd.f32 %v3437_v5, %v3437_v5 }
 0xa98   : > { %v3490_v40 = vadd.f32 %v3448_v58, %v3448_v58 }
 0xa99   : > { %v3488_v14 = vadd.f32 %v3440_v10, %v3440_v10  ;;  %v7016_v10 = vld [vmem:[%s8743_s3 + $0x80] sm:$0xff]  }
 0xa9a   : > { %v3656_v15 = vpack.c.bf16 %v3490_v40, %v3489_v11  ;;  %6593 = vmatprep.subr.bf16.mxu0 %v7016_v10  ;;  %v7017_v11 = vld [vmem:[%s8743_s3 + $0x88] sm:$0xff]   ;;  %v7019_v40 = vld [vmem:[%s8745_s5 + $0x80] sm:$0xff]  }
 0xa9b   : > { %v3655_v16 = vpack.c.bf16 %v3488_v14, %v3487_v12  ;;  %6617 = vmatprep.subr.bf16.mxu1 %v7019_v40  ;;  %v7020_v12 = vld [vmem:[%s8745_s5 + $0x88] sm:$0xff]   ;;  %v7018_v14 = vld [vmem:[%s8743_s3 + $0x90] sm:$0xff]  }
 0xa9c   : > { %v3673_v18 = vrot.slane %v3656_v15, 7  ;;  %3695 = vrot.lane.b32.xlu1 %v3656_v15, %s7673_s13  ;;  %6618 = vmatpush3.bf16.msra.mxu1 %v7019_v40  ;;  %v7022_v15 = vld [vmem:[%s8745_s5 + $0x90] sm:$0xff]  }
 0xa9d   : > { %v3672_v20 = vrot.slane %v3655_v16, 7  ;;  %3693 = vrot.lane.b32.xlu0 %v3655_v16, %s7673_s13  ;;  %6619 = vmatprep.subr.bf16.mxu1 %v7020_v12  ;;  %v7021_v16 = vld [vmem:[%s8743_s3 + $0x98] sm:$0xff]  }
 0xa9f   : > { %v3674_v19 = vsel %vm517_vm1, %v3672_v20, %v3673_v18  ;;  %v3684_v59 = vsel %vm517_vm1, 0, %v3672_v20  ;;  %v7023_v18 = vld [vmem:[%s8745_s5 + $0x98] sm:$0xff]  }
 0xaa0   : > { %6620 = vmatpush3.bf16.msra.mxu1 %v7020_v12 }
 0xaa1   : > { %6621 = vmatprep.subr.bf16.mxu1 %v7022_v15 }
 0xaa4   : > { %v6531_v22 = vpop.f32.mrb[56].mxu1  ;;  %6622 = vmatpush3.bf16.msra.mxu1 %v7022_v15 }
 0xaa5   : > { %v3461_v7 = vadd.f32 %v6531_v22, %v8362_v45  ;;  %v3452_v13 = vpop.f32.mrb[57].mxu1  ;;  %6623 = vmatprep.subr.bf16.mxu1 %v7023_v18 }
 0xaa6   : > { %v3453_v2 = vadd.f32 %v8362_v45, %v3452_v13  ;;  %v6532_v63 = vpop.f32.mrb[58].mxu1 }
 0xaa7   : > { %v3464_v24 = vadd.f32 %v6532_v63, %v8362_v45  ;;  %v3455_v25 = vpop.f32.mrb[59].mxu1  ;;  %v3493_v8 = vadd.f32 %v3461_v7, %v3461_v7 }
 0xaa8   : > { %v3456_v27 = vadd.f32 %v8362_v45, %v3455_v25  ;;  %v3491_v23 = vadd.f32 %v3453_v2, %v3453_v2  ;;  %6624 = vmatpush3.bf16.msra.mxu1 %v7023_v18 }
 0xaa9   : > { %v3494_v28 = vadd.f32 %v3464_v24, %v3464_v24 }
 0xaaa   : > { %v3492_v26 = vadd.f32 %v3456_v27, %v3456_v27 }
 0xaab   : > { %v3658_v31 = vpack.c.bf16 %v3494_v28, %v3493_v8 }
 0xaac   : > { %v3657_v32 = vpack.c.bf16 %v3492_v26, %v3491_v23 }
 0xaad   : > { %v3676_v33 = vrot.slane %v3658_v31, 7  ;;  %3699 = vrot.lane.b32.xlu1 %v3658_v31, %s7673_s13 }
 0xaae   : > { %v3675_v30 = vrot.slane %v3657_v32, 7  ;;  %v6535_v29 = vpop.f32.mrb[60].mxu1  ;;  %3697 = vrot.lane.b32.xlu0 %v3657_v32, %s7673_s13 }
 0xaaf   : > { %v3477_v34 = vadd.f32 %v6535_v29, %v8362_v45  ;;  %v3468_v35 = vpop.f32.mrb[61].mxu1 }
 0xab0   : > { %v3469_v36 = vadd.f32 %v8362_v45, %v3468_v35  ;;  %v6536_v37 = vpop.f32.mrb[62].mxu1  ;;  %v3677_v21 = vsel %vm517_vm1, %v3675_v30, %v3676_v33  ;;  %v3686_v62 = vsel %vm517_vm1, 0, %v3675_v30 }
 0xab1   : > { %v3480_v17 = vadd.f32 %v6536_v37, %v8362_v45  ;;  %v3471_v43 = vpop.f32.mrb[63].mxu1  ;;  %v3497_v39 = vadd.f32 %v3477_v34, %v3477_v34 }
 0xab2   : > { %v3472_v38 = vadd.f32 %v8362_v45, %v3471_v43  ;;  %v3495_v42 = vadd.f32 %v3469_v36, %v3469_v36 }
 0xab3   : > { %v3498_v41 = vadd.f32 %v3480_v17, %v3480_v17 }
 0xab4   : > { %v3496_v44 = vadd.f32 %v3472_v38, %v3472_v38 }
 0xab5   : > { %v3660_v46 = vpack.c.bf16 %v3498_v41, %v3497_v39 }
 0xab6   : > { %v3659_v47 = vpack.c.bf16 %v3496_v44, %v3495_v42 }
 0xab7   : > { %v3679_v48 = vrot.slane %v3660_v46, 7  ;;  %3703 = vrot.lane.b32.xlu1 %v3660_v46, %s7673_s13 }
 0xab8   : > { %v3678_v49 = vrot.slane %v3659_v47, 7  ;;  %3701 = vrot.lane.b32.xlu0 %v3659_v47, %s7673_s13 }
 0xaba   : > { %v3680_v50 = vsel %vm517_vm1, %v3678_v49, %v3679_v48  ;;  %v3688_v6 = vsel %vm517_vm1, 0, %v3678_v49 }
 0xafa   : > { %v3692_v51 = vpop.permute.xlu1 %3691 }
 0xafb   : > { %v3690_v52 = vpop.permute.xlu0 %3689  ;;  %v3710_v54 = vsel %vm596_vm4, %v8375_v0, %v3692_v51 }
 0xafc   : > { %v3706_v45 = vsel %vm596_vm4, %v3682_v53, %v3690_v52 }
 0xafd   : > { %6577 = vmatprep.mubr.bf16.mxu0 %v3706_v45 }
 0xafe   : > { %6578 = vmatmul.mubr.bf16.vlgmr.msra.gmra.mrb[96].mxu0 %v3710_v54 }
 0xaff   : > { %6594 = vmatpush3.bf16.msra.mxu0 %v7016_v10 }
 0xb00   : > { %6595 = vmatprep.subr.bf16.mxu0 %v7017_v11 }
 0xb03   : > { %6596 = vmatpush3.bf16.msra.mxu0 %v7017_v11 }
 0xb04   : > { %6597 = vmatprep.subr.bf16.mxu0 %v7018_v14 }
 0xb07   : > { %6598 = vmatpush3.bf16.msra.mxu0 %v7018_v14 }
 0xb08   : > { %6599 = vmatprep.subr.bf16.mxu0 %v7021_v16 }
 0xb0b   : > { %6600 = vmatpush3.bf16.msra.mxu0 %v7021_v16 }
 0xb0e   : > { %v3696_v55 = vpop.permute.xlu1 %3695 }
 0xb0f   : > { %v3694_v56 = vpop.permute.xlu0 %3693  ;;  %v3717_v60 = vsel %vm596_vm4, %v3674_v19, %v3696_v55 }
 0xb10   : > { %v3713_v57 = vsel %vm596_vm4, %v3684_v59, %v3694_v56 }
 0xb11   : > { %6581 = vmatprep.mubr.bf16.mxu0 %v3713_v57 }
 0xb12   : > { %6582 = vmatmul.mubr.bf16.gmra.mrb[100].mxu0 %v3717_v60 }
 0xb1f   : > { %v3700_v61 = vpop.permute.xlu1 %3699 }
 0xb20   : > { %v3698_v1 = vpop.permute.xlu0 %3697  ;;  %v3724_v0 = vsel %vm596_vm4, %v3677_v21, %v3700_v61 }
 0xb21   : > { %v3720_v3 = vsel %vm596_vm4, %v3686_v62, %v3698_v1 }
 0xb22   : > { %6585 = vmatprep.mubr.bf16.mxu0 %v3720_v3 }
 0xb23   : > { %6586 = vmatmul.mubr.bf16.gmra.mrb[104].mxu0 %v3724_v0 }
 0xb29   : > { %v3704_v4 = vpop.permute.xlu1 %3703 }
 0xb2a   : > { %v3702_v5 = vpop.permute.xlu0 %3701  ;;  %v3731_v9 = vsel %vm596_vm4, %v3680_v50, %v3704_v4 }
 0xb2b   : > { %v3727_v58 = vsel %vm596_vm4, %v3688_v6, %v3702_v5 }
 0xb2c   : > { %6589 = vmatprep.mubr.bf16.mxu0 %v3727_v58 }
 0xb2d   : > { %6590 = vmatmul.mubr.bf16.gmra.mrb[108].mxu0 %v3731_v9 }
 0xbd1   : > { %v6579_v20 = vpop.f32.mrb[96].mxu0 }
 0xbd2   : > { %v5812_v19 = vmul.f32 -1.442695, %v6579_v20  ;;  %v3832_v22 = vpop.f32.mrb[97].mxu0 }
 0xbd3   : > { %v5810_v7 = vmul.f32 -1.442695, %v3832_v22  ;;  %v6580_v13 = vpop.f32.mrb[98].mxu0 }
 0xbd4   : > { %7424 = vpow2.f32 %v5812_v19  ;;  %v5813_v2 = vmul.f32 -1.442695, %v6580_v13  ;;  %v3835_v63 = vpop.f32.mrb[99].mxu0 }
 0xbd5   : > { %7426 = vpow2.f32 %v5810_v7  ;;  %v5811_v24 = vmul.f32 -1.442695, %v3835_v63 }
 0xbd6   : > { %7428 = vpow2.f32 %v5813_v2 }
 0xbd7   : > { %7430 = vpow2.f32 %v5811_v24 }
 0xbd8   : > { %7432 = vtanh.f32 %v6579_v20 }
 0xbd9   : > { %7434 = vtanh.f32 %v3832_v22 }
 0xbda   : > { %7436 = vtanh.f32 %v6580_v13 }
 0xbde   : > { %v7425_v25 = vpop.eup %7424 }
 0xbdf   : > { %v7427_v27 = vpop.eup %7426  ;;  %v3961_v8 = vadd.f32 1.0, %v7425_v25 }
 0xbe0   : > { %v3959_v28 = vadd.f32 1.0, %v7427_v27  ;;  %v7429_v23 = vpop.eup %7428 }
 0xbe1   : > { %7438 = vrcp.f32 %v3961_v8  ;;  %v3962_v26 = vadd.f32 1.0, %v7429_v23  ;;  %v7431_v31 = vpop.eup %7430 }
 0xbe2   : > { %7440 = vrcp.f32 %v3959_v28  ;;  %v3960_v32 = vadd.f32 1.0, %v7431_v31  ;;  %v7433_v21 = vpop.eup %7432 }
 0xbe3   : > { %7442 = vrcp.f32 %v3962_v26  ;;  %v7435_v17 = vpop.eup %7434 }
 0xbe4   : > { %7444 = vtanh.f32 %v3835_v63  ;;  %v7437_v38 = vpop.eup %7436 }
 0xbe5   : > { %v6583_v33 = vpop.f32.mrb[100].mxu0  ;;  %7446 = vrcp.f32 %v3960_v32 }
 0xbe6   : > { %v5816_v30 = vmul.f32 -1.442695, %v6583_v33  ;;  %v3848_v29 = vpop.f32.mrb[101].mxu0 }
 0xbe7   : > { %v5814_v34 = vmul.f32 -1.442695, %v3848_v29  ;;  %v6584_v35 = vpop.f32.mrb[102].mxu0 }
 0xbe8   : > { %7448 = vpow2.f32 %v5816_v30  ;;  %v5817_v36 = vmul.f32 -1.442695, %v6584_v35  ;;  %v3851_v37 = vpop.f32.mrb[103].mxu0 }
 0xbe9   : > { %7450 = vpow2.f32 %v5814_v34  ;;  %v5815_v43 = vmul.f32 -1.442695, %v3851_v37 }
 0xbea   : > { %7452 = vpow2.f32 %v5817_v36 }
 0xbeb   : > { %v7439_v39 = vpop.eup %7438  ;;  %7454 = vpow2.f32 %v5815_v43 }
 0xbec   : > { %v7441_v41 = vpop.eup %7440  ;;  %v4009_v46 = vmul.f32 %v7439_v39, %v7433_v21  ;;  %7456 = vtanh.f32 %v6583_v33 }
 0xbed   : > { %v7443_v42 = vpop.eup %7442  ;;  %v4007_v50 = vmul.f32 %v7441_v41, %v7435_v17  ;;  %7458 = vtanh.f32 %v3848_v29 }
 0xbee   : > { %v7445_v44 = vpop.eup %7444  ;;  %v4010_v47 = vmul.f32 %v7443_v42, %v7437_v38  ;;  %7460 = vtanh.f32 %v6584_v35 }
 0xbef   : > { %v7447_v48 = vpop.eup %7446 }
 0xbf0   : > { %v4024_v49 = vpack.c.bf16 %v4010_v47, %v4009_v46  ;;  %v4008_v51 = vmul.f32 %v7447_v48, %v7445_v44 }
 0xbf2   : > { %v7449_v52 = vpop.eup %7448  ;;  %v4023_v45 = vpack.c.bf16 %v4008_v51, %v4007_v50 }
 0xbf3   : > { %v3965_v53 = vadd.f32 1.0, %v7449_v52  ;;  %v7451_v54 = vpop.eup %7450 }
 0xbf4   : > { %v3963_v55 = vadd.f32 1.0, %v7451_v54  ;;  %6601 = vmatprep.mubr.msk.bf16.mxu0 %vm596_vm4, %v4023_v45  ;;  %6625 = vmatprep.mubr.msk.bf16.mxu1 %vm596_vm4, %v4023_v45  ;;  %v7453_v59 = vpop.eup %7452 }
 0xbf5   : > { %7462 = vrcp.f32 %v3965_v53  ;;  %6602 = vmatmul.mubr.msk.bf16.vlgmr.msra.gmra.mrb[112].mxu0 %vm596_vm4, %v4024_v49  ;;  %6626 = vmatmul.mubr.msk.bf16.vlgmr.msra.gmra.mrb[16].mxu1 %vm596_vm4, %v4024_v49  ;;  %v3966_v61 = vadd.f32 1.0, %v7453_v59  ;;  %v7455_v62 = vpop.eup %7454 }
 0xbf6   : > { %v6587_v56 = vpop.f32.mrb[104].mxu0  ;;  %7464 = vrcp.f32 %v3963_v55  ;;  %v3964_v4 = vadd.f32 1.0, %v7455_v62  ;;  %v7457_v58 = vpop.eup %7456 }
 0xbf7   : > { %v5820_v57 = vmul.f32 -1.442695, %v6587_v56  ;;  %v3864_v60 = vpop.f32.mrb[105].mxu0  ;;  %v7459_v9 = vpop.eup %7458 }
 0xbf8   : > { %v6588_v1 = vpop.f32.mrb[106].mxu0  ;;  %v5818_v3 = vmul.f32 -1.442695, %v3864_v60  ;;  %v7461_v10 = vpop.eup %7460 }
 0xbf9   : > { %7466 = vpow2.f32 %v5820_v57  ;;  %v3867_v0 = vpop.f32.mrb[107].mxu0  ;;  %v5821_v5 = vmul.f32 -1.442695, %v6588_v1 }
 0xbfa   : > { %7468 = vrcp.f32 %v3966_v61  ;;  %v5819_v6 = vmul.f32 -1.442695, %v3867_v0 }
 0xbfb   : > { %7470 = vtanh.f32 %v3851_v37 }
 0xbfc   : > { %7472 = vrcp.f32 %v3964_v4 }
 0xbfd   : > { %7474 = vpow2.f32 %v5818_v3 }
 0xbfe   : > { %7476 = vpow2.f32 %v5821_v5 }
 0xbff   : > { %v7463_v40 = vpop.eup %7462  ;;  %7478 = vpow2.f32 %v5819_v6 }
 0xc00   : > { %v6591_v11 = vpop.f32.mrb[108].mxu0  ;;  %v7465_v15 = vpop.eup %7464  ;;  %7480 = vtanh.f32 %v6587_v56  ;;  %v4013_v63 = vmul.f32 %v7463_v40, %v7457_v58  ;;  %v7026_v40 = vld [vmem:[%s8742_s2 + $0x150] sm:$0xff]  }
 0xc01   : > { %v5824_v12 = vmul.f32 -1.442695, %v6591_v11  ;;  %v3880_v14 = vpop.f32.mrb[109].mxu0  ;;  %v4011_v28 = vmul.f32 %v7465_v15, %v7459_v9  ;;  %v7029_v15 = vld [vmem:[%s8742_s2 + $0x168] sm:$0xff]  }
 0xc02   : > { %v5822_v16 = vmul.f32 -1.442695, %v3880_v14  ;;  %v6592_v18 = vpop.f32.mrb[110].mxu0 }
 0xc03   : > { %v7467_v20 = vpop.eup %7466  ;;  %7482 = vpow2.f32 %v5824_v12  ;;  %v3883_v19 = vpop.f32.mrb[111].mxu0  ;;  %v5825_v7 = vmul.f32 -1.442695, %v6592_v18  ;;  %v7027_v12 = vld [vmem:[%s8742_s2 + $0x158] sm:$0xff]  }
 0xc04   : > { %v7469_v22 = vpop.eup %7468  ;;  %7484 = vtanh.f32 %v3864_v60  ;;  %v3969_v2 = vadd.f32 1.0, %v7467_v20  ;;  %v5823_v8 = vmul.f32 -1.442695, %v3883_v19  ;;  %v8478_v20 = vld [vmem:[%s8744_s4 + $0x4] ss:$0 sm:$0xff] }
 0xc05   : > { %v7471_v13 = vpop.eup %7470  ;;  %7486 = vpow2.f32 %v5822_v16  ;;  %v4014_v24 = vmul.f32 %v7469_v22, %v7461_v10  ;;  %v7024_v10 = vld [vmem:[%s8742_s2 + $0x140] sm:$0xff]   ;;  %v7030_v16 = vld [vmem:[%s8742_s2 + $0x170] sm:$0xff]  }
 0xc06   : > { %v7473_v25 = vpop.eup %7472  ;;  %7488 = vtanh.f32 %v6588_v1  ;;  %6641 = vmatprep.subr.bf16.mxu0 %v7024_v10 }
 0xc07   : > { %v7475_v27 = vpop.eup %7474  ;;  %v4012_v23 = vmul.f32 %v7473_v25, %v7471_v13  ;;  %v4026_v26 = vpack.c.bf16 %v4014_v24, %v4013_v63  ;;  %7490 = vpow2.f32 %v5825_v7  ;;  %6642 = vmatpush3.bf16.msra.mxu0 %v7024_v10 }
 0xc08   : > { %v3967_v31 = vadd.f32 1.0, %v7475_v27  ;;  %v7477_v32 = vpop.eup %7476  ;;  %7492 = vrcp.f32 %v3969_v2 }
 0xc09   : > { %v4025_v33 = vpack.c.bf16 %v4012_v23, %v4011_v28  ;;  %v3970_v30 = vadd.f32 1.0, %v7477_v32  ;;  %v7479_v29 = vpop.eup %7478 }
 0xc0a   : > { %7494 = vrcp.f32 %v3967_v31  ;;  %v7481_v34 = vpop.eup %7480  ;;  %v3968_v35 = vadd.f32 1.0, %v7479_v29 }
 0xc0b   : > { %7496 = vpow2.f32 %v5823_v8  ;;  %6605 = vmatprep.mubr.msk.bf16.mxu0 %vm596_vm4, %v4025_v33  ;;  %6629 = vmatprep.mubr.msk.bf16.mxu1 %vm596_vm4, %v4025_v33 }
 0xc0c   : > { %7498 = vrcp.f32 %v3970_v30  ;;  %6606 = vmatmul.mubr.msk.bf16.gmra.mrb[116].mxu0 %vm596_vm4, %v4026_v26  ;;  %6630 = vmatmul.mubr.msk.bf16.gmra.mrb[20].mxu1 %vm596_vm4, %v4026_v26 }
 0xc0d   : > { %v7483_v36 = vpop.eup %7482  ;;  %7500 = vtanh.f32 %v3867_v0 }
 0xc0e   : > { %v7485_v37 = vpop.eup %7484  ;;  %7502 = vrcp.f32 %v3968_v35  ;;  %v3973_v17 = vadd.f32 1.0, %v7483_v36 }
 0xc0f   : > { %v7487_v21 = vpop.eup %7486  ;;  %7504 = vtanh.f32 %v6591_v11  ;;  %v7025_v11 = vld [vmem:[%s8742_s2 + $0x148] sm:$0xff]  }
 0xc10   : > { %v7489_v43 = vpop.eup %7488  ;;  %7506 = vtanh.f32 %v3880_v14  ;;  %v3971_v39 = vadd.f32 1.0, %v7487_v21  ;;  %6643 = vmatprep.subr.bf16.mxu0 %v7025_v11  ;;  %v7028_v14 = vld [vmem:[%s8742_s2 + $0x160] sm:$0xff]  }
 0xc11   : > { %v7491_v38 = vpop.eup %7490  ;;  %7508 = vrcp.f32 %v3973_v17  ;;  %6644 = vmatpush3.bf16.msra.mxu0 %v7025_v11 }
 0xc12   : > { %v7493_v41 = vpop.eup %7492  ;;  %v3974_v42 = vadd.f32 1.0, %v7491_v38  ;;  %7510 = vtanh.f32 %v6592_v18  ;;  %6645 = vmatprep.subr.bf16.mxu0 %v7026_v40  ;;  %v7031_v18 = vld [vmem:[%s8742_s2 + $0x178] sm:$0xff]  }
 0xc13   : > { %v4017_v50 = vmul.f32 %v7493_v41, %v7481_v34 }
 0xc14   : > { %v7495_v44 = vpop.eup %7494  ;;  %7512 = vrcp.f32 %v3974_v42 }
 0xc15   : > { %v7497_v46 = vpop.eup %7496  ;;  %7514 = vrcp.f32 %v3971_v39  ;;  %v4015_v53 = vmul.f32 %v7495_v44, %v7485_v37  ;;  %6646 = vmatpush3.bf16.msra.mxu0 %v7026_v40 }
 0xc16   : > { %v7499_v47 = vpop.eup %7498  ;;  %v3972_v48 = vadd.f32 1.0, %v7497_v46  ;;  %7516 = vtanh.f32 %v3883_v19  ;;  %6647 = vmatprep.subr.bf16.mxu0 %v7027_v12 }
 0xc17   : > { %v7501_v49 = vpop.eup %7500  ;;  %v4018_v51 = vmul.f32 %v7499_v47, %v7489_v43 }
 0xc18   : > { %v7503_v52 = vpop.eup %7502  ;;  %7518 = vrcp.f32 %v3972_v48 }
 0xc19   : > { %v4016_v45 = vmul.f32 %v7503_v52, %v7501_v49  ;;  %v4028_v54 = vpack.c.bf16 %v4018_v51, %v4017_v50  ;;  %v7505_v55 = vpop.eup %7504  ;;  %6648 = vmatpush3.bf16.msra.mxu0 %v7027_v12 }
 0xc1a   : > { %v7507_v59 = vpop.eup %7506  ;;  %6649 = vmatprep.subr.bf16.mxu0 %v7028_v14 }
 0xc1b   : > { %v4027_v56 = vpack.c.bf16 %v4016_v45, %v4015_v53  ;;  %v7509_v57 = vpop.eup %7508 }
 0xc1c   : > { %v7511_v60 = vpop.eup %7510  ;;  %v4021_v62 = vmul.f32 %v7509_v57, %v7505_v55 }
 0xc1d   : > { %6609 = vmatprep.mubr.msk.bf16.mxu0 %vm596_vm4, %v4027_v56  ;;  %6633 = vmatprep.mubr.msk.bf16.mxu1 %vm596_vm4, %v4027_v56 }
 0xc1e   : > { %6610 = vmatmul.mubr.msk.bf16.gmra.mrb[120].mxu0 %vm596_vm4, %v4028_v54  ;;  %6634 = vmatmul.mubr.msk.bf16.gmra.mrb[24].mxu1 %vm596_vm4, %v4028_v54  ;;  %v7513_v61 = vpop.eup %7512 }
 0xc1f   : > { %v7515_v1 = vpop.eup %7514  ;;  %v4022_v3 = vmul.f32 %v7513_v61, %v7511_v60  ;;  %6650 = vmatpush3.bf16.msra.mxu0 %v7028_v14 }
 0xc20   : > { %v7517_v0 = vpop.eup %7516  ;;  %v4019_v6 = vmul.f32 %v7515_v1, %v7507_v59  ;;  %6651 = vmatprep.subr.bf16.mxu0 %v7029_v15 }
 0xc21   : > { %v4030_v5 = vpack.c.bf16 %v4022_v3, %v4021_v62 }
 0xc22   : > { %v7519_v4 = vpop.eup %7518 }
 0xc23   : > { %v4020_v58 = vmul.f32 %v7519_v4, %v7517_v0  ;;  %6652 = vmatpush3.bf16.msra.mxu0 %v7029_v15 }
 0xc24   : > { %6653 = vmatprep.subr.bf16.mxu0 %v7030_v16 }
 0xc25   : > { %v4029_v9 = vpack.c.bf16 %v4020_v58, %v4019_v6 }
 0xc27   : > { %6613 = vmatprep.mubr.msk.bf16.mxu0 %vm596_vm4, %v4029_v9  ;;  %6637 = vmatprep.mubr.msk.bf16.mxu1 %vm596_vm4, %v4029_v9 }
 0xc28   : > { %6614 = vmatmul.mubr.msk.bf16.gmra.mrb[124].mxu0 %vm596_vm4, %v4030_v5  ;;  %6638 = vmatmul.mubr.msk.bf16.gmra.mrb[28].mxu1 %vm596_vm4, %v4030_v5 }
 0xc29   : > { %6654 = vmatpush3.bf16.msra.mxu0 %v7030_v16 }
 0xc2a   : > { %6655 = vmatprep.subr.bf16.mxu0 %v7031_v18 }
 0xc2d   : > { %6656 = vmatpush3.bf16.msra.mxu0 %v7031_v18 }
 0xcc8   : > { %v6603_v19 = vpop.f32.mrb[112].mxu0  ;;  %v8480_v22 = vpop.f32.mrb[16].mxu1 }
 0xcc9   : > { %v4139_v7 = vadd.f32 %v6603_v19, %v8478_v20  ;;  %v4130_v13 = vpop.f32.mrb[113].mxu0  ;;  %v8483_v2 = vpop.f32.mrb[17].mxu1 }
 0xcca   : > { %v4131_v63 = vadd.f32 %v8478_v20, %v4130_v13  ;;  %v6604_v24 = vpop.f32.mrb[114].mxu0  ;;  %v8486_v25 = vpop.f32.mrb[18].mxu1 }
 0xccb   : > { %v4142_v27 = vadd.f32 %v6604_v24, %v8478_v20  ;;  %v4133_v8 = vpop.f32.mrb[115].mxu0  ;;  %v8489_v28 = vpop.f32.mrb[19].mxu1  ;;  %v4195_v26 = vadd.f32 %v4139_v7, %v4139_v7 }
 0xccc   : > { %v4134_v23 = vadd.f32 %v8478_v20, %v4133_v8  ;;  %v4193_v32 = vadd.f32 %v4131_v63, %v4131_v63 }
 0xccd   : > { %v4196_v31 = vadd.f32 %v4142_v27, %v4142_v27 }
 0xcce   : > { %v4194_v33 = vadd.f32 %v4134_v23, %v4134_v23 }
 0xccf   : > { %v4364_v30 = vpack.c.bf16 %v4196_v31, %v4195_v26 }
 0xcd0   : > { %v8492_v29 = vpack.c.bf16 %v4194_v33, %v4193_v32 }
 0xcd1   : > { %v4380_v34 = vrot.slane %v4364_v30, 6  ;;  %4401 = vrot.lane.b32.xlu1 %v4364_v30, %s7673_s13 }
 0xcd2   : > { %v4379_v35 = vrot.slane %v8492_v29, 6  ;;  %4399 = vrot.lane.b32.xlu0 %v8492_v29, %s7673_s13 }
 0xcd4   : > { %v8499_v36 = vsel %vm2195_vm5, %v4379_v35, %v4380_v34  ;;  %v4392_v33 = vsel %vm2195_vm5, 0, %v4379_v35 }
 0xcdf   : > { %v6607_v37 = vpop.f32.mrb[116].mxu0 }
 0xce0   : > { %v4155_v21 = vadd.f32 %v6607_v37, %v8478_v20  ;;  %v4146_v17 = vpop.f32.mrb[117].mxu0 }
 0xce1   : > { %v4147_v43 = vadd.f32 %v8478_v20, %v4146_v17  ;;  %v6608_v38 = vpop.f32.mrb[118].mxu0 }
 0xce2   : > { %v4158_v39 = vadd.f32 %v6608_v38, %v8478_v20  ;;  %v4149_v41 = vpop.f32.mrb[119].mxu0  ;;  %v4199_v44 = vadd.f32 %v4155_v21, %v4155_v21 }
 0xce3   : > { %v4150_v42 = vadd.f32 %v8478_v20, %v4149_v41  ;;  %v4197_v47 = vadd.f32 %v4147_v43, %v4147_v43 }
 0xce4   : > { %v4200_v46 = vadd.f32 %v4158_v39, %v4158_v39 }
 0xce5   : > { %v4198_v48 = vadd.f32 %v4150_v42, %v4150_v42 }
 0xce6   : > { %v4366_v49 = vpack.c.bf16 %v4200_v46, %v4199_v44 }
 0xce7   : > { %v4365_v50 = vpack.c.bf16 %v4198_v48, %v4197_v47  ;;  %v7032_v48 = vld [vmem:[%s8745_s5 + $0xa0] sm:$0xff]  }
 0xce8   : > { %v4383_v51 = vrot.slane %v4366_v49, 6  ;;  %4405 = vrot.lane.b32.xlu1 %v4366_v49, %s7673_s13  ;;  %6673 = vmatprep.subr.bf16.mxu0 %v7032_v48  ;;  %v7033_v49 = vld [vmem:[%s8745_s5 + $0xa8] sm:$0xff]  }
 0xce9   : > { %v4382_v52 = vrot.slane %v4365_v50, 6  ;;  %4403 = vrot.lane.b32.xlu0 %v4365_v50, %s7673_s13  ;;  %6737 = vmatprep.subr.bf16.mxu1 %v7032_v48  ;;  %v7034_v50 = vld [vmem:[%s8745_s5 + $0xb0] sm:$0xff]  }
 0xcea   : > { %6741 = vmatpush3.bf16.msra.mxu1 %v7032_v48 }
 0xceb   : > { %v4384_v53 = vsel %vm2195_vm5, %v4382_v52, %v4383_v51  ;;  %v4394_v37 = vsel %vm2195_vm5, 0, %v4382_v52  ;;  %6738 = vmatprep.subr.bf16.mxu1 %v7033_v49  ;;  %v7035_v51 = vld [vmem:[%s8745_s5 + $0xb8] sm:$0xff]  }
 0xcee   : > { %6742 = vmatpush3.bf16.msra.mxu1 %v7033_v49 }
 0xcef   : > { %6739 = vmatprep.subr.bf16.mxu1 %v7034_v50 }
 0xcf1   : > { %v6611_v45 = vpop.f32.mrb[120].mxu0 }
 0xcf2   : > { %v4171_v54 = vadd.f32 %v6611_v45, %v8478_v20  ;;  %v4162_v55 = vpop.f32.mrb[121].mxu0  ;;  %6743 = vmatpush3.bf16.msra.mxu1 %v7034_v50 }
 0xcf3   : > { %v4163_v56 = vadd.f32 %v8478_v20, %v4162_v55  ;;  %v6612_v59 = vpop.f32.mrb[122].mxu0  ;;  %6740 = vmatprep.subr.bf16.mxu1 %v7035_v51 }
 0xcf4   : > { %v4174_v57 = vadd.f32 %v6612_v59, %v8478_v20  ;;  %v4165_v60 = vpop.f32.mrb[123].mxu0  ;;  %v4203_v1 = vadd.f32 %v4171_v54, %v4171_v54 }
 0xcf5   : > { %v4166_v61 = vadd.f32 %v8478_v20, %v4165_v60  ;;  %v4201_v3 = vadd.f32 %v4163_v56, %v4163_v56 }
 0xcf6   : > { %v4204_v62 = vadd.f32 %v4174_v57, %v4174_v57  ;;  %6744 = vmatpush3.bf16.msra.mxu1 %v7035_v51 }
 0xcf7   : > { %v4202_v0 = vadd.f32 %v4166_v61, %v4166_v61 }
 0xcf8   : > { %v4368_v4 = vpack.c.bf16 %v4204_v62, %v4203_v1 }
 0xcf9   : > { %v4367_v5 = vpack.c.bf16 %v4202_v0, %v4201_v3 }
 0xcfa   : > { %v4386_v6 = vrot.slane %v4368_v4, 6  ;;  %4409 = vrot.lane.b32.xlu1 %v4368_v4, %s7673_s13 }
 0xcfb   : > { %v4385_v58 = vrot.slane %v4367_v5, 6  ;;  %v6615_v9 = vpop.f32.mrb[124].mxu0  ;;  %4407 = vrot.lane.b32.xlu0 %v4367_v5, %s7673_s13 }
 0xcfc   : > { %v4187_v10 = vadd.f32 %v6615_v9, %v8478_v20  ;;  %v4178_v11 = vpop.f32.mrb[125].mxu0 }
 0xcfd   : > { %v4179_v40 = vadd.f32 %v8478_v20, %v4178_v11  ;;  %v6616_v12 = vpop.f32.mrb[126].mxu0  ;;  %v4387_v14 = vsel %vm2195_vm5, %v4385_v58, %v4386_v6  ;;  %v4396_v35 = vsel %vm2195_vm5, 0, %v4385_v58 }
 0xcfe   : > { %v4190_v15 = vadd.f32 %v6616_v12, %v8478_v20  ;;  %v4181_v16 = vpop.f32.mrb[127].mxu0  ;;  %v4207_v19 = vadd.f32 %v4187_v10, %v4187_v10 }
 0xcff   : > { %v4182_v18 = vadd.f32 %v8478_v20, %v4181_v16  ;;  %v4205_v13 = vadd.f32 %v4179_v40, %v4179_v40 }
 0xd00   : > { %v4208_v7 = vadd.f32 %v4190_v15, %v4190_v15 }
 0xd01   : > { %v4206_v63 = vadd.f32 %v4182_v18, %v4182_v18 }
 0xd02   : > { %v4370_v24 = vpack.c.bf16 %v4208_v7, %v4207_v19 }
 0xd03   : > { %v4369_v27 = vpack.c.bf16 %v4206_v63, %v4205_v13 }
 0xd04   : > { %v4389_v8 = vrot.slane %v4370_v24, 6  ;;  %4413 = vrot.lane.b32.xlu1 %v4370_v24, %s7673_s13 }
 0xd05   : > { %v4388_v23 = vrot.slane %v4369_v27, 6  ;;  %4411 = vrot.lane.b32.xlu0 %v4369_v27, %s7673_s13 }
 0xd07   : > { %v4390_v26 = vsel %vm2195_vm5, %v4388_v23, %v4389_v8  ;;  %v4398_v44 = vsel %vm2195_vm5, 0, %v4388_v23 }
 0xd43   : > { %v4402_v31 = vpop.permute.xlu1 %4401 }
 0xd44   : > { %v4400_v32 = vpop.permute.xlu0 %4399  ;;  %v4420_v30 = vsel %vm596_vm4, %v8499_v36, %v4402_v31 }
 0xd45   : > { %v4416_v20 = vsel %vm596_vm4, %v4392_v33, %v4400_v32 }
 0xd46   : > { %6657 = vmatprep.mubr.bf16.mxu0 %v4416_v20 }
 0xd47   : > { %6658 = vmatmul.mubr.bf16.vlgmr.msra.gmra.mrb[128].mxu0 %v4420_v30 }
 0xd48   : > { %6674 = vmatpush3.bf16.msra.mxu0 %v7032_v48 }
 0xd49   : > { %6675 = vmatprep.subr.bf16.mxu0 %v7033_v49 }
 0xd4c   : > { %6676 = vmatpush3.bf16.msra.mxu0 %v7033_v49 }
 0xd4d   : > { %6677 = vmatprep.subr.bf16.mxu0 %v7034_v50 }
 0xd50   : > { %6678 = vmatpush3.bf16.msra.mxu0 %v7034_v50 }
 0xd51   : > { %6679 = vmatprep.subr.bf16.mxu0 %v7035_v51 }
 0xd54   : > { %6680 = vmatpush3.bf16.msra.mxu0 %v7035_v51 }
 0xd5a   : > { %v4406_v29 = vpop.permute.xlu1 %4405 }
 0xd5b   : > { %v4404_v34 = vpop.permute.xlu0 %4403  ;;  %v4427_v17 = vsel %vm596_vm4, %v4384_v53, %v4406_v29 }
 0xd5c   : > { %v4423_v21 = vsel %vm596_vm4, %v4394_v37, %v4404_v34 }
 0xd5d   : > { %6661 = vmatprep.mubr.bf16.mxu0 %v4423_v21 }
 0xd5e   : > { %6662 = vmatmul.mubr.bf16.gmra.mrb[132].mxu0 %v4427_v17 }
 0xd6c   : > { %v4410_v43 = vpop.permute.xlu1 %4409 }
 0xd6d   : > { %v4408_v38 = vpop.permute.xlu0 %4407  ;;  %v4434_v36 = vsel %vm596_vm4, %v4387_v14, %v4410_v43 }
 0xd6e   : > { %v4430_v39 = vsel %vm596_vm4, %v4396_v35, %v4408_v38 }
 0xd6f   : > { %6665 = vmatprep.mubr.bf16.mxu0 %v4430_v39 }
 0xd70   : > { %6666 = vmatmul.mubr.bf16.gmra.mrb[136].mxu0 %v4434_v36 }
 0xd76   : > { %v4414_v41 = vpop.permute.xlu1 %4413 }
 0xd77   : > { %v4412_v42 = vpop.permute.xlu0 %4411  ;;  %v4441_v47 = vsel %vm596_vm4, %v4390_v26, %v4414_v41 }
 0xd78   : > { %v4437_v46 = vsel %vm596_vm4, %v4398_v44, %v4412_v42 }
 0xd79   : > { %6669 = vmatprep.mubr.bf16.mxu0 %v4437_v46 }
 0xd7a   : > { %6670 = vmatmul.mubr.bf16.gmra.mrb[140].mxu0 %v4441_v47 }
 0xe1a   : > { %v6659_v52 = vpop.f32.mrb[128].mxu0 }
 0xe1b   : > { %v5896_v53 = vmul.f32 -1.442695, %v6659_v52  ;;  %v4542_v45 = vpop.f32.mrb[129].mxu0 }
 0xe1c   : > { %v5894_v54 = vmul.f32 -1.442695, %v4542_v45  ;;  %v6660_v55 = vpop.f32.mrb[130].mxu0 }
 0xe1d   : > { %7520 = vpow2.f32 %v5896_v53  ;;  %v5897_v56 = vmul.f32 -1.442695, %v6660_v55  ;;  %v4545_v59 = vpop.f32.mrb[131].mxu0 }
 0xe1e   : > { %7522 = vpow2.f32 %v5894_v54  ;;  %v5895_v57 = vmul.f32 -1.442695, %v4545_v59 }
 0xe1f   : > { %7524 = vpow2.f32 %v5897_v56 }
 0xe20   : > { %7526 = vpow2.f32 %v5895_v57 }
 0xe21   : > { %7528 = vtanh.f32 %v6659_v52 }
 0xe22   : > { %7530 = vtanh.f32 %v4542_v45 }
 0xe23   : > { %7532 = vtanh.f32 %v6660_v55 }
 0xe27   : > { %v7521_v60 = vpop.eup %7520 }
 0xe28   : > { %v7523_v61 = vpop.eup %7522  ;;  %v4671_v1 = vadd.f32 1.0, %v7521_v60 }
 0xe29   : > { %v4669_v62 = vadd.f32 1.0, %v7523_v61  ;;  %v7525_v3 = vpop.eup %7524 }
 0xe2a   : > { %7534 = vrcp.f32 %v4671_v1  ;;  %v4672_v0 = vadd.f32 1.0, %v7525_v3  ;;  %v7527_v4 = vpop.eup %7526 }
 0xe2b   : > { %7536 = vrcp.f32 %v4669_v62  ;;  %v4670_v5 = vadd.f32 1.0, %v7527_v4  ;;  %v7529_v40 = vpop.eup %7528 }
 0xe2c   : > { %7538 = vrcp.f32 %v4672_v0  ;;  %v7531_v15 = vpop.eup %7530 }
 0xe2d   : > { %7540 = vtanh.f32 %v4545_v59  ;;  %v7533_v18 = vpop.eup %7532 }
 0xe2e   : > { %7542 = vrcp.f32 %v4670_v5 }
 0xe31   : > { %v6663_v6 = vpop.f32.mrb[132].mxu0 }
 0xe32   : > { %v5900_v58 = vmul.f32 -1.442695, %v6663_v6  ;;  %v4558_v9 = vpop.f32.mrb[133].mxu0 }
 0xe33   : > { %v5898_v10 = vmul.f32 -1.442695, %v4558_v9  ;;  %v6664_v11 = vpop.f32.mrb[134].mxu0 }
 0xe34   : > { %7544 = vpow2.f32 %v5900_v58  ;;  %v5901_v12 = vmul.f32 -1.442695, %v6664_v11  ;;  %v4561_v14 = vpop.f32.mrb[135].mxu0  ;;  %v7535_v19 = vpop.eup %7534 }
 0xe35   : > { %7546 = vpow2.f32 %v5898_v10  ;;  %v5899_v16 = vmul.f32 -1.442695, %v4561_v14  ;;  %v7537_v7 = vpop.eup %7536  ;;  %v4719_v24 = vmul.f32 %v7535_v19, %v7529_v40 }
 0xe36   : > { %7548 = vpow2.f32 %v5901_v12  ;;  %v7539_v13 = vpop.eup %7538  ;;  %v4717_v26 = vmul.f32 %v7537_v7, %v7531_v15 }
 0xe37   : > { %7550 = vpow2.f32 %v5899_v16  ;;  %v7541_v63 = vpop.eup %7540  ;;  %v4720_v27 = vmul.f32 %v7539_v13, %v7533_v18 }
 0xe38   : > { %v7543_v8 = vpop.eup %7542  ;;  %7552 = vtanh.f32 %v6663_v6 }
 0xe39   : > { %v4734_v23 = vpack.c.bf16 %v4720_v27, %v4719_v24  ;;  %v4718_v31 = vmul.f32 %v7543_v8, %v7541_v63  ;;  %7554 = vtanh.f32 %v4558_v9 }
 0xe3a   : > { %7556 = vtanh.f32 %v6664_v11 }
 0xe3b   : > { %v4733_v33 = vpack.c.bf16 %v4718_v31, %v4717_v26 }
 0xe3d   : > { %6681 = vmatprep.mubr.msk.bf16.mxu0 %vm596_vm4, %v4733_v33 }
 0xe3e   : > { %v7545_v32 = vpop.eup %7544  ;;  %6682 = vmatmul.mubr.msk.bf16.vlgmr.msra.gmra.mrb[144].mxu0 %vm596_vm4, %v4734_v23 }
 0xe3f   : > { %v7547_v20 = vpop.eup %7546  ;;  %v4675_v30 = vadd.f32 1.0, %v7545_v32 }
 0xe40   : > { %v4673_v29 = vadd.f32 1.0, %v7547_v20  ;;  %v7549_v34 = vpop.eup %7548 }
 0xe41   : > { %7558 = vrcp.f32 %v4675_v30  ;;  %v4676_v37 = vadd.f32 1.0, %v7549_v34  ;;  %v7551_v21 = vpop.eup %7550 }
 0xe42   : > { %7560 = vrcp.f32 %v4673_v29  ;;  %v4674_v43 = vadd.f32 1.0, %v7551_v21  ;;  %v7553_v44 = vpop.eup %7552 }
 0xe43   : > { %v6667_v17 = vpop.f32.mrb[136].mxu0  ;;  %7562 = vrcp.f32 %v4676_v37  ;;  %v7555_v47 = vpop.eup %7554 }
 0xe44   : > { %v5904_v38 = vmul.f32 -1.442695, %v6667_v17  ;;  %v4574_v35 = vpop.f32.mrb[137].mxu0  ;;  %7564 = vtanh.f32 %v4561_v14  ;;  %v7557_v48 = vpop.eup %7556 }
 0xe45   : > { %v5902_v39 = vmul.f32 -1.442695, %v4574_v35  ;;  %v6668_v36 = vpop.f32.mrb[138].mxu0  ;;  %7566 = vrcp.f32 %v4674_v43 }
 0xe46   : > { %v4577_v41 = vpop.f32.mrb[139].mxu0  ;;  %7568 = vpow2.f32 %v5904_v38  ;;  %v5905_v42 = vmul.f32 -1.442695, %v6668_v36 }
 0xe47   : > { %7570 = vpow2.f32 %v5902_v39  ;;  %v5903_v46 = vmul.f32 -1.442695, %v4577_v41 }
 0xe48   : > { %7572 = vpow2.f32 %v5905_v42 }
 0xe49   : > { %7574 = vpow2.f32 %v5903_v46 }
 0xe4a   : > { %7576 = vtanh.f32 %v6667_v17 }
 0xe4b   : > { %v7559_v49 = vpop.eup %7558 }
 0xe4c   : > { %v7561_v50 = vpop.eup %7560  ;;  %v4723_v55 = vmul.f32 %v7559_v49, %v7553_v44 }
 0xe4d   : > { %v6671_v51 = vpop.f32.mrb[140].mxu0  ;;  %v7563_v52 = vpop.eup %7562  ;;  %v4721_v0 = vmul.f32 %v7561_v50, %v7555_v47 }
 0xe4e   : > { %v5908_v53 = vmul.f32 -1.442695, %v6671_v51  ;;  %v4590_v45 = vpop.f32.mrb[141].mxu0  ;;  %v7565_v54 = vpop.eup %7564  ;;  %v4724_v56 = vmul.f32 %v7563_v52, %v7557_v48  ;;  %v7036_v52 = vld [vmem:[%s8747_s7] sm:$0xff]  }
 0xe4f   : > { %v5906_v59 = vmul.f32 -1.442695, %v4590_v45  ;;  %v6672_v57 = vpop.f32.mrb[142].mxu0  ;;  %v7567_v60 = vpop.eup %7566  ;;  %6697 = vmatprep.subr.bf16.mxu0 %v7036_v52 }
 0xe50   : > { %7578 = vpow2.f32 %v5908_v53  ;;  %v5909_v61 = vmul.f32 -1.442695, %v6672_v57  ;;  %v4593_v1 = vpop.f32.mrb[143].mxu0  ;;  %v7569_v62 = vpop.eup %7568  ;;  %v4736_v3 = vpack.c.bf16 %v4724_v56, %v4723_v55  ;;  %v4722_v4 = vmul.f32 %v7567_v60, %v7565_v54  ;;  %v7037_v53 = vld [vmem:[%s8747_s7 + $0x8] sm:$0xff]   ;;  %6698 = vmatpush3.bf16.msra.mxu0 %v7036_v52  ;;  %v5521_v55 = vld [vmem:[%s8746_s6] ss:$0 sm:$0xff] }
 0xe51   : > { %7580 = vpow2.f32 %v5906_v59  ;;  %v4679_v5 = vadd.f32 1.0, %v7569_v62  ;;  %v7571_v6 = vpop.eup %7570  ;;  %v5907_v58 = vmul.f32 -1.442695, %v4593_v1  ;;  %6699 = vmatprep.subr.bf16.mxu0 %v7037_v53  ;;  %v7039_v54 = vld [vmem:[%s8749_s9 + $0x8] sm:$0xff]   ;;  %v5605_v56 = vld [vmem:[%s8746_s6 + $0x1] ss:$0 sm:$0xff] }
 0xe52   : > { %7582 = vtanh.f32 %v4574_v35  ;;  %v4735_v9 = vpack.c.bf16 %v4722_v4, %v4721_v0  ;;  %v4677_v10 = vadd.f32 1.0, %v7571_v6  ;;  %v7573_v11 = vpop.eup %7572  ;;  %v6752_v59 = vadd.f32 %v5605_v56, %v5521_v55  ;;  %v5857_v62 = vld [vmem:[%s8746_s6 + $0x4] ss:$0 sm:$0xff] }
 0xe53   : > { %7584 = vpow2.f32 %v5909_v61  ;;  %v4680_v40 = vadd.f32 1.0, %v7573_v11  ;;  %v7575_v12 = vpop.eup %7574  ;;  %v5773_v61 = vld [vmem:[%s8746_s6 + $0x3] ss:$0 sm:$0xff] }
 0xe54   : > { %7586 = vtanh.f32 %v6668_v36  ;;  %6685 = vmatprep.mubr.msk.bf16.mxu1 %vm596_vm4, %v4735_v9  ;;  %v4678_v14 = vadd.f32 1.0, %v7575_v12  ;;  %v7577_v15 = vpop.eup %7576  ;;  %6700 = vmatpush3.bf16.msra.mxu0 %v7037_v53 }
 0xe55   : > { %7588 = vrcp.f32 %v4679_v5  ;;  %6686 = vmatmul.mubr.msk.bf16.vlgmr.msra.gmra.mrb[20].mxu1 %vm596_vm4, %v4736_v3 }
 0xe56   : > { %7590 = vrcp.f32 %v4677_v10 }
 0xe57   : > { %7592 = vpow2.f32 %v5907_v58  ;;  %v5919_v58 = vld [vmem:[%s8746_s6 + $0x5] ss:$0 sm:$0xff] }
 0xe58   : > { %7594 = vrcp.f32 %v4680_v40 }
 0xe59   : > { %7596 = vtanh.f32 %v4577_v41 }
 0xe5a   : > { %v7579_v16 = vpop.eup %7578  ;;  %7598 = vrcp.f32 %v4678_v14 }
 0xe5b   : > { %v7581_v18 = vpop.eup %7580  ;;  %v4683_v19 = vadd.f32 1.0, %v7579_v16  ;;  %7600 = vtanh.f32 %v6671_v51 }
 0xe5c   : > { %v7583_v7 = vpop.eup %7582  ;;  %v4681_v24 = vadd.f32 1.0, %v7581_v18 }
 0xe5d   : > { %v7585_v13 = vpop.eup %7584  ;;  %7602 = vrcp.f32 %v4683_v19 }
 0xe5e   : > { %v7587_v63 = vpop.eup %7586  ;;  %v4684_v27 = vadd.f32 1.0, %v7585_v13  ;;  %7604 = vtanh.f32 %v6672_v57  ;;  %v5689_v57 = vld [vmem:[%s8746_s6 + $0x2] ss:$0 sm:$0xff] }
 0xe5f   : > { %v7589_v8 = vpop.eup %7588  ;;  %v6753_v60 = vadd.f32 %v6752_v59, %v5689_v57 }
 0xe60   : > { %v7591_v23 = vpop.eup %7590  ;;  %7606 = vrcp.f32 %v4684_v27  ;;  %v4727_v20 = vmul.f32 %v7589_v8, %v7577_v15 }
 0xe61   : > { %v7593_v26 = vpop.eup %7592  ;;  %7608 = vtanh.f32 %v4590_v45  ;;  %v4725_v34 = vmul.f32 %v7591_v23, %v7583_v7  ;;  %v7038_v45 = vld [vmem:[%s8749_s9] sm:$0xff]  }
 0xe62   : > { %v7595_v31 = vpop.eup %7594  ;;  %7610 = vrcp.f32 %v4681_v24  ;;  %v4682_v32 = vadd.f32 1.0, %v7593_v26  ;;  %6717 = vmatprep.subr.bf16.mxu1 %v7038_v45 }
 0xe63   : > { %v7597_v33 = vpop.eup %7596  ;;  %7612 = vtanh.f32 %v4593_v1  ;;  %v4728_v30 = vmul.f32 %v7595_v31, %v7587_v63  ;;  %6718 = vmatpush3.bf16.msra.mxu1 %v7038_v45  ;;  %v6754_v1 = vadd.f32 %v6753_v60, %v5773_v61 }
 0xe64   : > { %v7599_v29 = vpop.eup %7598  ;;  %7614 = vrcp.f32 %v4682_v32  ;;  %6719 = vmatprep.subr.bf16.mxu1 %v7039_v54 }
 0xe65   : > { %v4726_v37 = vmul.f32 %v7599_v29, %v7597_v33  ;;  %v4738_v21 = vpack.c.bf16 %v4728_v30, %v4727_v20  ;;  %v7601_v17 = vpop.eup %7600  ;;  %v6769_v3 = vadd.f32 %v6754_v1, %v5857_v62  ;;  %v6748_v0 = vadd.f32 %v6754_v1, %v8480_v22 }
 0xe66   : > { %v6755_v4 = vadd.f32 %v6754_v1, %v8483_v2 }
 0xe67   : > { %v4737_v43 = vpack.c.bf16 %v4726_v37, %v4725_v34  ;;  %v7603_v38 = vpop.eup %7602  ;;  %6720 = vmatpush3.bf16.msra.mxu1 %v7039_v54  ;;  %v6763_v5 = vadd.f32 %v6769_v3, %v8486_v25  ;;  %v6770_v6 = vadd.f32 %v6769_v3, %v8489_v28  ;;  %v6749_v9 = vadd.f32 %v6748_v0, %v5857_v62 }
 0xe68   : > { %v7605_v35 = vpop.eup %7604  ;;  %v4731_v41 = vmul.f32 %v7603_v38, %v7601_v17  ;;  %v6756_v11 = vadd.f32 %v6755_v4, %v5857_v62  ;;  %v6783_v23 = vadd.f32 %v6769_v3, %v5919_v58 }
 0xe69   : > { %6689 = vmatprep.mubr.msk.bf16.mxu1 %vm596_vm4, %v4737_v43  ;;  %v6764_v14 = vadd.f32 %v6763_v5, %v5919_v58  ;;  %v6771_v18 = vadd.f32 %v6770_v6, %v5919_v58 }
 0xe6a   : > { %v7607_v39 = vpop.eup %7606  ;;  %6690 = vmatmul.mubr.msk.bf16.gmra.mrb[24].mxu1 %vm596_vm4, %v4738_v21 }
 0xe6b   : > { %v7609_v36 = vpop.eup %7608  ;;  %v4732_v42 = vmul.f32 %v7607_v39, %v7605_v35 }
 0xe6c   : > { %v7611_v44 = vpop.eup %7610 }
 0xe6d   : > { %v7613_v46 = vpop.eup %7612  ;;  %v4740_v47 = vpack.c.bf16 %v4732_v42, %v4731_v41  ;;  %v4729_v49 = vmul.f32 %v7611_v44, %v7609_v36 }
 0xe6e   : > { %v7615_v48 = vpop.eup %7614 }
 0xe6f   : > { %v4730_v50 = vmul.f32 %v7615_v48, %v7613_v46 }
 0xe71   : > { %v4739_v51 = vpack.c.bf16 %v4730_v50, %v4729_v49 }
 0xe73   : > { %6693 = vmatprep.mubr.msk.bf16.mxu1 %vm596_vm4, %v4739_v51 }
 0xe74   : > { %6694 = vmatmul.mubr.msk.bf16.gmra.mrb[28].mxu1 %vm596_vm4, %v4740_v47 }
 0xf11   : > { %v6683_v10 = vpop.f32.mrb[144].mxu0 }
 0xf12   : > { %v6750_v40 = vadd.f32 %v6749_v9, %v6683_v10  ;;  %v4840_v12 = vpop.f32.mrb[145].mxu0 }
 0xf13   : > { %v6757_v15 = vadd.f32 %v6756_v11, %v4840_v12  ;;  %v6684_v16 = vpop.f32.mrb[146].mxu0 }
 0xf14   : > { %v6751_v22 = vadd.f32 %v6750_v40, %v5919_v58  ;;  %v6765_v19 = vadd.f32 %v6764_v14, %v6684_v16  ;;  %v4843_v2 = vpop.f32.mrb[147].mxu0 }
 0xf15   : > { %v6758_v7 = vadd.f32 %v6757_v15, %v5919_v58  ;;  %v6772_v25 = vadd.f32 %v6771_v18, %v4843_v2  ;;  %v5932_v58 = vld [vmem:[%s8748_s8] ss:$0 sm:$0xff] }
 0xf16   : > { %v4921_v13 = vmax.f32 %v6751_v22, 0.0  ;;  %v4922_v28 = vmax.f32 %v6765_v19, 0.0 }
 0xf17   : > { %v4919_v63 = vmax.f32 %v6758_v7, 0.0  ;;  %v4920_v24 = vmax.f32 %v6772_v25, 0.0 }
 0xf18   : > { %v4936_v27 = vpack.c.bf16 %v4922_v28, %v4921_v13 }
 0xf19   : > { %v4935_v8 = vpack.c.bf16 %v4920_v24, %v4919_v63 }
 0xf1b   : > { %6701 = vmatprep.mubr.msk.bf16.mxu0 %vm539_vm3, %v4935_v8 }
 0xf1c   : > { %6702 = vmatmul.mubr.msk.bf16.vlgmr.msra.gmra.mrb[148].mxu0 %vm539_vm3, %v4936_v27 }
 0xf28   : > { %v6687_v26 = vpop.f32.mrb[20].mxu1 }
 0xf29   : > { %v6778_v31 = vadd.f32 %v6783_v23, %v6687_v26  ;;  %v4856_v32 = vpop.f32.mrb[21].mxu1 }
 0xf2a   : > { %v6784_v33 = vadd.f32 %v6783_v23, %v4856_v32  ;;  %v6688_v20 = vpop.f32.mrb[22].mxu1 }
 0xf2b   : > { %v6790_v30 = vadd.f32 %v6783_v23, %v6688_v20  ;;  %v4859_v29 = vpop.f32.mrb[23].mxu1  ;;  %v4925_v37 = vmax.f32 %v6778_v31, 0.0 }
 0xf2c   : > { %v6796_v34 = vadd.f32 %v6783_v23, %v4859_v29  ;;  %v4923_v17 = vmax.f32 %v6784_v33, 0.0 }
 0xf2d   : > { %v4926_v21 = vmax.f32 %v6790_v30, 0.0 }
 0xf2e   : > { %v4924_v43 = vmax.f32 %v6796_v34, 0.0 }
 0xf2f   : > { %v4938_v38 = vpack.c.bf16 %v4926_v21, %v4925_v37 }
 0xf30   : > { %v4937_v35 = vpack.c.bf16 %v4924_v43, %v4923_v17 }
 0xf32   : > { %6705 = vmatprep.mubr.msk.bf16.mxu0 %vm539_vm3, %v4937_v35 }
 0xf33   : > { %6706 = vmatmul.mubr.msk.bf16.gmra.mrb[152].mxu0 %vm539_vm3, %v4938_v38 }
 0xf3d   : > { %v6691_v39 = vpop.f32.mrb[24].mxu1 }
 0xf3e   : > { %v6802_v36 = vadd.f32 %v6783_v23, %v6691_v39  ;;  %v4872_v41 = vpop.f32.mrb[25].mxu1 }
 0xf3f   : > { %v6808_v42 = vadd.f32 %v6783_v23, %v4872_v41  ;;  %v6692_v44 = vpop.f32.mrb[26].mxu1 }
 0xf40   : > { %v6814_v46 = vadd.f32 %v6783_v23, %v6692_v44  ;;  %v4875_v47 = vpop.f32.mrb[27].mxu1  ;;  %v4929_v49 = vmax.f32 %v6802_v36, 0.0 }
 0xf41   : > { %v6820_v48 = vadd.f32 %v6783_v23, %v4875_v47  ;;  %v4927_v51 = vmax.f32 %v6808_v42, 0.0 }
 0xf42   : > { %v4930_v50 = vmax.f32 %v6814_v46, 0.0 }
 0xf43   : > { %v4928_v52 = vmax.f32 %v6820_v48, 0.0 }
 0xf44   : > { %v4940_v53 = vpack.c.bf16 %v4930_v50, %v4929_v49 }
 0xf45   : > { %v4939_v45 = vpack.c.bf16 %v4928_v52, %v4927_v51 }
 0xf47   : > { %v6695_v54 = vpop.f32.mrb[28].mxu1  ;;  %6709 = vmatprep.mubr.msk.bf16.mxu0 %vm539_vm3, %v4939_v45 }
 0xf48   : > { %v6826_v55 = vadd.f32 %v6783_v23, %v6695_v54  ;;  %v4888_v56 = vpop.f32.mrb[29].mxu1  ;;  %6710 = vmatmul.mubr.msk.bf16.gmra.mrb[156].mxu0 %vm539_vm3, %v4940_v53 }
 0xf49   : > { %v6832_v59 = vadd.f32 %v6783_v23, %v4888_v56  ;;  %v6696_v57 = vpop.f32.mrb[30].mxu1 }
 0xf4a   : > { %v6838_v60 = vadd.f32 %v6783_v23, %v6696_v57  ;;  %v4891_v61 = vpop.f32.mrb[31].mxu1  ;;  %v4933_v62 = vmax.f32 %v6826_v55, 0.0 }
 0xf4b   : > { %v6844_v1 = vadd.f32 %v6783_v23, %v4891_v61  ;;  %v4931_v0 = vmax.f32 %v6832_v59, 0.0 }
 0xf4c   : > { %v4934_v3 = vmax.f32 %v6838_v60, 0.0 }
 0xf4d   : > { %v4932_v4 = vmax.f32 %v6844_v1, 0.0  ;;  %v5943_v1 = vld [vmem:[%s8750_s10] ss:$0 sm:$0xff] }
 0xf4e   : > { %v4942_v5 = vpack.c.bf16 %v4934_v3, %v4933_v62 }
 0xf4f   : > { %v4941_v6 = vpack.c.bf16 %v4932_v4, %v4931_v0 }
 0xf51   : > { %6713 = vmatprep.mubr.msk.bf16.mxu0 %vm539_vm3, %v4941_v6 }
 0xf52   : > { %6714 = vmatmul.mubr.msk.bf16.gmra.mrb[160].mxu0 %vm539_vm3, %v4942_v5 }
 0xfef   : > { %v6703_v9 = vpop.f32.mrb[148].mxu0 }
 0xff0   : > { %v5033_v10 = vadd.f32 %v6703_v9, %v5932_v58  ;;  %v5024_v11 = vpop.f32.mrb[149].mxu0 }
 0xff1   : > { %v5025_v40 = vadd.f32 %v5932_v58, %v5024_v11  ;;  %v6704_v12 = vpop.f32.mrb[150].mxu0 }
 0xff2   : > { %v5036_v14 = vadd.f32 %v6704_v12, %v5932_v58  ;;  %v5027_v15 = vpop.f32.mrb[151].mxu0  ;;  %v5089_v18 = vmax.f32 %v5033_v10, 0.0 }
 0xff3   : > { %v5028_v16 = vadd.f32 %v5932_v58, %v5027_v15  ;;  %v5087_v19 = vmax.f32 %v5025_v40, 0.0 }
 0xff4   : > { %v5090_v22 = vmax.f32 %v5036_v14, 0.0 }
 0xff5   : > { %v5088_v2 = vmax.f32 %v5028_v16, 0.0 }
 0xff6   : > { %v5104_v7 = vpack.c.bf16 %v5090_v22, %v5089_v18 }
 0xff7   : > { %v5103_v25 = vpack.c.bf16 %v5088_v2, %v5087_v19 }
 0xff9   : > { %6721 = vmatprep.mubr.msk.bf16.mxu1 %vm539_vm3, %v5103_v25 }
 0xffa   : > { %6722 = vmatmul.mubr.msk.bf16.vlgmr.msra.gmra.mrb[64].mxu1 %vm539_vm3, %v5104_v7 }
0x1006   : > { %v6707_v13 = vpop.f32.mrb[152].mxu0 }
0x1007   : > { %v5049_v28 = vadd.f32 %v6707_v13, %v5932_v58  ;;  %v5040_v63 = vpop.f32.mrb[153].mxu0 }
0x1008   : > { %v5041_v24 = vadd.f32 %v5932_v58, %v5040_v63  ;;  %v6708_v27 = vpop.f32.mrb[154].mxu0 }
0x1009   : > { %v5052_v8 = vadd.f32 %v6708_v27, %v5932_v58  ;;  %v5043_v23 = vpop.f32.mrb[155].mxu0  ;;  %v5093_v31 = vmax.f32 %v5049_v28, 0.0 }
0x100a   : > { %v5044_v26 = vadd.f32 %v5932_v58, %v5043_v23  ;;  %v5091_v33 = vmax.f32 %v5041_v24, 0.0 }
0x100b   : > { %v5094_v32 = vmax.f32 %v5052_v8, 0.0 }
0x100c   : > { %v5092_v20 = vmax.f32 %v5044_v26, 0.0 }
0x100d   : > { %v5106_v30 = vpack.c.bf16 %v5094_v32, %v5093_v31 }
0x100e   : > { %v5105_v29 = vpack.c.bf16 %v5092_v20, %v5091_v33 }
0x1010   : > { %6725 = vmatprep.mubr.msk.bf16.mxu1 %vm539_vm3, %v5105_v29 }
0x1011   : > { %6726 = vmatmul.mubr.msk.bf16.gmra.mrb[68].mxu1 %vm539_vm3, %v5106_v30 }
0x101b   : > { %v6711_v34 = vpop.f32.mrb[156].mxu0 }
0x101c   : > { %v5065_v37 = vadd.f32 %v6711_v34, %v5932_v58  ;;  %v5056_v21 = vpop.f32.mrb[157].mxu0 }
0x101d   : > { %v5057_v17 = vadd.f32 %v5932_v58, %v5056_v21  ;;  %v6712_v43 = vpop.f32.mrb[158].mxu0 }
0x101e   : > { %v5068_v38 = vadd.f32 %v6712_v43, %v5932_v58  ;;  %v5059_v35 = vpop.f32.mrb[159].mxu0  ;;  %v5097_v36 = vmax.f32 %v5065_v37, 0.0 }
0x101f   : > { %v5060_v39 = vadd.f32 %v5932_v58, %v5059_v35  ;;  %v5095_v42 = vmax.f32 %v5057_v17, 0.0 }
0x1020   : > { %v5098_v41 = vmax.f32 %v5068_v38, 0.0 }
0x1021   : > { %v5096_v44 = vmax.f32 %v5060_v39, 0.0 }
0x1022   : > { %v5108_v46 = vpack.c.bf16 %v5098_v41, %v5097_v36 }
0x1023   : > { %v5107_v47 = vpack.c.bf16 %v5096_v44, %v5095_v42 }
0x1025   : > { %v6715_v48 = vpop.f32.mrb[160].mxu0  ;;  %6729 = vmatprep.mubr.msk.bf16.mxu1 %vm539_vm3, %v5107_v47 }
0x1026   : > { %v5081_v49 = vadd.f32 %v6715_v48, %v5932_v58  ;;  %v5072_v50 = vpop.f32.mrb[161].mxu0  ;;  %6730 = vmatmul.mubr.msk.bf16.gmra.mrb[72].mxu1 %vm539_vm3, %v5108_v46 }
0x1027   : > { %v5073_v51 = vadd.f32 %v5932_v58, %v5072_v50  ;;  %v6716_v52 = vpop.f32.mrb[162].mxu0 }
0x1028   : > { %v5084_v53 = vadd.f32 %v6716_v52, %v5932_v58  ;;  %v5075_v45 = vpop.f32.mrb[163].mxu0  ;;  %v5101_v55 = vmax.f32 %v5081_v49, 0.0 }
0x1029   : > { %v5076_v54 = vadd.f32 %v5932_v58, %v5075_v45  ;;  %v5099_v59 = vmax.f32 %v5073_v51, 0.0 }
0x102a   : > { %v5102_v56 = vmax.f32 %v5084_v53, 0.0 }
0x102b   : > { %v5100_v57 = vmax.f32 %v5076_v54, 0.0 }
0x102c   : > { %v5110_v60 = vpack.c.bf16 %v5102_v56, %v5101_v55 }
0x102d   : > { %v5109_v61 = vpack.c.bf16 %v5100_v57, %v5099_v59 }
0x102f   : > { %6733 = vmatprep.mubr.msk.bf16.mxu1 %vm539_vm3, %v5109_v61 }
0x1030   : > { %6734 = vmatmul.mubr.msk.bf16.gmra.mrb[76].mxu1 %vm539_vm3, %v5110_v60 }
0x10cd   : > { %v6723_v62 = vpop.f32.mrb[64].mxu1 }
0x10ce   : > { %v5200_v3 = vadd.f32 %v6723_v62, %v5943_v1  ;;  %v5192_v0 = vpop.f32.mrb[65].mxu1 }
0x10cf   : > { %v6724_v4 = vpop.f32.mrb[66].mxu1 }
0x10d0   : > { %v5203_v5 = vadd.f32 %v6724_v4, %v5943_v1  ;;  %v5194_v6 = vpop.f32.mrb[67].mxu1  ;;  %v5254_v58 = vsel %vm539_vm3, %v5200_v3, -inf }
0x10d1   : > { %5255 = vmax.xlane.f32.xlu1 %v5254_v58  ;;  %v5195_v9 = vadd.f32 %v5943_v1, %v5194_v6 }
0x10d2   : > { %v5257_v10 = vsel %vm539_vm3, %v5203_v5, -inf }
0x10d3   : > { %5258 = vmax.xlane.f32.xlu0 %v5257_v10  ;;  %v5251_v11 = vsel %vm539_vm3, %v5195_v9, -inf }
0x10d7   : > { %5252 = vmax.xlane.f32.xlu0 %v5251_v11 }
0x10e4   : > { %v6727_v40 = vpop.f32.mrb[68].mxu1 }
0x10e5   : > { %v5215_v12 = vadd.f32 %v6727_v40, %v5943_v1  ;;  %v5207_v14 = vpop.f32.mrb[69].mxu1 }
0x10e6   : > { %v6728_v15 = vpop.f32.mrb[70].mxu1 }
0x10e7   : > { %v5218_v16 = vadd.f32 %v6728_v15, %v5943_v1  ;;  %v5209_v18 = vpop.f32.mrb[71].mxu1  ;;  %v5263_v22 = vsel %vm539_vm3, %v5215_v12, -inf }
0x10e8   : > { %5264 = vmax.xlane.f32.xlu1 %v5263_v22  ;;  %v5210_v19 = vadd.f32 %v5943_v1, %v5209_v18 }
0x10e9   : > { %v5266_v2 = vsel %vm539_vm3, %v5218_v16, -inf }
0x10ea   : > { %5267 = vmax.xlane.f32.xlu0 %v5266_v2  ;;  %v5260_v7 = vsel %vm539_vm3, %v5210_v19, -inf }
0x10ee   : > { %5261 = vmax.xlane.f32.xlu0 %v5260_v7 }
0x10f9   : > { %v6731_v25 = vpop.f32.mrb[72].mxu1 }
0x10fa   : > { %v8617_v13 = vadd.f32 %v6731_v25, %v5943_v1  ;;  %v5222_v28 = vpop.f32.mrb[73].mxu1 }
0x10fb   : > { %v6732_v63 = vpop.f32.mrb[74].mxu1 }
0x10fc   : > { %v8619_v24 = vadd.f32 %v6732_v63, %v5943_v1  ;;  %v5224_v27 = vpop.f32.mrb[75].mxu1  ;;  %v5272_v8 = vsel %vm539_vm3, %v8617_v13, -inf }
0x10fd   : > { %5273 = vmax.xlane.f32.xlu0 %v5272_v8  ;;  %v8623_v23 = vadd.f32 %v5943_v1, %v5224_v27 }
0x10fe   : > { %v5275_v26 = vsel %vm539_vm3, %v8619_v24, -inf }
0x10ff   : > { %5276 = vmax.xlane.f32.xlu1 %v5275_v26  ;;  %v5269_v31 = vsel %vm539_vm3, %v8623_v23, -inf }
0x1103   : > { %v6735_v32 = vpop.f32.mrb[76].mxu1  ;;  %5270 = vmax.xlane.f32.xlu1 %v5269_v31 }
0x1104   : > { %v8629_v33 = vadd.f32 %v6735_v32, %v5943_v1  ;;  %v5237_v20 = vpop.f32.mrb[77].mxu1 }
0x1105   : > { %v6736_v30 = vpop.f32.mrb[78].mxu1 }
0x1106   : > { %v5239_v29 = vpop.f32.mrb[79].mxu1  ;;  %v5281_v34 = vsel %vm539_vm3, %v8629_v33, -inf  ;;  %v8635_v21 = vadd.f32 %v6736_v30, %v5943_v1 }
0x1107   : > { %v8633_v37 = vadd.f32 %v5943_v1, %v5239_v29  ;;  %5282 = vmax.xlane.f32.xlu1 %v5281_v34 }
0x1108   : > { %v5284_v43 = vsel %vm539_vm3, %v8635_v21, -inf }
0x1109   : > { %v5278_v17 = vsel %vm539_vm3, %v8633_v37, -inf }
0x110a   : > { %5279 = vmax.xlane.f32.xlu0 %v5278_v17 }
0x110e   : > { %5285 = vmax.xlane.f32.xlu0 %v5284_v43 }
0x115e   : > { %v5256_v38 = vpop.xlane.xlu1 %5255 }
0x115f   : > { %v5288_v35 = vsub.f32 %v5200_v3, %v5256_v38 }
0x1160   : > { %v5259_v39 = vpop.xlane.xlu0 %5258 }
0x1161   : > { %v5301_v36 = vmul.f32 1.442695, %v5288_v35  ;;  %v5289_v41 = vsub.f32 %v5203_v5, %v5259_v39 }
0x1163   : > { %7616 = vpow2.f32 %v5301_v36  ;;  %v5303_v42 = vmul.f32 1.442695, %v5289_v41 }
0x1164   : > { %v5253_v44 = vpop.xlane.xlu0 %5252 }
0x1165   : > { %7618 = vpow2.f32 %v5303_v42  ;;  %v5287_v46 = vsub.f32 %v5195_v9, %v5253_v44 }
0x1167   : > { %v5299_v47 = vmul.f32 1.442695, %v5287_v46 }
0x1169   : > { %7620 = vpow2.f32 %v5299_v47 }
0x116d   : > { %v8641_v48 = vpop.eup %7616 }
0x116e   : > { %v5326_v49 = vsel %vm539_vm3, %v8641_v48, 0.0 }
0x116f   : > { %v8645_v50 = vpop.eup %7618  ;;  %5327 = vadd.xlane.f32.xlu0 %v5326_v49 }
0x1170   : > { %v5329_v51 = vsel %vm539_vm3, %v8645_v50, 0.0 }
0x1171   : > { %5330 = vadd.xlane.f32.xlu1 %v5329_v51 }
0x1173   : > { %v8649_v52 = vpop.eup %7620 }
0x1174   : > { %v5323_v54 = vsel %vm539_vm3, %v8649_v52, 0.0 }
0x1175   : > { %v5265_v53 = vpop.xlane.xlu1 %5264  ;;  %5324 = vadd.xlane.f32.xlu1 %v5323_v54 }
0x1176   : > { %v5291_v45 = vsub.f32 %v5215_v12, %v5265_v53 }
0x1177   : > { %v5268_v55 = vpop.xlane.xlu0 %5267 }
0x1178   : > { %v5307_v56 = vmul.f32 1.442695, %v5291_v45  ;;  %v5292_v59 = vsub.f32 %v5218_v16, %v5268_v55 }
0x117a   : > { %7622 = vpow2.f32 %v5307_v56  ;;  %v5309_v57 = vmul.f32 1.442695, %v5292_v59 }
0x117b   : > { %v5262_v60 = vpop.xlane.xlu0 %5261 }
0x117c   : > { %7624 = vpow2.f32 %v5309_v57  ;;  %v5290_v61 = vsub.f32 %v5210_v19, %v5262_v60 }
0x117e   : > { %v5305_v1 = vmul.f32 1.442695, %v5290_v61 }
0x1180   : > { %7626 = vpow2.f32 %v5305_v1 }
0x1184   : > { %v8653_v62 = vpop.eup %7622 }
0x1185   : > { %v5335_v3 = vsel %vm539_vm3, %v8653_v62, 0.0 }
0x1186   : > { %v8657_v0 = vpop.eup %7624  ;;  %5336 = vadd.xlane.f32.xlu1 %v5335_v3 }
0x1187   : > { %v5338_v4 = vsel %vm539_vm3, %v8657_v0, 0.0 }
0x1188   : > { %5339 = vadd.xlane.f32.xlu0 %v5338_v4 }
0x118a   : > { %v5274_v5 = vpop.xlane.xlu0 %5273  ;;  %v8661_v6 = vpop.eup %7626 }
0x118b   : > { %v5294_v58 = vsub.f32 %v8617_v13, %v5274_v5  ;;  %v5332_v10 = vsel %vm539_vm3, %v8661_v6, 0.0 }
0x118c   : > { %v5277_v9 = vpop.xlane.xlu1 %5276  ;;  %5333 = vadd.xlane.f32.xlu0 %v5332_v10 }
0x118d   : > { %v5295_v11 = vsub.f32 %v8619_v24, %v5277_v9  ;;  %v5313_v40 = vmul.f32 1.442695, %v5294_v58 }
0x118f   : > { %v5315_v12 = vmul.f32 1.442695, %v5295_v11  ;;  %7628 = vpow2.f32 %v5313_v40 }
0x1190   : > { %v5271_v14 = vpop.xlane.xlu1 %5270 }
0x1191   : > { %7630 = vpow2.f32 %v5315_v12  ;;  %v5293_v15 = vsub.f32 %v8623_v23, %v5271_v14 }
0x1193   : > { %v5311_v16 = vmul.f32 1.442695, %v5293_v15 }
0x1194   : > { %v5283_v18 = vpop.xlane.xlu1 %5282 }
0x1195   : > { %7632 = vpow2.f32 %v5311_v16  ;;  %v5297_v22 = vsub.f32 %v8629_v33, %v5283_v18 }
0x1197   : > { %v5319_v19 = vmul.f32 1.442695, %v5297_v22  ;;  %v5280_v2 = vpop.xlane.xlu0 %5279 }
0x1198   : > { %v5296_v7 = vsub.f32 %v8633_v37, %v5280_v2 }
0x1199   : > { %v8670_v25 = vpop.eup %7628  ;;  %7634 = vpow2.f32 %v5319_v19 }
0x119a   : > { %v5317_v13 = vmul.f32 1.442695, %v5296_v7  ;;  %v5344_v28 = vsel %vm539_vm3, %v8670_v25, 0.0 }
0x119b   : > { %v8674_v63 = vpop.eup %7630  ;;  %v5286_v24 = vpop.xlane.xlu0 %5285  ;;  %5345 = vadd.xlane.f32.xlu0 %v5344_v28 }
0x119c   : > { %7636 = vpow2.f32 %v5317_v13  ;;  %v5298_v27 = vsub.f32 %v8635_v21, %v5286_v24  ;;  %v5347_v8 = vsel %vm539_vm3, %v8674_v63, 0.0 }
0x119d   : > { %5348 = vadd.xlane.f32.xlu1 %v5347_v8 }
0x119e   : > { %v5321_v23 = vmul.f32 1.442695, %v5298_v27 }
0x119f   : > { %v8679_v26 = vpop.eup %7632 }
0x11a0   : > { %7638 = vpow2.f32 %v5321_v23  ;;  %v5341_v31 = vsel %vm539_vm3, %v8679_v26, 0.0 }
0x11a1   : > { %5342 = vadd.xlane.f32.xlu1 %v5341_v31 }
0x11a3   : > { %v8683_v32 = vpop.eup %7634 }
0x11a4   : > { %v5353_v33 = vsel %vm539_vm3, %v8683_v32, 0.0 }
0x11a5   : > { %5354 = vadd.xlane.f32.xlu1 %v5353_v33 }
0x11a6   : > { %v8687_v20 = vpop.eup %7636 }
0x11a7   : > { %v5350_v30 = vsel %vm539_vm3, %v8687_v20, 0.0 }
0x11a8   : > { %5351 = vadd.xlane.f32.xlu0 %v5350_v30 }
0x11aa   : > { %v8691_v29 = vpop.eup %7638 }
0x11ab   : > { %v5356_v34 = vsel %vm539_vm3, %v8691_v29, 0.0 }
0x11ac   : > { %5357 = vadd.xlane.f32.xlu0 %v5356_v34 }
0x11fc   : > { %v5328_v37 = vpop.xlane.xlu0 %5327 }
0x11fd   : > { %7640 = vrcp.f32 %v5328_v37 }
0x11fe   : > { %v5331_v21 = vpop.xlane.xlu1 %5330 }
0x11ff   : > { %7642 = vrcp.f32 %v5331_v21 }
0x1202   : > { %v5325_v17 = vpop.xlane.xlu1 %5324 }
0x1203   : > { %7644 = vrcp.f32 %v5325_v17 }
0x1207   : > { %v7641_v43 = vpop.eup %7640 }
0x1208   : > { %v5372_v38 = vmul.f32 %v7641_v43, %v8641_v48 }
0x1209   : > { %v7643_v35 = vpop.eup %7642 }
0x120a   : > { %5385 = vst.msk [vmem:[%s8699_s26 + $0x2] sm:$0xff] %vm539_vm3, %v5372_v38  ;;  %v5373_v39 = vmul.f32 %v7643_v35, %v8645_v50 }
0x120c   : > { %5386 = vst.msk [vmem:[%s8699_s26 + $0xa] sm:$0xff] %vm539_vm3, %v5373_v39 }
0x120d   : > { %v7645_v36 = vpop.eup %7644 }
0x120e   : > { %v5371_v41 = vmul.f32 %v7645_v36, %v8649_v52 }
0x1210   : > { %5384 = vst.msk [vmem:[%s8699_s26 - $0x6] sm:$0xc0] %vm5383_vm6, %v5371_v41 }
0x1213   : > { %v5337_v42 = vpop.xlane.xlu1 %5336 }
0x1214   : > { %7646 = vrcp.f32 %v5337_v42 }
0x1215   : > { %v5340_v44 = vpop.xlane.xlu0 %5339 }
0x1216   : > { %7648 = vrcp.f32 %v5340_v44 }
0x1219   : > { %v5334_v46 = vpop.xlane.xlu0 %5333 }
0x121a   : > { %7650 = vrcp.f32 %v5334_v46 }
0x121e   : > { %v7647_v47 = vpop.eup %7646 }
0x121f   : > { %v5375_v48 = vmul.f32 %v7647_v47, %v8653_v62 }
0x1220   : > { %v7649_v49 = vpop.eup %7648 }
0x1221   : > { %5388 = vst.msk [vmem:[%s8699_s26 + $0x1a] sm:$0xff] %vm539_vm3, %v5375_v48  ;;  %v5376_v50 = vmul.f32 %v7649_v49, %v8657_v0 }
0x1223   : > { %5389 = vst.msk [vmem:[%s8699_s26 + $0x22] sm:$0xff] %vm539_vm3, %v5376_v50 }
0x1224   : > { %v7651_v51 = vpop.eup %7650 }
0x1225   : > { %v5374_v52 = vmul.f32 %v7651_v51, %v8661_v6 }
0x1227   : > { %5387 = vst.msk [vmem:[%s8699_s26 + $0x12] sm:$0xc0] %vm5383_vm6, %v5374_v52 }
0x1228   : > { %v5346_v53 = vpop.xlane.xlu0 %5345 }
0x1229   : > { %7652 = vrcp.f32 %v5346_v53 }
0x122a   : > { %v5349_v45 = vpop.xlane.xlu1 %5348 }
0x122b   : > { %7654 = vrcp.f32 %v5349_v45 }
0x122e   : > { %v5343_v54 = vpop.xlane.xlu1 %5342 }
0x122f   : > { %7656 = vrcp.f32 %v5343_v54 }
0x1232   : > { %v5355_v55 = vpop.xlane.xlu1 %5354 }
0x1233   : > { %v7653_v56 = vpop.eup %7652  ;;  %7658 = vrcp.f32 %v5355_v55 }
0x1234   : > { %v5378_v59 = vmul.f32 %v7653_v56, %v8670_v25 }
0x1235   : > { %v7655_v57 = vpop.eup %7654  ;;  %v5352_v60 = vpop.xlane.xlu0 %5351 }
0x1236   : > { %v5379_v61 = vmul.f32 %v7655_v57, %v8674_v63  ;;  %5391 = vst.msk [vmem:[%s8699_s26 + $0x32] sm:$0xff] %vm539_vm3, %v5378_v59  ;;  %7660 = vrcp.f32 %v5352_v60 }
0x1238   : > { %5392 = vst.msk [vmem:[%s8699_s26 + $0x3a] sm:$0xff] %vm539_vm3, %v5379_v61 }
0x1239   : > { %v7657_v1 = vpop.eup %7656  ;;  %v5358_v62 = vpop.xlane.xlu0 %5357 }
0x123a   : > { %v5377_v3 = vmul.f32 %v7657_v1, %v8679_v26  ;;  %7662 = vrcp.f32 %v5358_v62 }
0x123c   : > { %5390 = vst.msk [vmem:[%s8699_s26 + $0x2a] sm:$0xc0] %vm5383_vm6, %v5377_v3 }
0x123d   : > { %v7659_v0 = vpop.eup %7658 }
0x123e   : > { %v5381_v4 = vmul.f32 %v7659_v0, %v8683_v32 }
0x1240   : > { %v7661_v5 = vpop.eup %7660  ;;  %5394 = vst.msk [vmem:[%s8699_s26 + $0x4a] sm:$0xff] %vm539_vm3, %v5381_v4 }
0x1241   : > { %v5380_v6 = vmul.f32 %v7661_v5, %v8687_v20 }
0x1243   : > { %5393 = vst.msk [vmem:[%s8699_s26 + $0x42] sm:$0xc0] %vm5383_vm6, %v5380_v6 }
0x1244   : > { %v7663_v58 = vpop.eup %7662 }
0x1245   : > { %v5382_v9 = vmul.f32 %v7663_v58, %v8691_v29 }
0x1247   : > { %5395 = vst.msk [vmem:[%s8699_s26 + $0x52] sm:$0xff] %vm539_vm3, %v5382_v9 }
0x1248 PF: > { %s21_s17 = sadd.s32 1, %s7670_s17  }
0x1249   : > { %p18_p4 = scmp.ge.s32.totalorder %s21_s17, 4  }
0x124b   :  { %20 = sbr.rel (!%p18_p4) target bundleno = 1 (0x1), region = 117 }

</bundles_post_ra>
